<compile_context>
chip_gen: v6e
topology: v6e:2x2x1
jax: 0.10.0
libtpu: 0.0.40
codegen_flags: <defaults>
</compile_context>

<pallas_src>
import functools

import numpy as np
import jax
import jax.numpy as jnp
from jax import lax
from jax.experimental import pallas as pl
from jax.experimental.pallas import tpu as pltpu


def mkrb_kernel(img_w, pad, x_ref, w1_ref, b1_ref, w2_ref, b2_ref,
                mask3_ref, mask5_ref, out_ref, xe_ref, p_ref):
    # x_ref        : (NB, C, HW) f32   NB samples, flattened spatial dim on lanes
    # w1_ref       : (C, 9*C)  bf16    BN-folded 3x3 weights, cols ordered (kh, kw, ci)
    # w2_ref       : (C, 25*C) bf16    BN-folded 5x5 weights, cols ordered (kh, kw, ci)
    # b1_ref/b2_ref: (C, 1) f32        BN-folded biases
    # mask3/mask5  : (K*K, NB*HW) f32  0/1 conv zero-padding validity masks
    #                                  (per-sample pattern tiled NB times on lanes)
    # out_ref      : (NB, C, HW) f32
    # xe_ref       : (C, L) f32        lane-extended scratch, L = pad + NB*HW + pad;
    #                                  holds x first, then `fused` (borders stay 0)
    # p_ref        : (25*C, NB*HW) bf16  merged im2col scratch (conv1 uses rows :9*C)
    nb, c, hw = x_ref.shape
    L = xe_ref.shape[-1]
    cols = nb * hw

    # ---- stage the NB samples into the halo'd scratch; zero only the halos ----
    xe_ref[:, :pad] = jnp.zeros((c, pad), jnp.float32)
    xe_ref[:, pad + cols:] = jnp.zeros((c, L - pad - cols), jnp.float32)
    for n in range(nb):
        xe_ref[:, pad + n * hw: pad + (n + 1) * hw] = x_ref[n]

    def conv(w_ref, b_ref, m_ref, k):
        # Per-tap shifted + masked slabs -> bf16 im2col rows -> one MXU matmul
        # (bf16 x bf16 inputs, f32 accumulation).  The masks zero out positions
        # whose tap falls outside the image, so cross-sample bleed through the
        # concatenated lane layout is harmless.
        half = k // 2
        kk = k * k
        for kh in range(k):
            for kw in range(k):
                t = kh * k + kw
                s = pad + (kh - half) * img_w + (kw - half)   # static lane offset
                slab = xe_ref[:, s:s + cols]
                if not (kh == half and kw == half):           # centre tap: mask == 1
                    slab = slab * m_ref[t:t + 1, :]
                p_ref[t * c:(t + 1) * c, :] = slab.astype(jnp.bfloat16)
        acc = jnp.dot(w_ref[...], p_ref[:kk * c, :],
                      preferred_element_type=jnp.float32)
        return acc + b_ref[...]

    # ---- branch 1: Conv3x3(pad=1) + folded BN + ReLU, residual add, ReLU ----
    y0 = jnp.maximum(conv(w1_ref, b1_ref, mask3_ref, 3), 0.0)
    fused = jnp.maximum(y0 + xe_ref[:, pad:pad + cols], 0.0)
    xe_ref[:, pad:pad + cols] = fused            # reuse halo'd scratch for `fused`

    # ---- branch 2: Conv5x5(pad=2) + folded BN + ReLU, residual add, ReLU ----
    # TODO(synk): nn.Dropout2d is identity in eval mode; training-mode dropout and
    # BatchNorm batch-statistics updates are not implemented.
    y1 = jnp.maximum(conv(w2_ref, b2_ref, mask5_ref, 5), 0.0)
    out = jnp.maximum(y1 + xe_ref[:, pad:pad + cols], 0.0)    # re-read fused
    for n in range(nb):
        out_ref[n] = out[:, n * hw:(n + 1) * hw]


def _make_masks(K, H, W):
    """0/1 float32 masks (K*K, H*W): valid positions of each conv tap (zero pad)."""
    P = K // 2
    hh = np.arange(H * W) // W
    ww = np.arange(H * W) % W
    rows = []
    for kh in range(K):
        for kw in range(K):
            dh, dw = kh - P, kw - P
            valid = ((hh + dh >= 0) & (hh + dh < H) &
                     (ww + dw >= 0) & (ww + dw < W))
            rows.append(valid.astype(np.float32))
    return np.stack(rows)


def fold_bn(w, b, gamma, beta, mean, var, eps=1e-5):
    """Fold eval-mode BatchNorm2d into conv weight (Cout,Cin,K,K) and bias (Cout,)."""
    scale = gamma / jnp.sqrt(var + eps)
    w_f = w * scale[:, None, None, None]
    b_f = beta + (b - mean) * scale
    return w_f, b_f


@jax.jit
def mkrb_apply(x_nchw, w1_2d, b1_col, w2_2d, b2_col):
    N, C, H, W = x_nchw.shape
    HW = H * W

    # Samples per grid step: NB samples are concatenated along the lane axis so
    # each conv is one wide matmul and per-step overhead is amortized.
    NB = 1
    for cand in (8, 4, 2):
        if N % cand == 0:
            NB = cand
            break

    halo = 2 * (W + 1)                     # max |lane shift| of the 5x5 taps
    PAD = ((halo + 63) // 64) * 64         # >= halo; rounded for nicer lane offsets
    L = 2 * PAD + NB * HW

    # lane-dense flattening (pure reshape, no transpose, no HBM-side padding)
    x_flat = x_nchw.reshape(N, C, HW).astype(jnp.float32)

    # conv zero-padding validity masks, tiled per sample along the lane axis.
    mask3 = jnp.asarray(np.tile(_make_masks(3, H, W), (1, NB)))
    mask5 = jnp.asarray(np.tile(_make_masks(5, H, W), (1, NB)))

    grid_spec = pltpu.PrefetchScalarGridSpec(
        num_scalar_prefetch=0,
        grid=(N // NB,),
        in_specs=[
            pl.BlockSpec((NB, C, HW), lambda g: (g, 0, 0)),   # x (unpadded)
            pl.BlockSpec((C, 9 * C), lambda g: (0, 0)),       # w1 (bf16, BN-folded)
            pl.BlockSpec((C, 1), lambda g: (0, 0)),           # b1
            pl.BlockSpec((C, 25 * C), lambda g: (0, 0)),      # w2 (bf16, BN-folded)
            pl.BlockSpec((C, 1), lambda g: (0, 0)),           # b2
            pl.BlockSpec((9, NB * HW), lambda g: (0, 0)),     # 3x3 masks
            pl.BlockSpec((25, NB * HW), lambda g: (0, 0)),    # 5x5 masks
        ],
        out_specs=pl.BlockSpec((NB, C, HW), lambda g: (g, 0, 0)),
        scratch_shapes=[
            pltpu.VMEM((C, L), jnp.float32),                  # halo'd x / fused
            pltpu.VMEM((25 * C, NB * HW), jnp.bfloat16),      # merged im2col patches
        ],
    )

    out_flat = pl.pallas_call(
        functools.partial(mkrb_kernel, W, PAD),
        out_shape=jax.ShapeDtypeStruct((N, C, HW), jnp.float32),
        grid_spec=grid_spec,
        compiler_params=pltpu.CompilerParams(
            dimension_semantics=("parallel",)),               # batch blocks across cores
    )(x_flat, w1_2d, b1_col, w2_2d, b2_col, mask3, mask5)

    return out_flat.reshape(N, C, H, W)


def ref_forward(x, w1, b1, bn1, w2, b2, bn2, eps=1e-5):
    """Pure-JAX reference of the PyTorch MKRB forward (eval mode, f32 precision)."""
    def conv_bn_relu(inp, w, b, bn, pad):
        gamma, beta, mean, var = bn
        y = lax.conv_general_dilated(
            inp, w, window_strides=(1, 1), padding=[(pad, pad), (pad, pad)],
            dimension_numbers=('NCHW', 'OIHW', 'NCHW'),
            precision=lax.Precision.HIGHEST)
        y = y + b[None, :, None, None]
        y = (gamma[None, :, None, None] * (y - mean[None, :, None, None])
             / jnp.sqrt(var + eps)[None, :, None, None] + beta[None, :, None, None])
        return jnp.maximum(y, 0.0)

    y0 = conv_bn_relu(x, w1, b1, bn1, 1)
    fused = jnp.maximum(y0 + x, 0.0)
    y1 = conv_bn_relu(fused, w2, b2, bn2, 2)
    return jnp.maximum(y1 + fused, 0.0)


if __name__ == "__main__":
    N, C, H, W = 2, 4, 16, 16  # in_channels == out_channels (residual add requires it)
    key = jax.random.PRNGKey(0)
    ks = jax.random.split(key, 13)

    x = jax.random.normal(ks[0], (N, C, H, W), jnp.float32)

    # conv1 (3x3) + BN1 params (deterministic synthetic init)
    w1 = 0.1 * jax.random.normal(ks[1], (C, C, 3, 3), jnp.float32)
    b1 = 0.1 * jax.random.normal(ks[2], (C,), jnp.float32)
    g1 = 1.0 + 0.1 * jax.random.normal(ks[3], (C,), jnp.float32)
    be1 = 0.1 * jax.random.normal(ks[4], (C,), jnp.float32)
    m1 = 0.1 * jax.random.normal(ks[5], (C,), jnp.float32)
    v1 = 1.0 + 0.1 * jnp.abs(jax.random.normal(ks[6], (C,), jnp.float32))

    # conv2 (5x5) + BN2 params
    w2 = 0.1 * jax.random.normal(ks[7], (C, C, 5, 5), jnp.float32)
    b2 = 0.1 * jax.random.normal(ks[8], (C,), jnp.float32)
    g2 = 1.0 + 0.1 * jax.random.normal(ks[9], (C,), jnp.float32)
    be2 = 0.1 * jax.random.normal(ks[10], (C,), jnp.float32)
    m2 = 0.1 * jax.random.normal(ks[11], (C,), jnp.float32)
    v2 = 1.0 + 0.1 * jnp.abs(jax.random.normal(ks[12], (C,), jnp.float32))

    # fold BN (eval mode) into conv weights/bias and lay out for the kernel:
    # columns ordered (kh, kw, ci) to match the im2col patch rows; weights cast
    # to bf16 for the MXU (per perf review), biases kept in f32.
    w1f, b1f = fold_bn(w1, b1, g1, be1, m1, v1)
    w2f, b2f = fold_bn(w2, b2, g2, be2, m2, v2)
    w1_2d = jnp.transpose(w1f, (0, 2, 3, 1)).reshape(C, 3 * 3 * C).astype(jnp.bfloat16)
    w2_2d = jnp.transpose(w2f, (0, 2, 3, 1)).reshape(C, 5 * 5 * C).astype(jnp.bfloat16)
    b1_col = b1f.reshape(C, 1).astype(jnp.float32)
    b2_col = b2f.reshape(C, 1).astype(jnp.float32)

    out = mkrb_apply(x, w1_2d, b1_col, w2_2d, b2_col)
    out = jax.block_until_ready(out)

    # correctness check against pure-JAX f32 reference of the PyTorch forward.
    # Tolerance reflects bf16 MXU operands (weights + im2col patches rounded to
    # bf16, f32 accumulation) vs the HIGHEST-precision f32 reference.
    expected = ref_forward(x, w1, b1, (g1, be1, m1, v1), w2, b2, (g2, be2, m2, v2))
    if not jnp.allclose(out, expected, rtol=1e-2, atol=1e-2):
        err = float(jnp.max(jnp.abs(out - expected)))
        raise AssertionError(
            f"Pallas MKRB output mismatch vs reference (max |err| = {err:.3e})")

    print("KERNEL_OK")
</pallas_src>

<mosaic_0001>
module attributes {stable_mosaic.version = 11 : i64} {
  func.func @mkrb_kernel(%arg0: i32, %arg1: memref<2x4x256xf32, #tpu.memory_space<vmem>>, %arg2: memref<4x36xbf16, #tpu.memory_space<vmem>>, %arg3: memref<4x1xf32, #tpu.memory_space<vmem>>, %arg4: memref<4x100xbf16, #tpu.memory_space<vmem>>, %arg5: memref<4x1xf32, #tpu.memory_space<vmem>>, %arg6: memref<9x512xf32, #tpu.memory_space<vmem>>, %arg7: memref<25x512xf32, #tpu.memory_space<vmem>>, %arg8: memref<2x4x256xf32, #tpu.memory_space<vmem>>, %arg9: memref<4x640xf32, #tpu.memory_space<vmem>>, %arg10: memref<100x512xbf16, #tpu.memory_space<vmem>>) attributes {dimension_semantics = [#tpu.dimension_semantics<parallel>], iteration_bounds = array<i64: 1>, scalar_prefetch = 0 : i64, scratch_operands = 2 : i64, tpu.core_type = #tpu.core_type<tc>, window_params = [{transform_indices = @transform_0, window_bounds = array<i64: 2, 4, 256>}, {pipeline_mode = #tpu.pipeline_mode<synchronous>, transform_indices = @transform_1, window_bounds = array<i64: 4, 36>}, {pipeline_mode = #tpu.pipeline_mode<synchronous>, transform_indices = @transform_2, window_bounds = array<i64: 4, 1>}, {pipeline_mode = #tpu.pipeline_mode<synchronous>, transform_indices = @transform_3, window_bounds = array<i64: 4, 100>}, {pipeline_mode = #tpu.pipeline_mode<synchronous>, transform_indices = @transform_4, window_bounds = array<i64: 4, 1>}, {pipeline_mode = #tpu.pipeline_mode<synchronous>, transform_indices = @transform_5, window_bounds = array<i64: 9, 512>}, {pipeline_mode = #tpu.pipeline_mode<synchronous>, transform_indices = @transform_6, window_bounds = array<i64: 25, 512>}, {transform_indices = @transform_7, window_bounds = array<i64: 2, 4, 256>}]} {
    %cst = arith.constant 0.000000e+00 : f32
    %0 = vector.broadcast %cst : f32 to vector<4x64xf32>
    %c0 = arith.constant 0 : index
    %c0_0 = arith.constant 0 : index
    %1 = vector.load %arg9[%c0, %c0_0] : memref<4x640xf32, #tpu.memory_space<vmem>>, vector<4x64xf32>
    tpu.vector_store %arg9[%c0, %c0_0], %0 {strides = array<i32>} : memref<4x640xf32, #tpu.memory_space<vmem>>, vector<4x64xf32>,
    %cst_1 = arith.constant 0.000000e+00 : f32
    %2 = vector.broadcast %cst_1 : f32 to vector<4x64xf32>
    %c0_2 = arith.constant 0 : index
    %c576 = arith.constant 576 : index
    %3 = vector.load %arg9[%c0_2, %c576] : memref<4x640xf32, #tpu.memory_space<vmem>>, vector<4x64xf32>
    tpu.vector_store %arg9[%c0_2, %c576], %2 {strides = array<i32>} : memref<4x640xf32, #tpu.memory_space<vmem>>, vector<4x64xf32>,
    %c0_3 = arith.constant 0 : index
    %c0_4 = arith.constant 0 : index
    %c0_5 = arith.constant 0 : index
    %4 = vector.load %arg1[%c0_3, %c0_4, %c0_5] : memref<2x4x256xf32, #tpu.memory_space<vmem>>, vector<1x4x256xf32>
    %5 = vector.shape_cast %4 : vector<1x4x256xf32> to vector<4x256xf32>
    %c0_6 = arith.constant 0 : index
    %c64 = arith.constant 64 : index
    %6 = vector.load %arg9[%c0_6, %c64] : memref<4x640xf32, #tpu.memory_space<vmem>>, vector<4x256xf32>
    tpu.vector_store %arg9[%c0_6, %c64], %5 {strides = array<i32>} : memref<4x640xf32, #tpu.memory_space<vmem>>, vector<4x256xf32>,
    %c1 = arith.constant 1 : index
    %c0_7 = arith.constant 0 : index
    %c0_8 = arith.constant 0 : index
    %7 = vector.load %arg1[%c1, %c0_7, %c0_8] : memref<2x4x256xf32, #tpu.memory_space<vmem>>, vector<1x4x256xf32>
    %8 = vector.shape_cast %7 : vector<1x4x256xf32> to vector<4x256xf32>
    %c0_9 = arith.constant 0 : index
    %c320 = arith.constant 320 : index
    %9 = vector.load %arg9[%c0_9, %c320] : memref<4x640xf32, #tpu.memory_space<vmem>>, vector<4x256xf32>
    tpu.vector_store %arg9[%c0_9, %c320], %8 {strides = array<i32>} : memref<4x640xf32, #tpu.memory_space<vmem>>, vector<4x256xf32>,
    %c0_10 = arith.constant 0 : index
    %c47 = arith.constant 47 : index
    %10 = vector.load %arg9[%c0_10, %c47] : memref<4x640xf32, #tpu.memory_space<vmem>>, vector<4x512xf32>
    %c0_11 = arith.constant 0 : index
    %c0_12 = arith.constant 0 : index
    %11 = vector.load %arg6[%c0_11, %c0_12] : memref<9x512xf32, #tpu.memory_space<vmem>>, vector<1x512xf32>
    %12 = vector.broadcast %11 : vector<1x512xf32> to vector<4x512xf32>
    %13 = arith.mulf %10, %12 : vector<4x512xf32>
    %14 = arith.truncf %13 : vector<4x512xf32> to vector<4x512xbf16>
    %c0_13 = arith.constant 0 : index
    %c0_14 = arith.constant 0 : index
    %15 = vector.load %arg10[%c0_13, %c0_14] : memref<100x512xbf16, #tpu.memory_space<vmem>>, vector<4x512xbf16>
    tpu.vector_store %arg10[%c0_13, %c0_14], %14 {strides = array<i32>} : memref<100x512xbf16, #tpu.memory_space<vmem>>, vector<4x512xbf16>,
    %c0_15 = arith.constant 0 : index
    %c48 = arith.constant 48 : index
    %16 = vector.load %arg9[%c0_15, %c48] : memref<4x640xf32, #tpu.memory_space<vmem>>, vector<4x512xf32>
    %c1_16 = arith.constant 1 : index
    %c0_17 = arith.constant 0 : index
    %17 = vector.load %arg6[%c1_16, %c0_17] : memref<9x512xf32, #tpu.memory_space<vmem>>, vector<1x512xf32>
    %18 = vector.broadcast %17 : vector<1x512xf32> to vector<4x512xf32>
    %19 = arith.mulf %16, %18 : vector<4x512xf32>
    %20 = arith.truncf %19 : vector<4x512xf32> to vector<4x512xbf16>
    %c4 = arith.constant 4 : index
    %c0_18 = arith.constant 0 : index
    %21 = vector.load %arg10[%c4, %c0_18] : memref<100x512xbf16, #tpu.memory_space<vmem>>, vector<4x512xbf16>
    tpu.vector_store %arg10[%c4, %c0_18], %20 {strides = array<i32>} : memref<100x512xbf16, #tpu.memory_space<vmem>>, vector<4x512xbf16>,
    %c0_19 = arith.constant 0 : index
    %c49 = arith.constant 49 : index
    %22 = vector.load %arg9[%c0_19, %c49] : memref<4x640xf32, #tpu.memory_space<vmem>>, vector<4x512xf32>
    %c2 = arith.constant 2 : index
    %c0_20 = arith.constant 0 : index
    %23 = vector.load %arg6[%c2, %c0_20] : memref<9x512xf32, #tpu.memory_space<vmem>>, vector<1x512xf32>
    %24 = vector.broadcast %23 : vector<1x512xf32> to vector<4x512xf32>
    %25 = arith.mulf %22, %24 : vector<4x512xf32>
    %26 = arith.truncf %25 : vector<4x512xf32> to vector<4x512xbf16>
    %c8 = arith.constant 8 : index
    %c0_21 = arith.constant 0 : index
    %27 = vector.load %arg10[%c8, %c0_21] : memref<100x512xbf16, #tpu.memory_space<vmem>>, vector<4x512xbf16>
    tpu.vector_store %arg10[%c8, %c0_21], %26 {strides = array<i32>} : memref<100x512xbf16, #tpu.memory_space<vmem>>, vector<4x512xbf16>,
    %c0_22 = arith.constant 0 : index
    %c63 = arith.constant 63 : index
    %28 = vector.load %arg9[%c0_22, %c63] : memref<4x640xf32, #tpu.memory_space<vmem>>, vector<4x512xf32>
    %c3 = arith.constant 3 : index
    %c0_23 = arith.constant 0 : index
    %29 = vector.load %arg6[%c3, %c0_23] : memref<9x512xf32, #tpu.memory_space<vmem>>, vector<1x512xf32>
    %30 = vector.broadcast %29 : vector<1x512xf32> to vector<4x512xf32>
    %31 = arith.mulf %28, %30 : vector<4x512xf32>
    %32 = arith.truncf %31 : vector<4x512xf32> to vector<4x512xbf16>
    %c12 = arith.constant 12 : index
    %c0_24 = arith.constant 0 : index
    %33 = vector.load %arg10[%c12, %c0_24] : memref<100x512xbf16, #tpu.memory_space<vmem>>, vector<4x512xbf16>
    tpu.vector_store %arg10[%c12, %c0_24], %32 {strides = array<i32>} : memref<100x512xbf16, #tpu.memory_space<vmem>>, vector<4x512xbf16>,
    %c0_25 = arith.constant 0 : index
    %c64_26 = arith.constant 64 : index
    %34 = vector.load %arg9[%c0_25, %c64_26] : memref<4x640xf32, #tpu.memory_space<vmem>>, vector<4x512xf32>
    %35 = arith.truncf %34 : vector<4x512xf32> to vector<4x512xbf16>
    %c16 = arith.constant 16 : index
    %c0_27 = arith.constant 0 : index
    %36 = vector.load %arg10[%c16, %c0_27] : memref<100x512xbf16, #tpu.memory_space<vmem>>, vector<4x512xbf16>
    tpu.vector_store %arg10[%c16, %c0_27], %35 {strides = array<i32>} : memref<100x512xbf16, #tpu.memory_space<vmem>>, vector<4x512xbf16>,
    %c0_28 = arith.constant 0 : index
    %c65 = arith.constant 65 : index
    %37 = vector.load %arg9[%c0_28, %c65] : memref<4x640xf32, #tpu.memory_space<vmem>>, vector<4x512xf32>
    %c5 = arith.constant 5 : index
    %c0_29 = arith.constant 0 : index
    %38 = vector.load %arg6[%c5, %c0_29] : memref<9x512xf32, #tpu.memory_space<vmem>>, vector<1x512xf32>
    %39 = vector.broadcast %38 : vector<1x512xf32> to vector<4x512xf32>
    %40 = arith.mulf %37, %39 : vector<4x512xf32>
    %41 = arith.truncf %40 : vector<4x512xf32> to vector<4x512xbf16>
    %c20 = arith.constant 20 : index
    %c0_30 = arith.constant 0 : index
    %42 = vector.load %arg10[%c20, %c0_30] : memref<100x512xbf16, #tpu.memory_space<vmem>>, vector<4x512xbf16>
    tpu.vector_store %arg10[%c20, %c0_30], %41 {strides = array<i32>} : memref<100x512xbf16, #tpu.memory_space<vmem>>, vector<4x512xbf16>,
    %c0_31 = arith.constant 0 : index
    %c79 = arith.constant 79 : index
    %43 = vector.load %arg9[%c0_31, %c79] : memref<4x640xf32, #tpu.memory_space<vmem>>, vector<4x512xf32>
    %c6 = arith.constant 6 : index
    %c0_32 = arith.constant 0 : index
    %44 = vector.load %arg6[%c6, %c0_32] : memref<9x512xf32, #tpu.memory_space<vmem>>, vector<1x512xf32>
    %45 = vector.broadcast %44 : vector<1x512xf32> to vector<4x512xf32>
    %46 = arith.mulf %43, %45 : vector<4x512xf32>
    %47 = arith.truncf %46 : vector<4x512xf32> to vector<4x512xbf16>
    %c24 = arith.constant 24 : index
    %c0_33 = arith.constant 0 : index
    %48 = vector.load %arg10[%c24, %c0_33] : memref<100x512xbf16, #tpu.memory_space<vmem>>, vector<4x512xbf16>
    tpu.vector_store %arg10[%c24, %c0_33], %47 {strides = array<i32>} : memref<100x512xbf16, #tpu.memory_space<vmem>>, vector<4x512xbf16>,
    %c0_34 = arith.constant 0 : index
    %c80 = arith.constant 80 : index
    %49 = vector.load %arg9[%c0_34, %c80] : memref<4x640xf32, #tpu.memory_space<vmem>>, vector<4x512xf32>
    %c7 = arith.constant 7 : index
    %c0_35 = arith.constant 0 : index
    %50 = vector.load %arg6[%c7, %c0_35] : memref<9x512xf32, #tpu.memory_space<vmem>>, vector<1x512xf32>
    %51 = vector.broadcast %50 : vector<1x512xf32> to vector<4x512xf32>
    %52 = arith.mulf %49, %51 : vector<4x512xf32>
    %53 = arith.truncf %52 : vector<4x512xf32> to vector<4x512xbf16>
    %c28 = arith.constant 28 : index
    %c0_36 = arith.constant 0 : index
    %54 = vector.load %arg10[%c28, %c0_36] : memref<100x512xbf16, #tpu.memory_space<vmem>>, vector<4x512xbf16>
    tpu.vector_store %arg10[%c28, %c0_36], %53 {strides = array<i32>} : memref<100x512xbf16, #tpu.memory_space<vmem>>, vector<4x512xbf16>,
    %c0_37 = arith.constant 0 : index
    %c81 = arith.constant 81 : index
    %55 = vector.load %arg9[%c0_37, %c81] : memref<4x640xf32, #tpu.memory_space<vmem>>, vector<4x512xf32>
    %c8_38 = arith.constant 8 : index
    %c0_39 = arith.constant 0 : index
    %56 = vector.load %arg6[%c8_38, %c0_39] : memref<9x512xf32, #tpu.memory_space<vmem>>, vector<1x512xf32>
    %57 = vector.broadcast %56 : vector<1x512xf32> to vector<4x512xf32>
    %58 = arith.mulf %55, %57 : vector<4x512xf32>
    %59 = arith.truncf %58 : vector<4x512xf32> to vector<4x512xbf16>
    %c32 = arith.constant 32 : index
    %c0_40 = arith.constant 0 : index
    %60 = vector.load %arg10[%c32, %c0_40] : memref<100x512xbf16, #tpu.memory_space<vmem>>, vector<4x512xbf16>
    tpu.vector_store %arg10[%c32, %c0_40], %59 {strides = array<i32>} : memref<100x512xbf16, #tpu.memory_space<vmem>>, vector<4x512xbf16>,
    %c0_41 = arith.constant 0 : index
    %c0_42 = arith.constant 0 : index
    %61 = vector.load %arg2[%c0_41, %c0_42] : memref<4x36xbf16, #tpu.memory_space<vmem>>, vector<4x36xbf16>
    %c0_43 = arith.constant 0 : index
    %c0_44 = arith.constant 0 : index
    %62 = vector.load %arg10[%c0_43, %c0_44] : memref<100x512xbf16, #tpu.memory_space<vmem>>, vector<36x512xbf16>
    %cst_45 = arith.constant dense<0.000000e+00> : vector<4x512xf32>
    %63 = tpu.matmul %61, %62, %cst_45 {dimension_numbers = #tpu.dot_dimension_numbers<[1], [0], [0], [1], [0, 0, 1, 1], [], []>} : vector<4x36xbf16>, vector<36x512xbf16>, vector<4x512xf32> -> vector<4x512xf32>
    %c0_46 = arith.constant 0 : index
    %c0_47 = arith.constant 0 : index
    %64 = vector.load %arg3[%c0_46, %c0_47] : memref<4x1xf32, #tpu.memory_space<vmem>>, vector<4x1xf32>
    %65 = vector.broadcast %64 : vector<4x1xf32> to vector<4x512xf32>
    %66 = arith.addf %63, %65 : vector<4x512xf32>
    %cst_48 = arith.constant 0.000000e+00 : f32
    %67 = vector.broadcast %cst_48 : f32 to vector<4x512xf32>
    %68 = arith.maximumf %66, %67 : vector<4x512xf32>
    %c0_49 = arith.constant 0 : index
    %c64_50 = arith.constant 64 : index
    %69 = vector.load %arg9[%c0_49, %c64_50] : memref<4x640xf32, #tpu.memory_space<vmem>>, vector<4x512xf32>
    %70 = arith.addf %68, %69 : vector<4x512xf32>
    %cst_51 = arith.constant 0.000000e+00 : f32
    %71 = vector.broadcast %cst_51 : f32 to vector<4x512xf32>
    %72 = arith.maximumf %70, %71 : vector<4x512xf32>
    %c0_52 = arith.constant 0 : index
    %c64_53 = arith.constant 64 : index
    %73 = vector.load %arg9[%c0_52, %c64_53] : memref<4x640xf32, #tpu.memory_space<vmem>>, vector<4x512xf32>
    tpu.vector_store %arg9[%c0_52, %c64_53], %72 {strides = array<i32>} : memref<4x640xf32, #tpu.memory_space<vmem>>, vector<4x512xf32>,
    %c0_54 = arith.constant 0 : index
    %c30 = arith.constant 30 : index
    %74 = vector.load %arg9[%c0_54, %c30] : memref<4x640xf32, #tpu.memory_space<vmem>>, vector<4x512xf32>
    %c0_55 = arith.constant 0 : index
    %c0_56 = arith.constant 0 : index
    %75 = vector.load %arg7[%c0_55, %c0_56] : memref<25x512xf32, #tpu.memory_space<vmem>>, vector<1x512xf32>
    %76 = vector.broadcast %75 : vector<1x512xf32> to vector<4x512xf32>
    %77 = arith.mulf %74, %76 : vector<4x512xf32>
    %78 = arith.truncf %77 : vector<4x512xf32> to vector<4x512xbf16>
    %c0_57 = arith.constant 0 : index
    %c0_58 = arith.constant 0 : index
    %79 = vector.load %arg10[%c0_57, %c0_58] : memref<100x512xbf16, #tpu.memory_space<vmem>>, vector<4x512xbf16>
    tpu.vector_store %arg10[%c0_57, %c0_58], %78 {strides = array<i32>} : memref<100x512xbf16, #tpu.memory_space<vmem>>, vector<4x512xbf16>,
    %c0_59 = arith.constant 0 : index
    %c31 = arith.constant 31 : index
    %80 = vector.load %arg9[%c0_59, %c31] : memref<4x640xf32, #tpu.memory_space<vmem>>, vector<4x512xf32>
    %c1_60 = arith.constant 1 : index
    %c0_61 = arith.constant 0 : index
    %81 = vector.load %arg7[%c1_60, %c0_61] : memref<25x512xf32, #tpu.memory_space<vmem>>, vector<1x512xf32>
    %82 = vector.broadcast %81 : vector<1x512xf32> to vector<4x512xf32>
    %83 = arith.mulf %80, %82 : vector<4x512xf32>
    %84 = arith.truncf %83 : vector<4x512xf32> to vector<4x512xbf16>
    %c4_62 = arith.constant 4 : index
    %c0_63 = arith.constant 0 : index
    %85 = vector.load %arg10[%c4_62, %c0_63] : memref<100x512xbf16, #tpu.memory_space<vmem>>, vector<4x512xbf16>
    tpu.vector_store %arg10[%c4_62, %c0_63], %84 {strides = array<i32>} : memref<100x512xbf16, #tpu.memory_space<vmem>>, vector<4x512xbf16>,
    %c0_64 = arith.constant 0 : index
    %c32_65 = arith.constant 32 : index
    %86 = vector.load %arg9[%c0_64, %c32_65] : memref<4x640xf32, #tpu.memory_space<vmem>>, vector<4x512xf32>
    %c2_66 = arith.constant 2 : index
    %c0_67 = arith.constant 0 : index
    %87 = vector.load %arg7[%c2_66, %c0_67] : memref<25x512xf32, #tpu.memory_space<vmem>>, vector<1x512xf32>
    %88 = vector.broadcast %87 : vector<1x512xf32> to vector<4x512xf32>
    %89 = arith.mulf %86, %88 : vector<4x512xf32>
    %90 = arith.truncf %89 : vector<4x512xf32> to vector<4x512xbf16>
    %c8_68 = arith.constant 8 : index
    %c0_69 = arith.constant 0 : index
    %91 = vector.load %arg10[%c8_68, %c0_69] : memref<100x512xbf16, #tpu.memory_space<vmem>>, vector<4x512xbf16>
    tpu.vector_store %arg10[%c8_68, %c0_69], %90 {strides = array<i32>} : memref<100x512xbf16, #tpu.memory_space<vmem>>, vector<4x512xbf16>,
    %c0_70 = arith.constant 0 : index
    %c33 = arith.constant 33 : index
    %92 = vector.load %arg9[%c0_70, %c33] : memref<4x640xf32, #tpu.memory_space<vmem>>, vector<4x512xf32>
    %c3_71 = arith.constant 3 : index
    %c0_72 = arith.constant 0 : index
    %93 = vector.load %arg7[%c3_71, %c0_72] : memref<25x512xf32, #tpu.memory_space<vmem>>, vector<1x512xf32>
    %94 = vector.broadcast %93 : vector<1x512xf32> to vector<4x512xf32>
    %95 = arith.mulf %92, %94 : vector<4x512xf32>
    %96 = arith.truncf %95 : vector<4x512xf32> to vector<4x512xbf16>
    %c12_73 = arith.constant 12 : index
    %c0_74 = arith.constant 0 : index
    %97 = vector.load %arg10[%c12_73, %c0_74] : memref<100x512xbf16, #tpu.memory_space<vmem>>, vector<4x512xbf16>
    tpu.vector_store %arg10[%c12_73, %c0_74], %96 {strides = array<i32>} : memref<100x512xbf16, #tpu.memory_space<vmem>>, vector<4x512xbf16>,
    %c0_75 = arith.constant 0 : index
    %c34 = arith.constant 34 : index
    %98 = vector.load %arg9[%c0_75, %c34] : memref<4x640xf32, #tpu.memory_space<vmem>>, vector<4x512xf32>
    %c4_76 = arith.constant 4 : index
    %c0_77 = arith.constant 0 : index
    %99 = vector.load %arg7[%c4_76, %c0_77] : memref<25x512xf32, #tpu.memory_space<vmem>>, vector<1x512xf32>
    %100 = vector.broadcast %99 : vector<1x512xf32> to vector<4x512xf32>
    %101 = arith.mulf %98, %100 : vector<4x512xf32>
    %102 = arith.truncf %101 : vector<4x512xf32> to vector<4x512xbf16>
    %c16_78 = arith.constant 16 : index
    %c0_79 = arith.constant 0 : index
    %103 = vector.load %arg10[%c16_78, %c0_79] : memref<100x512xbf16, #tpu.memory_space<vmem>>, vector<4x512xbf16>
    tpu.vector_store %arg10[%c16_78, %c0_79], %102 {strides = array<i32>} : memref<100x512xbf16, #tpu.memory_space<vmem>>, vector<4x512xbf16>,
    %c0_80 = arith.constant 0 : index
    %c46 = arith.constant 46 : index
    %104 = vector.load %arg9[%c0_80, %c46] : memref<4x640xf32, #tpu.memory_space<vmem>>, vector<4x512xf32>
    %c5_81 = arith.constant 5 : index
    %c0_82 = arith.constant 0 : index
    %105 = vector.load %arg7[%c5_81, %c0_82] : memref<25x512xf32, #tpu.memory_space<vmem>>, vector<1x512xf32>
    %106 = vector.broadcast %105 : vector<1x512xf32> to vector<4x512xf32>
    %107 = arith.mulf %104, %106 : vector<4x512xf32>
    %108 = arith.truncf %107 : vector<4x512xf32> to vector<4x512xbf16>
    %c20_83 = arith.constant 20 : index
    %c0_84 = arith.constant 0 : index
    %109 = vector.load %arg10[%c20_83, %c0_84] : memref<100x512xbf16, #tpu.memory_space<vmem>>, vector<4x512xbf16>
    tpu.vector_store %arg10[%c20_83, %c0_84], %108 {strides = array<i32>} : memref<100x512xbf16, #tpu.memory_space<vmem>>, vector<4x512xbf16>,
    %c0_85 = arith.constant 0 : index
    %c47_86 = arith.constant 47 : index
    %110 = vector.load %arg9[%c0_85, %c47_86] : memref<4x640xf32, #tpu.memory_space<vmem>>, vector<4x512xf32>
    %c6_87 = arith.constant 6 : index
    %c0_88 = arith.constant 0 : index
    %111 = vector.load %arg7[%c6_87, %c0_88] : memref<25x512xf32, #tpu.memory_space<vmem>>, vector<1x512xf32>
    %112 = vector.broadcast %111 : vector<1x512xf32> to vector<4x512xf32>
    %113 = arith.mulf %110, %112 : vector<4x512xf32>
    %114 = arith.truncf %113 : vector<4x512xf32> to vector<4x512xbf16>
    %c24_89 = arith.constant 24 : index
    %c0_90 = arith.constant 0 : index
    %115 = vector.load %arg10[%c24_89, %c0_90] : memref<100x512xbf16, #tpu.memory_space<vmem>>, vector<4x512xbf16>
    tpu.vector_store %arg10[%c24_89, %c0_90], %114 {strides = array<i32>} : memref<100x512xbf16, #tpu.memory_space<vmem>>, vector<4x512xbf16>,
    %c0_91 = arith.constant 0 : index
    %c48_92 = arith.constant 48 : index
    %116 = vector.load %arg9[%c0_91, %c48_92] : memref<4x640xf32, #tpu.memory_space<vmem>>, vector<4x512xf32>
    %c7_93 = arith.constant 7 : index
    %c0_94 = arith.constant 0 : index
    %117 = vector.load %arg7[%c7_93, %c0_94] : memref<25x512xf32, #tpu.memory_space<vmem>>, vector<1x512xf32>
    %118 = vector.broadcast %117 : vector<1x512xf32> to vector<4x512xf32>
    %119 = arith.mulf %116, %118 : vector<4x512xf32>
    %120 = arith.truncf %119 : vector<4x512xf32> to vector<4x512xbf16>
    %c28_95 = arith.constant 28 : index
    %c0_96 = arith.constant 0 : index
    %121 = vector.load %arg10[%c28_95, %c0_96] : memref<100x512xbf16, #tpu.memory_space<vmem>>, vector<4x512xbf16>
    tpu.vector_store %arg10[%c28_95, %c0_96], %120 {strides = array<i32>} : memref<100x512xbf16, #tpu.memory_space<vmem>>, vector<4x512xbf16>,
    %c0_97 = arith.constant 0 : index
    %c49_98 = arith.constant 49 : index
    %122 = vector.load %arg9[%c0_97, %c49_98] : memref<4x640xf32, #tpu.memory_space<vmem>>, vector<4x512xf32>
    %c8_99 = arith.constant 8 : index
    %c0_100 = arith.constant 0 : index
    %123 = vector.load %arg7[%c8_99, %c0_100] : memref<25x512xf32, #tpu.memory_space<vmem>>, vector<1x512xf32>
    %124 = vector.broadcast %123 : vector<1x512xf32> to vector<4x512xf32>
    %125 = arith.mulf %122, %124 : vector<4x512xf32>
    %126 = arith.truncf %125 : vector<4x512xf32> to vector<4x512xbf16>
    %c32_101 = arith.constant 32 : index
    %c0_102 = arith.constant 0 : index
    %127 = vector.load %arg10[%c32_101, %c0_102] : memref<100x512xbf16, #tpu.memory_space<vmem>>, vector<4x512xbf16>
    tpu.vector_store %arg10[%c32_101, %c0_102], %126 {strides = array<i32>} : memref<100x512xbf16, #tpu.memory_space<vmem>>, vector<4x512xbf16>,
    %c0_103 = arith.constant 0 : index
    %c50 = arith.constant 50 : index
    %128 = vector.load %arg9[%c0_103, %c50] : memref<4x640xf32, #tpu.memory_space<vmem>>, vector<4x512xf32>
    %c9 = arith.constant 9 : index
    %c0_104 = arith.constant 0 : index
    %129 = vector.load %arg7[%c9, %c0_104] : memref<25x512xf32, #tpu.memory_space<vmem>>, vector<1x512xf32>
    %130 = vector.broadcast %129 : vector<1x512xf32> to vector<4x512xf32>
    %131 = arith.mulf %128, %130 : vector<4x512xf32>
    %132 = arith.truncf %131 : vector<4x512xf32> to vector<4x512xbf16>
    %c36 = arith.constant 36 : index
    %c0_105 = arith.constant 0 : index
    %133 = vector.load %arg10[%c36, %c0_105] : memref<100x512xbf16, #tpu.memory_space<vmem>>, vector<4x512xbf16>
    tpu.vector_store %arg10[%c36, %c0_105], %132 {strides = array<i32>} : memref<100x512xbf16, #tpu.memory_space<vmem>>, vector<4x512xbf16>,
    %c0_106 = arith.constant 0 : index
    %c62 = arith.constant 62 : index
    %134 = vector.load %arg9[%c0_106, %c62] : memref<4x640xf32, #tpu.memory_space<vmem>>, vector<4x512xf32>
    %c10 = arith.constant 10 : index
    %c0_107 = arith.constant 0 : index
    %135 = vector.load %arg7[%c10, %c0_107] : memref<25x512xf32, #tpu.memory_space<vmem>>, vector<1x512xf32>
    %136 = vector.broadcast %135 : vector<1x512xf32> to vector<4x512xf32>
    %137 = arith.mulf %134, %136 : vector<4x512xf32>
    %138 = arith.truncf %137 : vector<4x512xf32> to vector<4x512xbf16>
    %c40 = arith.constant 40 : index
    %c0_108 = arith.constant 0 : index
    %139 = vector.load %arg10[%c40, %c0_108] : memref<100x512xbf16, #tpu.memory_space<vmem>>, vector<4x512xbf16>
    tpu.vector_store %arg10[%c40, %c0_108], %138 {strides = array<i32>} : memref<100x512xbf16, #tpu.memory_space<vmem>>, vector<4x512xbf16>,
    %c0_109 = arith.constant 0 : index
    %c63_110 = arith.constant 63 : index
    %140 = vector.load %arg9[%c0_109, %c63_110] : memref<4x640xf32, #tpu.memory_space<vmem>>, vector<4x512xf32>
    %c11 = arith.constant 11 : index
    %c0_111 = arith.constant 0 : index
    %141 = vector.load %arg7[%c11, %c0_111] : memref<25x512xf32, #tpu.memory_space<vmem>>, vector<1x512xf32>
    %142 = vector.broadcast %141 : vector<1x512xf32> to vector<4x512xf32>
    %143 = arith.mulf %140, %142 : vector<4x512xf32>
    %144 = arith.truncf %143 : vector<4x512xf32> to vector<4x512xbf16>
    %c44 = arith.constant 44 : index
    %c0_112 = arith.constant 0 : index
    %145 = vector.load %arg10[%c44, %c0_112] : memref<100x512xbf16, #tpu.memory_space<vmem>>, vector<4x512xbf16>
    tpu.vector_store %arg10[%c44, %c0_112], %144 {strides = array<i32>} : memref<100x512xbf16, #tpu.memory_space<vmem>>, vector<4x512xbf16>,
    %c0_113 = arith.constant 0 : index
    %c64_114 = arith.constant 64 : index
    %146 = vector.load %arg9[%c0_113, %c64_114] : memref<4x640xf32, #tpu.memory_space<vmem>>, vector<4x512xf32>
    %147 = arith.truncf %146 : vector<4x512xf32> to vector<4x512xbf16>
    %c48_115 = arith.constant 48 : index
    %c0_116 = arith.constant 0 : index
    %148 = vector.load %arg10[%c48_115, %c0_116] : memref<100x512xbf16, #tpu.memory_space<vmem>>, vector<4x512xbf16>
    tpu.vector_store %arg10[%c48_115, %c0_116], %147 {strides = array<i32>} : memref<100x512xbf16, #tpu.memory_space<vmem>>, vector<4x512xbf16>,
    %c0_117 = arith.constant 0 : index
    %c65_118 = arith.constant 65 : index
    %149 = vector.load %arg9[%c0_117, %c65_118] : memref<4x640xf32, #tpu.memory_space<vmem>>, vector<4x512xf32>
    %c13 = arith.constant 13 : index
    %c0_119 = arith.constant 0 : index
    %150 = vector.load %arg7[%c13, %c0_119] : memref<25x512xf32, #tpu.memory_space<vmem>>, vector<1x512xf32>
    %151 = vector.broadcast %150 : vector<1x512xf32> to vector<4x512xf32>
    %152 = arith.mulf %149, %151 : vector<4x512xf32>
    %153 = arith.truncf %152 : vector<4x512xf32> to vector<4x512xbf16>
    %c52 = arith.constant 52 : index
    %c0_120 = arith.constant 0 : index
    %154 = vector.load %arg10[%c52, %c0_120] : memref<100x512xbf16, #tpu.memory_space<vmem>>, vector<4x512xbf16>
    tpu.vector_store %arg10[%c52, %c0_120], %153 {strides = array<i32>} : memref<100x512xbf16, #tpu.memory_space<vmem>>, vector<4x512xbf16>,
    %c0_121 = arith.constant 0 : index
    %c66 = arith.constant 66 : index
    %155 = vector.load %arg9[%c0_121, %c66] : memref<4x640xf32, #tpu.memory_space<vmem>>, vector<4x512xf32>
    %c14 = arith.constant 14 : index
    %c0_122 = arith.constant 0 : index
    %156 = vector.load %arg7[%c14, %c0_122] : memref<25x512xf32, #tpu.memory_space<vmem>>, vector<1x512xf32>
    %157 = vector.broadcast %156 : vector<1x512xf32> to vector<4x512xf32>
    %158 = arith.mulf %155, %157 : vector<4x512xf32>
    %159 = arith.truncf %158 : vector<4x512xf32> to vector<4x512xbf16>
    %c56 = arith.constant 56 : index
    %c0_123 = arith.constant 0 : index
    %160 = vector.load %arg10[%c56, %c0_123] : memref<100x512xbf16, #tpu.memory_space<vmem>>, vector<4x512xbf16>
    tpu.vector_store %arg10[%c56, %c0_123], %159 {strides = array<i32>} : memref<100x512xbf16, #tpu.memory_space<vmem>>, vector<4x512xbf16>,
    %c0_124 = arith.constant 0 : index
    %c78 = arith.constant 78 : index
    %161 = vector.load %arg9[%c0_124, %c78] : memref<4x640xf32, #tpu.memory_space<vmem>>, vector<4x512xf32>
    %c15 = arith.constant 15 : index
    %c0_125 = arith.constant 0 : index
    %162 = vector.load %arg7[%c15, %c0_125] : memref<25x512xf32, #tpu.memory_space<vmem>>, vector<1x512xf32>
    %163 = vector.broadcast %162 : vector<1x512xf32> to vector<4x512xf32>
    %164 = arith.mulf %161, %163 : vector<4x512xf32>
    %165 = arith.truncf %164 : vector<4x512xf32> to vector<4x512xbf16>
    %c60 = arith.constant 60 : index
    %c0_126 = arith.constant 0 : index
    %166 = vector.load %arg10[%c60, %c0_126] : memref<100x512xbf16, #tpu.memory_space<vmem>>, vector<4x512xbf16>
    tpu.vector_store %arg10[%c60, %c0_126], %165 {strides = array<i32>} : memref<100x512xbf16, #tpu.memory_space<vmem>>, vector<4x512xbf16>,
    %c0_127 = arith.constant 0 : index
    %c79_128 = arith.constant 79 : index
    %167 = vector.load %arg9[%c0_127, %c79_128] : memref<4x640xf32, #tpu.memory_space<vmem>>, vector<4x512xf32>
    %c16_129 = arith.constant 16 : index
    %c0_130 = arith.constant 0 : index
    %168 = vector.load %arg7[%c16_129, %c0_130] : memref<25x512xf32, #tpu.memory_space<vmem>>, vector<1x512xf32>
    %169 = vector.broadcast %168 : vector<1x512xf32> to vector<4x512xf32>
    %170 = arith.mulf %167, %169 : vector<4x512xf32>
    %171 = arith.truncf %170 : vector<4x512xf32> to vector<4x512xbf16>
    %c64_131 = arith.constant 64 : index
    %c0_132 = arith.constant 0 : index
    %172 = vector.load %arg10[%c64_131, %c0_132] : memref<100x512xbf16, #tpu.memory_space<vmem>>, vector<4x512xbf16>
    tpu.vector_store %arg10[%c64_131, %c0_132], %171 {strides = array<i32>} : memref<100x512xbf16, #tpu.memory_space<vmem>>, vector<4x512xbf16>,
    %c0_133 = arith.constant 0 : index
    %c80_134 = arith.constant 80 : index
    %173 = vector.load %arg9[%c0_133, %c80_134] : memref<4x640xf32, #tpu.memory_space<vmem>>, vector<4x512xf32>
    %c17 = arith.constant 17 : index
    %c0_135 = arith.constant 0 : index
    %174 = vector.load %arg7[%c17, %c0_135] : memref<25x512xf32, #tpu.memory_space<vmem>>, vector<1x512xf32>
    %175 = vector.broadcast %174 : vector<1x512xf32> to vector<4x512xf32>
    %176 = arith.mulf %173, %175 : vector<4x512xf32>
    %177 = arith.truncf %176 : vector<4x512xf32> to vector<4x512xbf16>
    %c68 = arith.constant 68 : index
    %c0_136 = arith.constant 0 : index
    %178 = vector.load %arg10[%c68, %c0_136] : memref<100x512xbf16, #tpu.memory_space<vmem>>, vector<4x512xbf16>
    tpu.vector_store %arg10[%c68, %c0_136], %177 {strides = array<i32>} : memref<100x512xbf16, #tpu.memory_space<vmem>>, vector<4x512xbf16>,
    %c0_137 = arith.constant 0 : index
    %c81_138 = arith.constant 81 : index
    %179 = vector.load %arg9[%c0_137, %c81_138] : memref<4x640xf32, #tpu.memory_space<vmem>>, vector<4x512xf32>
    %c18 = arith.constant 18 : index
    %c0_139 = arith.constant 0 : index
    %180 = vector.load %arg7[%c18, %c0_139] : memref<25x512xf32, #tpu.memory_space<vmem>>, vector<1x512xf32>
    %181 = vector.broadcast %180 : vector<1x512xf32> to vector<4x512xf32>
    %182 = arith.mulf %179, %181 : vector<4x512xf32>
    %183 = arith.truncf %182 : vector<4x512xf32> to vector<4x512xbf16>
    %c72 = arith.constant 72 : index
    %c0_140 = arith.constant 0 : index
    %184 = vector.load %arg10[%c72, %c0_140] : memref<100x512xbf16, #tpu.memory_space<vmem>>, vector<4x512xbf16>
    tpu.vector_store %arg10[%c72, %c0_140], %183 {strides = array<i32>} : memref<100x512xbf16, #tpu.memory_space<vmem>>, vector<4x512xbf16>,
    %c0_141 = arith.constant 0 : index
    %c82 = arith.constant 82 : index
    %185 = vector.load %arg9[%c0_141, %c82] : memref<4x640xf32, #tpu.memory_space<vmem>>, vector<4x512xf32>
    %c19 = arith.constant 19 : index
    %c0_142 = arith.constant 0 : index
    %186 = vector.load %arg7[%c19, %c0_142] : memref<25x512xf32, #tpu.memory_space<vmem>>, vector<1x512xf32>
    %187 = vector.broadcast %186 : vector<1x512xf32> to vector<4x512xf32>
    %188 = arith.mulf %185, %187 : vector<4x512xf32>
    %189 = arith.truncf %188 : vector<4x512xf32> to vector<4x512xbf16>
    %c76 = arith.constant 76 : index
    %c0_143 = arith.constant 0 : index
    %190 = vector.load %arg10[%c76, %c0_143] : memref<100x512xbf16, #tpu.memory_space<vmem>>, vector<4x512xbf16>
    tpu.vector_store %arg10[%c76, %c0_143], %189 {strides = array<i32>} : memref<100x512xbf16, #tpu.memory_space<vmem>>, vector<4x512xbf16>,
    %c0_144 = arith.constant 0 : index
    %c94 = arith.constant 94 : index
    %191 = vector.load %arg9[%c0_144, %c94] : memref<4x640xf32, #tpu.memory_space<vmem>>, vector<4x512xf32>
    %c20_145 = arith.constant 20 : index
    %c0_146 = arith.constant 0 : index
    %192 = vector.load %arg7[%c20_145, %c0_146] : memref<25x512xf32, #tpu.memory_space<vmem>>, vector<1x512xf32>
    %193 = vector.broadcast %192 : vector<1x512xf32> to vector<4x512xf32>
    %194 = arith.mulf %191, %193 : vector<4x512xf32>
    %195 = arith.truncf %194 : vector<4x512xf32> to vector<4x512xbf16>
    %c80_147 = arith.constant 80 : index
    %c0_148 = arith.constant 0 : index
    %196 = vector.load %arg10[%c80_147, %c0_148] : memref<100x512xbf16, #tpu.memory_space<vmem>>, vector<4x512xbf16>
    tpu.vector_store %arg10[%c80_147, %c0_148], %195 {strides = array<i32>} : memref<100x512xbf16, #tpu.memory_space<vmem>>, vector<4x512xbf16>,
    %c0_149 = arith.constant 0 : index
    %c95 = arith.constant 95 : index
    %197 = vector.load %arg9[%c0_149, %c95] : memref<4x640xf32, #tpu.memory_space<vmem>>, vector<4x512xf32>
    %c21 = arith.constant 21 : index
    %c0_150 = arith.constant 0 : index
    %198 = vector.load %arg7[%c21, %c0_150] : memref<25x512xf32, #tpu.memory_space<vmem>>, vector<1x512xf32>
    %199 = vector.broadcast %198 : vector<1x512xf32> to vector<4x512xf32>
    %200 = arith.mulf %197, %199 : vector<4x512xf32>
    %201 = arith.truncf %200 : vector<4x512xf32> to vector<4x512xbf16>
    %c84 = arith.constant 84 : index
    %c0_151 = arith.constant 0 : index
    %202 = vector.load %arg10[%c84, %c0_151] : memref<100x512xbf16, #tpu.memory_space<vmem>>, vector<4x512xbf16>
    tpu.vector_store %arg10[%c84, %c0_151], %201 {strides = array<i32>} : memref<100x512xbf16, #tpu.memory_space<vmem>>, vector<4x512xbf16>,
    %c0_152 = arith.constant 0 : index
    %c96 = arith.constant 96 : index
    %203 = vector.load %arg9[%c0_152, %c96] : memref<4x640xf32, #tpu.memory_space<vmem>>, vector<4x512xf32>
    %c22 = arith.constant 22 : index
    %c0_153 = arith.constant 0 : index
    %204 = vector.load %arg7[%c22, %c0_153] : memref<25x512xf32, #tpu.memory_space<vmem>>, vector<1x512xf32>
    %205 = vector.broadcast %204 : vector<1x512xf32> to vector<4x512xf32>
    %206 = arith.mulf %203, %205 : vector<4x512xf32>
    %207 = arith.truncf %206 : vector<4x512xf32> to vector<4x512xbf16>
    %c88 = arith.constant 88 : index
    %c0_154 = arith.constant 0 : index
    %208 = vector.load %arg10[%c88, %c0_154] : memref<100x512xbf16, #tpu.memory_space<vmem>>, vector<4x512xbf16>
    tpu.vector_store %arg10[%c88, %c0_154], %207 {strides = array<i32>} : memref<100x512xbf16, #tpu.memory_space<vmem>>, vector<4x512xbf16>,
    %c0_155 = arith.constant 0 : index
    %c97 = arith.constant 97 : index
    %209 = vector.load %arg9[%c0_155, %c97] : memref<4x640xf32, #tpu.memory_space<vmem>>, vector<4x512xf32>
    %c23 = arith.constant 23 : index
    %c0_156 = arith.constant 0 : index
    %210 = vector.load %arg7[%c23, %c0_156] : memref<25x512xf32, #tpu.memory_space<vmem>>, vector<1x512xf32>
    %211 = vector.broadcast %210 : vector<1x512xf32> to vector<4x512xf32>
    %212 = arith.mulf %209, %211 : vector<4x512xf32>
    %213 = arith.truncf %212 : vector<4x512xf32> to vector<4x512xbf16>
    %c92 = arith.constant 92 : index
    %c0_157 = arith.constant 0 : index
    %214 = vector.load %arg10[%c92, %c0_157] : memref<100x512xbf16, #tpu.memory_space<vmem>>, vector<4x512xbf16>
    tpu.vector_store %arg10[%c92, %c0_157], %213 {strides = array<i32>} : memref<100x512xbf16, #tpu.memory_space<vmem>>, vector<4x512xbf16>,
    %c0_158 = arith.constant 0 : index
    %c98 = arith.constant 98 : index
    %215 = vector.load %arg9[%c0_158, %c98] : memref<4x640xf32, #tpu.memory_space<vmem>>, vector<4x512xf32>
    %c24_159 = arith.constant 24 : index
    %c0_160 = arith.constant 0 : index
    %216 = vector.load %arg7[%c24_159, %c0_160] : memref<25x512xf32, #tpu.memory_space<vmem>>, vector<1x512xf32>
    %217 = vector.broadcast %216 : vector<1x512xf32> to vector<4x512xf32>
    %218 = arith.mulf %215, %217 : vector<4x512xf32>
    %219 = arith.truncf %218 : vector<4x512xf32> to vector<4x512xbf16>
    %c96_161 = arith.constant 96 : index
    %c0_162 = arith.constant 0 : index
    %220 = vector.load %arg10[%c96_161, %c0_162] : memref<100x512xbf16, #tpu.memory_space<vmem>>, vector<4x512xbf16>
    tpu.vector_store %arg10[%c96_161, %c0_162], %219 {strides = array<i32>} : memref<100x512xbf16, #tpu.memory_space<vmem>>, vector<4x512xbf16>,
    %c0_163 = arith.constant 0 : index
    %c0_164 = arith.constant 0 : index
    %221 = vector.load %arg4[%c0_163, %c0_164] : memref<4x100xbf16, #tpu.memory_space<vmem>>, vector<4x100xbf16>
    %c0_165 = arith.constant 0 : index
    %c0_166 = arith.constant 0 : index
    %222 = vector.load %arg10[%c0_165, %c0_166] : memref<100x512xbf16, #tpu.memory_space<vmem>>, vector<100x512xbf16>
    %cst_167 = arith.constant dense<0.000000e+00> : vector<4x512xf32>
    %223 = tpu.matmul %221, %222, %cst_167 {dimension_numbers = #tpu.dot_dimension_numbers<[1], [0], [0], [1], [0, 0, 1, 1], [], []>} : vector<4x100xbf16>, vector<100x512xbf16>, vector<4x512xf32> -> vector<4x512xf32>
    %c0_168 = arith.constant 0 : index
    %c0_169 = arith.constant 0 : index
    %224 = vector.load %arg5[%c0_168, %c0_169] : memref<4x1xf32, #tpu.memory_space<vmem>>, vector<4x1xf32>
    %225 = vector.broadcast %224 : vector<4x1xf32> to vector<4x512xf32>
    %226 = arith.addf %223, %225 : vector<4x512xf32>
    %cst_170 = arith.constant 0.000000e+00 : f32
    %227 = vector.broadcast %cst_170 : f32 to vector<4x512xf32>
    %228 = arith.maximumf %226, %227 : vector<4x512xf32>
    %c0_171 = arith.constant 0 : index
    %c64_172 = arith.constant 64 : index
    %229 = vector.load %arg9[%c0_171, %c64_172] : memref<4x640xf32, #tpu.memory_space<vmem>>, vector<4x512xf32>
    %230 = arith.addf %228, %229 : vector<4x512xf32>
    %cst_173 = arith.constant 0.000000e+00 : f32
    %231 = vector.broadcast %cst_173 : f32 to vector<4x512xf32>
    %232 = arith.maximumf %230, %231 : vector<4x512xf32>
    %233 = vector.extract_strided_slice %232 {offsets = [0, 0], sizes = [4, 256], strides = [1, 1]} : vector<4x512xf32> to vector<4x256xf32>
    %c0_174 = arith.constant 0 : index
    %c0_175 = arith.constant 0 : index
    %c0_176 = arith.constant 0 : index
    %234 = vector.load %arg8[%c0_174, %c0_175, %c0_176] : memref<2x4x256xf32, #tpu.memory_space<vmem>>, vector<1x4x256xf32>
    %235 = vector.shape_cast %234 : vector<1x4x256xf32> to vector<4x256xf32>
    %236 = vector.shape_cast %233 : vector<4x256xf32> to vector<1x4x256xf32>
    tpu.vector_store %arg8[%c0_174, %c0_175, %c0_176], %236 {strides = array<i32>} : memref<2x4x256xf32, #tpu.memory_space<vmem>>, vector<1x4x256xf32>,
    %237 = vector.extract_strided_slice %232 {offsets = [0, 256], sizes = [4, 256], strides = [1, 1]} : vector<4x512xf32> to vector<4x256xf32>
    %c1_177 = arith.constant 1 : index
    %c0_178 = arith.constant 0 : index
    %c0_179 = arith.constant 0 : index
    %238 = vector.load %arg8[%c1_177, %c0_178, %c0_179] : memref<2x4x256xf32, #tpu.memory_space<vmem>>, vector<1x4x256xf32>
    %239 = vector.shape_cast %238 : vector<1x4x256xf32> to vector<4x256xf32>
    %240 = vector.shape_cast %237 : vector<4x256xf32> to vector<1x4x256xf32>
    tpu.vector_store %arg8[%c1_177, %c0_178, %c0_179], %240 {strides = array<i32>} : memref<2x4x256xf32, #tpu.memory_space<vmem>>, vector<1x4x256xf32>,
    return
  }
  func.func @transform_0(%arg0: i32) -> (i32, i32, i32) {
    %c0_i32 = arith.constant 0 : i32
    %c0_i32_0 = arith.constant 0 : i32
    %c0_i32_1 = arith.constant 0 : i32
    return %arg0, %c0_i32, %c0_i32_0 : i32, i32, i32
  }
  func.func @transform_1(%arg0: i32) -> (i32, i32) {
    %c0_i32 = arith.constant 0 : i32
    %c0_i32_0 = arith.constant 0 : i32
    %c0_i32_1 = arith.constant 0 : i32
    return %c0_i32, %c0_i32_0 : i32, i32
  }
  func.func @transform_2(%arg0: i32) -> (i32, i32) {
    %c0_i32 = arith.constant 0 : i32
    %c0_i32_0 = arith.constant 0 : i32
    %c0_i32_1 = arith.constant 0 : i32
    return %c0_i32, %c0_i32_0 : i32, i32
  }
  func.func @transform_3(%arg0: i32) -> (i32, i32) {
    %c0_i32 = arith.constant 0 : i32
    %c0_i32_0 = arith.constant 0 : i32
    %c0_i32_1 = arith.constant 0 : i32
    return %c0_i32, %c0_i32_0 : i32, i32
  }
  func.func @transform_4(%arg0: i32) -> (i32, i32) {
    %c0_i32 = arith.constant 0 : i32
    %c0_i32_0 = arith.constant 0 : i32
    %c0_i32_1 = arith.constant 0 : i32
    return %c0_i32, %c0_i32_0 : i32, i32
  }
  func.func @transform_5(%arg0: i32) -> (i32, i32) {
    %c0_i32 = arith.constant 0 : i32
    %c0_i32_0 = arith.constant 0 : i32
    %c0_i32_1 = arith.constant 0 : i32
    return %c0_i32, %c0_i32_0 : i32, i32
  }
  func.func @transform_6(%arg0: i32) -> (i32, i32) {
    %c0_i32 = arith.constant 0 : i32
    %c0_i32_0 = arith.constant 0 : i32
    %c0_i32_1 = arith.constant 0 : i32
    return %c0_i32, %c0_i32_0 : i32, i32
  }
  func.func @transform_7(%arg0: i32) -> (i32, i32, i32) {
    %c0_i32 = arith.constant 0 : i32
    %c0_i32_0 = arith.constant 0 : i32
    %c0_i32_1 = arith.constant 0 : i32
    return %arg0, %c0_i32, %c0_i32_0 : i32, i32, i32
  }
}

</mosaic_0001>

<bundles_post_ra>
// kernel: mkrb_apply.1
= control target key start
LH: loop header
LB: loop body
LE: loop exit
PB: predicated region body
PF: predicated region fallthrough
CT: control target
= control target key end

     0   :  { %12 = vsyncpa [#allocation5], 0  ;;  %s3727_s24 = smov [#allocation4]   ;;  %s5130_s0 = inlined_call_operand.vmem [shape: f32[2,4,256], index: 0, kind: input, shape index: {}]   ;;  %s5131_s1 = inlined_call_operand.vmem [shape: bf16[4,36], index: 1, kind: input, shape index: {}]   ;;  %s5132_s2 = inlined_call_operand.vmem [shape: f32[4,1], index: 2, kind: input, shape index: {}]   ;;  %s5133_s3 = inlined_call_operand.vmem [shape: bf16[4,100], index: 3, kind: input, shape index: {}]   ;;  %s5134_s4 = inlined_call_operand.vmem [shape: f32[4,1], index: 4, kind: input, shape index: {}]   ;;  %s5135_s5 = inlined_call_operand.hbm [shape: f32[9,512], index: 5, kind: input, shape index: {}]   ;;  %s5136_s6 = inlined_call_operand.vmem [shape: f32[25,512], index: 6, kind: input, shape index: {}]   ;;  %s5137_s7 = inlined_call_operand.vmem [shape: f32[2,4,256], index: 7, kind: output, shape index: {}]  }
   0x1   :  { %s28_s25 = sshll.u32 %s3727_s24, 4  ;;  %s29_s25 = int_to_ptr.vmem [resolvable:$true] %s28_s25 }
   0x2   :  { %s3713_s26 = scalar_lea.vmem %s29_s25, 1024  ;;  %p3718_p1 = scmp.lt.s32.totalorder %s29_s25, %s29_s25 }
   0x3   :  { %p3714_p0 = scmp.ne.s32.totalorder %s29_s25, %s3713_s26  ;;  %p3719_p2 = scmp.lt.s32.totalorder %s3713_s26, %s3713_s26 }
   0x5   :  { %p3720_p3 = por %p3719_p2, %p3718_p1 }
   0x7   :  { %p3721_p4 = pnand %p3720_p3, %p3714_p0 }
   0x9   :  { %3724 = shalt.err (!%p3721_p4)
}
   0xa   :  { %s3728_s27 = smov 512   ;;  %s3729_s28 = smov 32  }
   0xb   :  { %34 = dma.hbm_to_vmem [thread:$0]  %s5135_s5, 1024, %s29_s25, [#allocation5], %s3728_s27, %s3728_s27, %s3729_s28  }
   0xc   :  { %3725 = dma.done.wait [#allocation5], 1024  }
   0xd   :  { %3726 = vsyncadd [#allocation5], 4294966272  ;;  %v74_v0 = vlaneseq  ;;  %vm41_vm0 = vcmask 519168   ;;  %vm43_vm1 = vcmask 1043968   ;;  %v3730_v1 = vmov 0.0   ;;  %v45_v7 = vld [vmem:[%s5130_s0] sm:$0xff] }
   0xe   :  { %42 = vst.msk [vmem:[#allocation2] sm:$0xf] %vm41_vm0, %v3730_v1  ;;  %v705_v8 = vld [vmem:[#allocation4 + $0x20] ss:$8 sm:$0xf]  ;;  %s3731_s9 = smov 64  }
   0xf   :  { %v75_v2 = vshrl.u32 %v74_v0, 7  ;;  %44 = vst.msk [vmem:[#allocation2 + $0x10] sm:$0xf] %vm43_vm1, %v3730_v1  ;;  %47 = vrot.lane.b32.xlu0 %v45_v7, %s3731_s9  ;;  %v453_v13 = vld [vmem:[#allocation4 + $0x5] ss:$8 sm:$0xf] }
  0x10   :  { %v3354_v14 = vld [vmem:[%s5130_s0 + $0x8] sm:$0xff]  ;;  %s3732_s12 = smov 81   ;;  %s3733_s0 = smov 65   ;;  %v3740_v1 = vmov 0   ;;  %vm54_vm2 = vcmask 1047556   ;;  %vm5180_vm3 = vcmask 523264  }
  0x11   :  { %v3802_v3 = vsub.s32 0, %v75_v2  ;;  %v3804_v4 = vsub.s32 1, %v75_v2  ;;  %v3806_v5 = vsub.s32 2, %v75_v2  ;;  %v3808_v6 = vsub.s32 3, %v75_v2  ;;  %s3734_s13 = smov 80   ;;  %s3735_s14 = smov 79   ;;  %3660 = vset.pattern.permute.xlu1 %v3740_v1  ;;  %899 = vmatprep.mubr.bf16.mxu0 %v3740_v1  ;;  %vm3871_vm4 = vmor %vm54_vm2, %vm43_vm1 }
  0x12   :  { %v620_v17 = vld [vmem:[#allocation4 + $0x7] ss:$8 sm:$0xf]  ;;  %v538_v25 = vld [vmem:[#allocation4 + $0x6] ss:$8 sm:$0xf]  ;;  %940 = vmatprep.mubr.bf16.mxu1 %v3740_v1  ;;  %3661 = vset.pattern.permute.xlu0 %v3740_v1 }
  0x13   :  { %v710_v9 = vrot.slane %v705_v8, %v3802_v3  ;;  %v714_v10 = vrot.slane %v705_v8, %v3804_v4  ;;  %v718_v11 = vrot.slane %v705_v8, %v3806_v5  ;;  %v722_v12 = vrot.slane %v705_v8, %v3808_v6  ;;  %61 = vrot.lane.b32.xlu0 %v3354_v14, %s3731_s9  ;;  %v156_v32 = vld [vmem:[#allocation4 + $0x1] ss:$8 sm:$0xf]  ;;  %v323_v39 = vld [vmem:[#allocation4 + $0x3] ss:$8 sm:$0xf] }
  0x14   :  { %v458_v15 = vrot.slane %v453_v13, %v3802_v3  ;;  %v462_v16 = vrot.slane %v453_v13, %v3804_v4  ;;  %v466_v20 = vrot.slane %v453_v13, %v3806_v5  ;;  %v470_v21 = vrot.slane %v453_v13, %v3808_v6  ;;  %v72_v46 = vld [vmem:[#allocation4] ss:$8 sm:$0xf]  ;;  %s3736_s15 = smov 48   ;;  %s3737_s16 = smov 63  }
  0x15   :  { %v723_v18 = vcombine.low %v710_v9, %v714_v10  ;;  %v724_v19 = vcombine.low %v718_v11, %v722_v12  ;;  %v625_v23 = vrot.slane %v620_v17, %v3802_v3  ;;  %v629_v24 = vrot.slane %v620_v17, %v3804_v4  ;;  %v241_v53 = vld [vmem:[#allocation4 + $0x2] ss:$8 sm:$0xf]  ;;  %s3738_s17 = smov 47   ;;  %s3739_s18 = smov 49  }
  0x16   :  { %v471_v22 = vcombine.low %v458_v15, %v462_v16  ;;  %v472_v26 = vcombine.low %v466_v20, %v470_v21  ;;  %v633_v27 = vrot.slane %v620_v17, %v3806_v5  ;;  %v637_v28 = vrot.slane %v620_v17, %v3808_v6  ;;  %s3741_s26 = smov 98   ;;  %s5138_s30 = smov 95  }
  0x17   :  { %725 = vrot.lane.b32.xlu1 %v723_v18, %s3732_s12  ;;  %v638_v29 = vcombine.low %v625_v23, %v629_v24  ;;  %v543_v30 = vrot.slane %v538_v25, %v3802_v3  ;;  %v547_v31 = vrot.slane %v538_v25, %v3804_v4  ;;  %v551_v34 = vrot.slane %v538_v25, %v3806_v5  ;;  %s5140_s10 = smov 97   ;;  %s3744_s20 = smov 94  }
  0x18   :  { %473 = vrot.lane.b32.xlu0 %v471_v22, %s3733_s0  ;;  %v639_v33 = vcombine.low %v633_v27, %v637_v28  ;;  %v555_v35 = vrot.slane %v538_v25, %v3808_v6  ;;  %v161_v37 = vrot.slane %v156_v32, %v3802_v3  ;;  %v165_v38 = vrot.slane %v156_v32, %v3804_v4  ;;  %s3746_s29 = smov 82   ;;  %s3747_s25 = smov 78  }
  0x19   :  { %v556_v36 = vcombine.low %v543_v30, %v547_v31  ;;  %v169_v41 = vrot.slane %v156_v32, %v3806_v5  ;;  %v173_v42 = vrot.slane %v156_v32, %v3808_v6  ;;  %v328_v44 = vrot.slane %v323_v39, %v3802_v3  ;;  %s3748_s8 = smov 66   ;;  %s3749_s21 = smov 50  }
  0x1a   :  { %v557_v40 = vcombine.low %v551_v34, %v555_v35  ;;  %v174_v43 = vcombine.low %v161_v37, %v165_v38  ;;  %v332_v45 = vrot.slane %v323_v39, %v3804_v4  ;;  %v336_v48 = vrot.slane %v323_v39, %v3806_v5  ;;  %s3750_s19 = smov 62   ;;  %s3751_s24 = smov 46  }
  0x1b   :  { %727 = vrot.lane.b32.xlu1 %v724_v19, %s3732_s12  ;;  %v175_v47 = vcombine.low %v169_v41, %v173_v42  ;;  %v340_v49 = vrot.slane %v323_v39, %v3808_v6  ;;  %v77_v51 = vrot.slane %v72_v46, %v3802_v3  ;;  %v81_v52 = vrot.slane %v72_v46, %v3804_v4  ;;  %s3752_s23 = smov 34   ;;  %s3753_s11 = smov 31  }
  0x1c   :  { %640 = vrot.lane.b32.xlu0 %v638_v29, %s3734_s13  ;;  %v341_v50 = vcombine.low %v328_v44, %v332_v45  ;;  %v85_v55 = vrot.slane %v72_v46, %v3806_v5  ;;  %v89_v56 = vrot.slane %v72_v46, %v3808_v6  ;;  %v246_v58 = vrot.slane %v241_v53, %v3802_v3  ;;  %s3754_s22 = smov 33  }
  0x1d   :  { %v342_v54 = vcombine.low %v336_v48, %v340_v49  ;;  %v90_v57 = vcombine.low %v77_v51, %v81_v52  ;;  %v250_v59 = vrot.slane %v241_v53, %v3804_v4  ;;  %v254_v60 = vrot.slane %v241_v53, %v3806_v5 }
  0x1e   :  { %v91_v61 = vcombine.low %v85_v55, %v89_v56  ;;  %v258_v63 = vrot.slane %v241_v53, %v3808_v6  ;;  %vm5182_vm5 = vcmask 662528   ;;  %vm100_vm6 = vcmask 1043456  }
  0x1f   :  { %475 = vrot.lane.b32.xlu1 %v472_v26, %s3733_s0  ;;  %v259_v62 = vcombine.low %v246_v58, %v250_v59  ;;  %vm311_vm7 = vcmask 646144   ;;  %vm5190_vm8 = vcmask 531456   ;;  %vm5188_vm9 = vcmask 654336  }
  0x20   :  { %558 = vrot.lane.b32.xlu0 %v556_v36, %s3735_s14  ;;  %v260_v0 = vcombine.low %v254_v60, %v258_v63  ;;  %vm98_vm10 = vcmask 384000   ;;  %vm267_vm11 = vcmask 400384   ;;  %vm182_vm12 = vcmask 392192  }
  0x21   :  { %vm349_vm13 = vcmask 515072   ;;  %vm5148_vm14 = vcmask 1041408   ;;  %vm850_vm15 = vcmask 293888   ;;  %vm1371_vm1 = vcmask 277504  }
  0x22   :  { %vm1119_vm2 = vcmask 252928  }
  0x23   :  { %642 = vrot.lane.b32.xlu1 %v639_v33, %s3734_s13 }
  0x24   :  { %176 = vrot.lane.b32.xlu0 %v174_v43, %s3736_s15 }
  0x27   :  { %560 = vrot.lane.b32.xlu1 %v557_v40, %s3735_s14 }
  0x28   :  { %343 = vrot.lane.b32.xlu0 %v341_v50, %s3737_s16 }
  0x2b   :  { %178 = vrot.lane.b32.xlu1 %v175_v47, %s3736_s15 }
  0x2c   :  { %92 = vrot.lane.b32.xlu0 %v90_v57, %s3738_s17 }
  0x2f   :  { %345 = vrot.lane.b32.xlu1 %v342_v54, %s3737_s16 }
  0x30   :  { %261 = vrot.lane.b32.xlu0 %v259_v62, %s3739_s18 }
  0x33   :  { %94 = vrot.lane.b32.xlu1 %v91_v61, %s3738_s17 }
  0x37   :  { %263 = vrot.lane.b32.xlu1 %v260_v0, %s3739_s18 }
  0x81   :  { %v48_v2 = vpop.permute.xlu0 %47 }
  0x82   :  { %v49_v8 = vrot.slane %v48_v2, 4 }
  0x84   :  { %v51_v9 = vsel %vm5180_vm3, %v49_v8, %v48_v2  ;;  %57 = vst.msk [vmem:[#allocation2 + $0x8] sm:$0xf] %vm41_vm0, %v49_v8 }
  0x85   :  { %56 = vst.msk [vmem:[#allocation2] sm:$0xff] %vm3871_vm4, %v51_v9  ;;  %v62_v11 = vpop.permute.xlu0 %61 }
  0x86   :  { %v63_v12 = vrot.slane %v62_v11, 4 }
  0x88   :  { %v64_v13 = vsel %vm5180_vm3, %v63_v12, %v62_v11  ;;  %68 = vst.msk [vmem:[#allocation2 + $0x10] sm:$0xf] %vm41_vm0, %v63_v12 }
  0x89   :  { %v3879_v10 = vpop.permute.xlu1 %725  ;;  %67 = vst.msk [vmem:[#allocation2 + $0x8] sm:$0xff] %vm3871_vm4, %v64_v13 }
  0x8a   :  { %v3887_v15 = vpop.permute.xlu0 %473  ;;  %v729_v40 = vrot.slane %v3879_v10, 4 }
  0x8b   :  { %v477_v60 = vrot.slane %v3887_v15, 4 }
  0x8c   :  { %v3925_v45 = vld [vmem:[#allocation2] sm:$0xff]  ;;  %v732_v52 = vsel %vm5182_vm5, %v729_v40, %v3879_v10 }
  0x8d   :  { %v3885_v14 = vpop.permute.xlu1 %727  ;;  %v738_v54 = vmul.f32 %v732_v52, %v3925_v45  ;;  %v480_v12 = vsel %vm5190_vm8, %v477_v60, %v3887_v15 }
  0x8e   :  { %v3891_v17 = vpop.permute.xlu0 %640  ;;  %v730_v18 = vrot.slane %v3885_v14, 4 }
  0x8f   :  { %v703_v20 = vld [vmem:[#allocation2 + $0x10] sm:$0xf]  ;;  %v743_v63 = vcombine.high %v738_v54, %v738_v54 }
  0x90   :  { %v406_v21 = vld [vmem:[#allocation2 + $0x10] sm:$0xf]  ;;  %v3895_v22 = vld [vmem:[#allocation2 + $0x8] sm:$0xff]  ;;  %v740_v23 = vmul.f32 %v730_v18, %v703_v20  ;;  %v733_v11 = vsel %vm100_vm6, %v729_v40, %v730_v18 }
  0x91   :  { %v3889_v16 = vpop.permute.xlu1 %475  ;;  %v3543_v24 = vpack.c.bf16 %v406_v21, %v406_v21  ;;  %v451_v25 = vld [vmem:[#allocation2 + $0x10] sm:$0xf]  ;;  %v3905_v28 = vcombine.high %v3895_v22, %v3895_v22  ;;  %v644_v21 = vrot.slane %v3891_v17, 4  ;;  %v734_v15 = vsel %vm5182_vm5, %v733_v11, %v3885_v14 }
  0x92   :  { %v478_v19 = vrot.slane %v3889_v16, 4  ;;  %v3901_v27 = vpop.permute.xlu0 %558  ;;  %v3555_v30 = vpack.c.bf16 %v740_v23, %v740_v23  ;;  %v618_v32 = vld [vmem:[#allocation2 + $0x10] sm:$0xf]  ;;  %v739_v40 = vmul.f32 %v734_v15, %v3895_v22 }
  0x93   :  { %435 = vrot.lane.b32.xlu1 %v3543_v24, %s3731_s9  ;;  %v3542_v33 = vpack.c.bf16 %v3905_v28, %v3895_v22  ;;  %v536_v36 = vld [vmem:[#allocation2 + $0x10] sm:$0xf]  ;;  %v562_v42 = vrot.slane %v3901_v27, 4  ;;  %v647_v14 = vsel %vm5188_vm9, %v644_v21, %v3891_v17 }
  0x94   :  { %v488_v31 = vmul.f32 %v478_v19, %v451_v25  ;;  %769 = vrot.lane.b32.xlu0 %v3555_v30, %s3738_s17  ;;  %v154_v51 = vld [vmem:[#allocation2 + $0x10] sm:$0xf]  ;;  %v3553_v25 = vpack.c.bf16 %v743_v63, %v738_v54  ;;  %v653_v54 = vmul.f32 %v3925_v45, %v647_v14 }
  0x95   :  { %v3899_v26 = vpop.permute.xlu1 %642  ;;  %v71_v10 = vld [vmem:[#allocation2 + $0x10] sm:$0xf]  ;;  %v565_v52 = vsel %vm311_vm7, %v562_v42, %v3901_v27 }
  0x96   :  { %v645_v29 = vrot.slane %v3899_v26, 4  ;;  %v3914_v35 = vpop.permute.xlu0 %176  ;;  %v3546_v38 = vpack.c.bf16 %v488_v31, %v488_v31 }
  0x98   :  { %v655_v39 = vmul.f32 %v645_v29, %v618_v32  ;;  %433 = vrot.lane.b32.xlu0 %v3542_v33, %s3731_s9  ;;  %v515_v47 = vrot.slane %v3546_v38, 6 }
  0x99   :  { %v561_v34 = vpop.permute.xlu1 %560 }
  0x9a   :  { %v563_v37 = vrot.slane %v561_v34, 4  ;;  %v3923_v44 = vpop.permute.xlu0 %343  ;;  %v3552_v49 = vpack.c.bf16 %v655_v39, %v655_v39  ;;  %v3965_v39 = vcombine.high %v3925_v45, %v3925_v45 }
  0x9c   :  { %v573_v41 = vmul.f32 %v563_v37, %v536_v36  ;;  %v566_v50 = vsel %vm100_vm6, %v562_v42, %v563_v37  ;;  %520 = vrot.lane.b32.xlu0 %v515_v47, %s3737_s16  ;;  %v682_v58 = vrot.slane %v3552_v49, 6  ;;  %v239_v36 = vld [vmem:[#allocation2 + $0x10] sm:$0xf]  ;;  %v3541_v17 = vpack.c.bf16 %v3965_v39, %v3925_v45 }
  0x9d   :  { %v3921_v43 = vpop.permute.xlu1 %178  ;;  %v567_v57 = vsel %vm311_vm7, %v566_v50, %v561_v34  ;;  %v486_v34 = vmul.f32 %v3925_v45, %v480_v12 }
  0x9e   :  { %v181_v46 = vrot.slane %v3921_v43, 4  ;;  %v3549_v48 = vpack.c.bf16 %v573_v41, %v573_v41  ;;  %v3940_v56 = vpop.permute.xlu0 %92  ;;  %v572_v61 = vmul.f32 %v3895_v22, %v567_v57  ;;  %v180_v41 = vrot.slane %v3914_v35, 4 }
  0x9f   :  { %v96_v0 = vrot.slane %v3940_v56, 4  ;;  %v744_v57 = vcombine.high %v739_v40, %v739_v40 }
  0xa0   :  { %602 = vrot.lane.b32.xlu1 %v3549_v48, %s3739_s18  ;;  %v191_v53 = vmul.f32 %v181_v46, %v154_v51  ;;  %687 = vrot.lane.b32.xlu0 %v682_v58, %s3736_s15  ;;  %v577_v30 = vcombine.high %v572_v61, %v572_v61  ;;  %v491_v58 = vcombine.high %v486_v34, %v486_v34 }
  0xa1   :  { %v3938_v55 = vpop.permute.xlu1 %345  ;;  %v183_v27 = vsel %vm182_vm12, %v180_v41, %v3914_v35  ;;  %v99_v63 = vsel %vm98_vm10, %v96_v0, %v3940_v56  ;;  %v3554_v56 = vpack.c.bf16 %v744_v57, %v739_v40 }
  0xa2   :  { %v3534_v59 = vpack.c.bf16 %v191_v53, %v191_v53  ;;  %v262_v9 = vpop.permute.xlu0 %261  ;;  %v3548_v50 = vpack.c.bf16 %v577_v30, %v572_v61  ;;  %v481_v53 = vsel %vm100_vm6, %v477_v60, %v478_v19  ;;  %v648_v19 = vsel %vm100_vm6, %v644_v21, %v645_v29 }
  0xa3   :  { %v265_v32 = vrot.slane %v262_v9, 4  ;;  %v189_v35 = vmul.f32 %v3925_v45, %v183_v27  ;;  %v3544_v60 = vpack.c.bf16 %v491_v58, %v486_v34  ;;  %v649_v29 = vsel %vm5188_vm9, %v648_v19, %v3899_v26 }
  0xa4   :  { %v218_v8 = vrot.slane %v3534_v59, 6  ;;  %v571_v59 = vmul.f32 %v3925_v45, %v565_v52  ;;  %v654_v26 = vmul.f32 %v3895_v22, %v649_v29 }
  0xa5   :  { %v95_v62 = vpop.permute.xlu1 %94  ;;  %v268_v12 = vsel %vm267_vm11, %v265_v32, %v262_v9  ;;  %v184_v9 = vsel %vm100_vm6, %v180_v41, %v181_v46  ;;  %v321_v41 = vld [vmem:[#allocation2 + $0x10] sm:$0xf] }
  0xa6   :  { %v97_v2 = vrot.slane %v95_v62, 4  ;;  %223 = vrot.lane.b32.xlu0 %v218_v8, %s3734_s13  ;;  %v658_v8 = vcombine.high %v653_v54, %v653_v54  ;;  %v185_v15 = vsel %vm182_vm12, %v184_v9, %v3921_v43  ;;  %v3484_v9 = vld [vmem:[%s5136_s6 + $0x46] ss:$8 sm:$0xf] }
  0xa7   :  { %v190_v46 = vmul.f32 %v3895_v22, %v185_v15  ;;  %v2811_v15 = vrot.slane %v3484_v9, %v3808_v6 }
  0xa8   :  { %v101_v13 = vsel %vm100_vm6, %v96_v0, %v97_v2  ;;  %v108_v20 = vmul.f32 %v97_v2, %v71_v10  ;;  %v482_v2 = vsel %vm5190_vm8, %v481_v53, %v3889_v16  ;;  %v106_v10 = vmul.f32 %v3925_v45, %v99_v63  ;;  %v794_v63 = vld [vmem:[%s5132_s2] sm:$0xf]  ;;  %s3745_s2 = smov 96  }
  0xa9   :  { %v102_v23 = vsel %vm98_vm10, %v101_v13, %v95_v62  ;;  %v264_v24 = vpop.permute.xlu1 %263  ;;  %v347_v62 = vrot.slane %v3923_v44, 4  ;;  %v576_v0 = vcombine.high %v571_v59, %v571_v59  ;;  %v487_v13 = vmul.f32 %v3895_v22, %v482_v2  ;;  %v955_v2 = vld [vmem:[#allocation2 + $0x10] sm:$0xf] }
  0xaa   :  { %v107_v31 = vmul.f32 %v3895_v22, %v102_v23  ;;  %v266_v33 = vrot.slane %v264_v24, 4  ;;  %v3531_v18 = vpack.c.bf16 %v108_v20, %v108_v20  ;;  %765 = vrot.lane.b32.xlu0 %v3553_v25, %s3738_s17  ;;  %v513_v20 = vrot.slane %v3544_v60, 6 }
  0xab   :  { %v350_v16 = vsel %vm349_vm13, %v347_v62, %v3923_v44  ;;  %v3550_v21 = vpack.c.bf16 %v658_v8, %v653_v54  ;;  %v194_v23 = vcombine.high %v189_v35, %v189_v35  ;;  %v274_v25 = vmul.f32 %v3925_v45, %v268_v12  ;;  %v3480_v8 = vld [vmem:[%s5136_s6 + $0x45] ss:$8 sm:$0xf] }
  0xac   :  { %v269_v37 = vsel %vm100_vm6, %v265_v32, %v266_v33  ;;  %137 = vrot.lane.b32.xlu1 %v3531_v18, %s3732_s12  ;;  %v276_v38 = vmul.f32 %v266_v33, %v239_v36  ;;  %v112_v51 = vcombine.high %v107_v31, %v107_v31  ;;  %v3547_v30 = vpack.c.bf16 %v576_v0, %v571_v59 }
  0xad   :  { %v270_v47 = vsel %vm267_vm11, %v269_v37, %v264_v24  ;;  %v356_v24 = vmul.f32 %v3925_v45, %v350_v16  ;;  %v111_v44 = vcombine.high %v106_v10, %v106_v10  ;;  %v680_v32 = vrot.slane %v3550_v21, 6  ;;  %v3476_v21 = vld [vmem:[%s5136_s6 + $0x44] ss:$8 sm:$0xf] }
  0xae   :  { %v275_v48 = vmul.f32 %v3895_v22, %v270_v47  ;;  %v3537_v49 = vpack.c.bf16 %v276_v38, %v276_v38  ;;  %600 = vrot.lane.b32.xlu0 %v3548_v50, %s3739_s18  ;;  %v3530_v42 = vpack.c.bf16 %v112_v51, %v107_v31  ;;  %v348_v31 = vrot.slane %v3938_v55, 4 }
  0xaf   :  { %v3532_v33 = vpack.c.bf16 %v194_v23, %v189_v35  ;;  %v492_v18 = vcombine.high %v487_v13, %v487_v13  ;;  %v3529_v34 = vpack.c.bf16 %v111_v44, %v106_v10  ;;  %v279_v36 = vcombine.high %v274_v25, %v274_v25 }
  0xb0   :  { %305 = vrot.lane.b32.xlu1 %v3537_v49, %s3735_s14  ;;  %v280_v61 = vcombine.high %v275_v48, %v275_v48  ;;  %v361_v37 = vcombine.high %v356_v24, %v356_v24  ;;  %v351_v38 = vsel %vm100_vm6, %v347_v62, %v348_v31  ;;  %v659_v47 = vcombine.high %v654_v26, %v654_v26 }
  0xb1   :  { %v216_v40 = vrot.slane %v3532_v33, 6  ;;  %v3545_v14 = vpack.c.bf16 %v492_v18, %v487_v13  ;;  %v3535_v49 = vpack.c.bf16 %v279_v36, %v274_v25  ;;  %v358_v50 = vmul.f32 %v348_v31, %v321_v41  ;;  %v3472_v41 = vld [vmem:[%s5136_s6 + $0x43] ss:$8 sm:$0xf] }
  0xb2   :  { %135 = vrot.lane.b32.xlu0 %v3530_v42, %s3732_s12  ;;  %v3536_v11 = vpack.c.bf16 %v280_v61, %v275_v48  ;;  %v352_v48 = vsel %vm349_vm13, %v351_v38, %v3938_v55  ;;  %v3538_v43 = vpack.c.bf16 %v361_v37, %v356_v24  ;;  %v3551_v54 = vpack.c.bf16 %v659_v47, %v654_v26 }
  0xb3   :  { %v357_v51 = vmul.f32 %v3895_v22, %v352_v48  ;;  %v514_v52 = vrot.slane %v3545_v14, 6  ;;  %v3540_v53 = vpack.c.bf16 %v358_v50, %v358_v50  ;;  %v195_v57 = vcombine.high %v190_v46, %v190_v46 }
  0xb4   :  { %431 = vrot.lane.b32.xlu1 %v3541_v17, %s3731_s9  ;;  %v383_v17 = vrot.slane %v3538_v43, 6  ;;  %v681_v55 = vrot.slane %v3551_v54, 6  ;;  %v2722_v10 = vrot.slane %v3480_v8, %v3806_v5  ;;  %v2714_v16 = vrot.slane %v3480_v8, %v3802_v3 }
  0xb5   :  { %v385_v58 = vrot.slane %v3540_v53, 6  ;;  %v3533_v59 = vpack.c.bf16 %v195_v57, %v190_v46  ;;  %v362_v27 = vcombine.high %v357_v51, %v357_v51  ;;  %v2718_v12 = vrot.slane %v3480_v8, %v3804_v4 }
  0xb6   :  { %303 = vrot.lane.b32.xlu0 %v3536_v11, %s3735_s14  ;;  %v3488_v11 = vld [vmem:[%s5136_s6 + $0x47] ss:$8 sm:$0xf]  ;;  %v2644_v44 = vrot.slane %v3476_v21, %v3808_v6  ;;  %v2632_v26 = vrot.slane %v3476_v21, %v3802_v3  ;;  %v2807_v18 = vrot.slane %v3484_v9, %v3806_v5  ;;  %v2799_v37 = vrot.slane %v3484_v9, %v3802_v3 }
  0xb7   :  { %v217_v42 = vrot.slane %v3533_v59, 6  ;;  %v3539_v61 = vpack.c.bf16 %v362_v27, %v357_v51  ;;  %v2889_v29 = vrot.slane %v3488_v11, %v3806_v5  ;;  %v2881_v23 = vrot.slane %v3488_v11, %v3802_v3  ;;  %v3468_v59 = vld [vmem:[%s5136_s6 + $0x42] ss:$8 sm:$0xf] }
  0xb8   :  { %767 = vrot.lane.b32.xlu1 %v3554_v56, %s3738_s17  ;;  %v2885_v24 = vrot.slane %v3488_v11, %v3804_v4  ;;  %v2803_v38 = vrot.slane %v3484_v9, %v3804_v4  ;;  %v2813_v46 = vcombine.low %v2807_v18, %v2811_v15  ;;  %v2555_v50 = vrot.slane %v3472_v41, %v3806_v5 }
  0xb9   :  { %v384_v62 = vrot.slane %v3539_v61, 6  ;;  %v2559_v51 = vrot.slane %v3472_v41, %v3808_v6  ;;  %v2547_v53 = vrot.slane %v3472_v41, %v3802_v3  ;;  %v2551_v54 = vrot.slane %v3472_v41, %v3804_v4 }
  0xba   :  { %516 = vrot.lane.b32.xlu0 %v513_v20, %s3737_s16  ;;  %v2893_v20 = vrot.slane %v3488_v11, %v3808_v6  ;;  %v2894_v31 = vcombine.low %v2881_v23, %v2885_v24  ;;  %v2812_v47 = vcombine.low %v2799_v37, %v2803_v38 }
  0xbb   :  { %v2561_v57 = vcombine.low %v2555_v50, %v2559_v51  ;;  %v2560_v27 = vcombine.low %v2547_v53, %v2551_v54 }
  0xbc   :  { %598 = vrot.lane.b32.xlu1 %v3547_v30, %s3739_s18  ;;  %v2895_v25 = vcombine.low %v2889_v29, %v2893_v20  ;;  %v2640_v30 = vrot.slane %v3476_v21, %v3806_v5  ;;  %v3452_v29 = vld [vmem:[%s5136_s6 + $0x26] ss:$8 sm:$0xf] }
  0xbd   :  { %v2145_v24 = vrot.slane %v3452_v29, %v3806_v5  ;;  %v2137_v9 = vrot.slane %v3452_v29, %v3802_v3 }
  0xbe   :  { %683 = vrot.lane.b32.xlu0 %v680_v32, %s3736_s15  ;;  %v2636_v32 = vrot.slane %v3476_v21, %v3804_v4  ;;  %v2646_v33 = vcombine.low %v2640_v30, %v2644_v44  ;;  %v3433_v30 = vld [vmem:[%s5136_s6 + $0x21] ss:$8 sm:$0xf] }
  0xbf   :  { %v1760_v37 = vrot.slane %v3433_v30, %v3802_v3  ;;  %v1764_v38 = vrot.slane %v3433_v30, %v3804_v4 }
  0xc0   :  { %133 = vrot.lane.b32.xlu1 %v3529_v34, %s3732_s12  ;;  %v3464_v34 = vld [vmem:[%s5136_s6 + $0x41] ss:$8 sm:$0xf]  ;;  %v2645_v36 = vcombine.low %v2632_v26, %v2636_v32  ;;  %v1768_v32 = vrot.slane %v3433_v30, %v3806_v5 }
  0xc1   :  { %v2396_v14 = vrot.slane %v3464_v34, %v3808_v6  ;;  %v2384_v48 = vrot.slane %v3464_v34, %v3802_v3 }
  0xc2   :  { %219 = vrot.lane.b32.xlu0 %v216_v40, %s3734_s13  ;;  %v2392_v40 = vrot.slane %v3464_v34, %v3806_v5 }
  0xc4   :  { %301 = vrot.lane.b32.xlu1 %v3535_v49, %s3735_s14  ;;  %v2388_v49 = vrot.slane %v3464_v34, %v3804_v4  ;;  %v2398_v43 = vcombine.low %v2392_v40, %v2396_v14  ;;  %v3441_v34 = vld [vmem:[%s5136_s6 + $0x23] ss:$8 sm:$0xf] }
  0xc5   :  { %v1935_v14 = vrot.slane %v3441_v34, %v3806_v5  ;;  %v1939_v41 = vrot.slane %v3441_v34, %v3808_v6  ;;  %v1927_v50 = vrot.slane %v3441_v34, %v3802_v3  ;;  %v1931_v51 = vrot.slane %v3441_v34, %v3804_v4 }
  0xc6   :  { %386 = vrot.lane.b32.xlu0 %v383_v17, %s3733_s0  ;;  %v2397_v17 = vcombine.low %v2384_v48, %v2388_v49  ;;  %v3429_v48 = vld [vmem:[%s5136_s6 + $0x20] ss:$8 sm:$0xf] }
  0xc7   :  { %v1688_v53 = vrot.slane %v3429_v48, %v3806_v5  ;;  %v1692_v54 = vrot.slane %v3429_v48, %v3808_v6 }
  0xc8   :  { %518 = vrot.lane.b32.xlu1 %v514_v52, %s3737_s16  ;;  %v3460_v52 = vld [vmem:[%s5136_s6 + $0x40] ss:$8 sm:$0xf] }
  0xc9   :  { %v2308_v61 = vrot.slane %v3460_v52, %v3804_v4 }
  0xca   :  { %390 = vrot.lane.b32.xlu0 %v385_v58, %s3733_s0  ;;  %v2312_v58 = vrot.slane %v3460_v52, %v3806_v5 }
  0xcc   :  { %685 = vrot.lane.b32.xlu1 %v681_v55, %s3736_s15  ;;  %v2316_v55 = vrot.slane %v3460_v52, %v3808_v6 }
  0xce   :  { %961 = vrot.lane.b32.xlu0 %v3925_v45, %s3731_s9  ;;  %v3492_v45 = vld [vmem:[%s5136_s6 + $0x60] ss:$8 sm:$0xf] }
  0xcf   :  { %v2974_v19 = vrot.slane %v3492_v45, %v3806_v5  ;;  %v2966_v35 = vrot.slane %v3492_v45, %v3802_v3  ;;  %v2970_v60 = vrot.slane %v3492_v45, %v3804_v4 }
  0xd0   :  { %221 = vrot.lane.b32.xlu1 %v217_v42, %s3734_s13  ;;  %v2304_v42 = vrot.slane %v3460_v52, %v3802_v3 }
  0xd1   :  { %v2979_v0 = vcombine.low %v2966_v35, %v2970_v60  ;;  %v2471_v35 = vrot.slane %v3468_v59, %v3804_v4 }
  0xd2   :  { %965 = vrot.lane.b32.xlu0 %v3895_v22, %s3731_s9  ;;  %v2978_v22 = vrot.slane %v3492_v45, %v3808_v6  ;;  %v3448_v45 = vld [vmem:[%s5136_s6 + $0x25] ss:$8 sm:$0xf] }
  0xd4   :  { %388 = vrot.lane.b32.xlu1 %v384_v62, %s3733_s0  ;;  %v2980_v56 = vcombine.low %v2974_v19, %v2978_v22  ;;  %v2318_v62 = vcombine.low %v2312_v58, %v2316_v55  ;;  %v2317_v19 = vcombine.low %v2304_v42, %v2308_v61  ;;  %v2467_v22 = vrot.slane %v3468_v59, %v3802_v3  ;;  %v3437_v55 = vld [vmem:[%s5136_s6 + $0x22] ss:$8 sm:$0xf] }
  0xd5   :  { %v1684_v42 = vrot.slane %v3429_v48, %v3804_v4  ;;  %v1694_v61 = vcombine.low %v1688_v53, %v1692_v54 }
  0xd6   :  { %969 = vrot.lane.b32.xlu0 %v955_v2, %s3731_s9  ;;  %v2479_v2 = vrot.slane %v3468_v59, %v3808_v6  ;;  %v2480_v11 = vcombine.low %v2467_v22, %v2471_v35  ;;  %v1845_v22 = vrot.slane %v3437_v55, %v3802_v3  ;;  %v1849_v35 = vrot.slane %v3437_v55, %v3804_v4 }
  0xd8   :  { %797 = vperm.xlu1 %3660, %v794_v63   ;;  %v2475_v63 = vrot.slane %v3468_v59, %v3806_v5  ;;  %v1940_v59 = vcombine.low %v1927_v50, %v1931_v51 }
  0xda   :  { %2983 = vrot.lane.b32.xlu0 %v2980_v56, %s3741_s26  ;;  %v2481_v60 = vcombine.low %v2475_v63, %v2479_v2  ;;  %v2054_v56 = vrot.slane %v3448_v45, %v3802_v3  ;;  %v1857_v63 = vrot.slane %v3437_v55, %v3808_v6 }
  0xdc   :  { %963 = vrot.lane.b32.xlu1 %v3965_v39, %s3731_s9  ;;  %v2726_v39 = vrot.slane %v3480_v8, %v3808_v6  ;;  %v2062_v8 = vrot.slane %v3448_v45, %v3806_v5 }
  0xde   :  { %v2728_v13 = vcombine.low %v2722_v10, %v2726_v39  ;;  %v2066_v10 = vrot.slane %v3448_v45, %v3808_v6  ;;  %v3456_v39 = vld [vmem:[%s5136_s6 + $0x27] ss:$8 sm:$0xf] }
  0xdf   :  { %v2219_v21 = vrot.slane %v3456_v39, %v3802_v3 }
  0xe0   :  { %967 = vrot.lane.b32.xlu1 %v3905_v28, %s3731_s9  ;;  %v2727_v28 = vcombine.low %v2714_v16, %v2718_v12  ;;  %2731 = vrot.lane.b32.xlu0 %v2728_v13, %s5138_s30  ;;  %v2068_v16 = vcombine.low %v2062_v8, %v2066_v10  ;;  %v2227_v12 = vrot.slane %v3456_v39, %v3806_v5 }
  0xe1   :  { %v2231_v13 = vrot.slane %v3456_v39, %v3808_v6 }
  0xe3   :  { %v2233_v23 = vcombine.low %v2227_v12, %v2231_v13 }
  0xe4   :  { %2981 = vrot.lane.b32.xlu1 %v2979_v0, %s3741_s26  ;;  %2898 = vrot.lane.b32.xlu0 %v2895_v25, %s5140_s10  ;;  %v2058_v0 = vrot.slane %v3448_v45, %v3804_v4  ;;  %v2149_v25 = vrot.slane %v3452_v29, %v3808_v6  ;;  %v3417_v45 = vld [vmem:[%s5136_s6 + $0x5] ss:$8 sm:$0xf] }
  0xe5   :  { %v1440_v8 = vrot.slane %v3417_v45, %v3806_v5  ;;  %v1444_v10 = vrot.slane %v3417_v45, %v3808_v6  ;;  %v1436_v12 = vrot.slane %v3417_v45, %v3804_v4 }
  0xe6   :  { %v2067_v20 = vcombine.low %v2054_v56, %v2058_v0  ;;  %v2151_v26 = vcombine.low %v2145_v24, %v2149_v25  ;;  %v3425_v56 = vld [vmem:[%s5136_s6 + $0x7] ss:$8 sm:$0xf]  ;;  %v1858_v0 = vcombine.low %v1845_v22, %v1849_v35 }
  0xe7   :  { %v1446_v13 = vcombine.low %v1440_v8, %v1444_v10  ;;  %v1597_v25 = vrot.slane %v3425_v56, %v3802_v3 }
  0xe8   :  { %2729 = vrot.lane.b32.xlu1 %v2727_v28, %s5138_s30  ;;  %2649 = vrot.lane.b32.xlu0 %v2646_v33, %s3744_s20  ;;  %v2223_v28 = vrot.slane %v3456_v39, %v3804_v4  ;;  %v1772_v33 = vrot.slane %v3433_v30, %v3808_v6  ;;  %v1601_v30 = vrot.slane %v3425_v56, %v3804_v4  ;;  %s3755_s30 = smov 30  }
  0xea   :  { %v2232_v44 = vcombine.low %v2219_v21, %v2223_v28  ;;  %v1774_v40 = vcombine.low %v1768_v32, %v1772_v33  ;;  %v3421_v33 = vld [vmem:[%s5136_s6 + $0x6] ss:$8 sm:$0xf] }
  0xeb   :  { %v1517_v54 = vrot.slane %v3421_v33, %v3802_v3 }
  0xec   :  { %2896 = vrot.lane.b32.xlu1 %v2894_v31, %s5140_s10  ;;  %2816 = vrot.lane.b32.xlu0 %v2813_v46, %s3745_s2  ;;  %v2141_v31 = vrot.slane %v3452_v29, %v3804_v4  ;;  %v1605_v29 = vrot.slane %v3425_v56, %v3806_v5 }
  0xf0   :  { %2647 = vrot.lane.b32.xlu1 %v2645_v36, %s3744_s20  ;;  %2401 = vrot.lane.b32.xlu0 %v2398_v43, %s3734_s13  ;;  %v2150_v36 = vcombine.low %v2137_v9, %v2141_v31  ;;  %v1773_v43 = vcombine.low %v1760_v37, %v1764_v38 }
  0xf4   :  { %2814 = vrot.lane.b32.xlu1 %v2812_v47, %s3745_s2  ;;  %2564 = vrot.lane.b32.xlu0 %v2561_v57, %s3746_s29 }
  0xf8   :  { %2399 = vrot.lane.b32.xlu1 %v2397_v17, %s3734_s13  ;;  %2321 = vrot.lane.b32.xlu0 %v2318_v62, %s3735_s14  ;;  %v1941_v17 = vcombine.low %v1935_v14, %v1939_v41  ;;  %v1853_v62 = vrot.slane %v3437_v55, %v3806_v5  ;;  %v1525_v14 = vrot.slane %v3421_v33, %v3806_v5 }
  0xf9   :  { %v1529_v41 = vrot.slane %v3421_v33, %v3808_v6  ;;  %v1521_v55 = vrot.slane %v3421_v33, %v3804_v4 }
  0xfc   :  { %2562 = vrot.lane.b32.xlu1 %v2560_v27, %s3746_s29  ;;  %2484 = vrot.lane.b32.xlu0 %v2481_v60, %s3732_s12  ;;  %v1680_v27 = vrot.slane %v3429_v48, %v3802_v3  ;;  %v1859_v60 = vcombine.low %v1853_v62, %v1857_v63  ;;  %v3401_v48 = vld [vmem:[%s5136_s6 + $0x1] ss:$8 sm:$0xf]  ;;  %v1531_v62 = vcombine.low %v1525_v14, %v1529_v41  ;;  %v3409_v63 = vld [vmem:[%s5136_s6 + $0x3] ss:$8 sm:$0xf] }
 0x100   :  { %2319 = vrot.lane.b32.xlu1 %v2317_v19, %s3735_s14  ;;  %2071 = vrot.lane.b32.xlu0 %v2068_v16, %s3733_s0  ;;  %v1693_v19 = vcombine.low %v1680_v27, %v1684_v42  ;;  %v1432_v16 = vrot.slane %v3417_v45, %v3802_v3  ;;  %v1110_v27 = vrot.slane %v3401_v48, %v3808_v6 }
 0x102   :  { %v1445_v24 = vcombine.low %v1432_v16, %v1436_v12  ;;  %v1273_v16 = vrot.slane %v3409_v63, %v3806_v5 }
 0x104   :  { %2482 = vrot.lane.b32.xlu1 %v2480_v11, %s3732_s12  ;;  %2236 = vrot.lane.b32.xlu0 %v2233_v23, %s3747_s25  ;;  %v3413_v23 = vld [vmem:[%s5136_s6 + $0x4] ss:$8 sm:$0xf] }
 0x105   :  { %v436_v15 = vpop.permute.xlu1 %435  ;;  %v1358_v9 = vrot.slane %v3413_v23, %v3806_v5  ;;  %v1362_v31 = vrot.slane %v3413_v23, %v3808_v6  ;;  %v1350_v37 = vrot.slane %v3413_v23, %v3802_v3  ;;  %v1354_v38 = vrot.slane %v3413_v23, %v3804_v4 }
 0x106   :  { %v4156_v18 = vpop.permute.xlu0 %769  ;;  %v439_v46 = vrot.slane %v436_v15, 4 }
 0x107   :  { %v773_v45 = vrot.slane %v4156_v18, 4 }
 0x108   :  { %2069 = vrot.lane.b32.xlu1 %v2067_v20, %s3733_s0  ;;  %2154 = vrot.lane.b32.xlu0 %v2151_v26, %s3748_s8  ;;  %v1609_v20 = vrot.slane %v3425_v56, %v3808_v6  ;;  %v1530_v56 = vcombine.low %v1517_v54, %v1521_v55 }
 0x10a   :  { %v4167_v47 = vpop.permute.xlu0 %433 }
 0x10b   :  { %v438_v49 = vrot.slane %v4167_v47, 4 }
 0x10c   :  { %2234 = vrot.lane.b32.xlu1 %v2232_v44, %s3747_s25  ;;  %1777 = vrot.lane.b32.xlu0 %v1774_v40, %s3749_s21  ;;  %v1611_v44 = vcombine.low %v1605_v29, %v1609_v20  ;;  %v1364_v40 = vcombine.low %v1358_v9, %v1362_v31  ;;  %v1277_v20 = vrot.slane %v3409_v63, %v3808_v6 }
 0x10d   :  { %v443_v52 = vsel %vm100_vm6, %v438_v49, %v439_v46  ;;  %v1265_v31 = vrot.slane %v3409_v63, %v3802_v3 }
 0x10e   :  { %v444_v57 = vsel %vm5180_vm3, %v4167_v47, %v443_v52  ;;  %v4184_v58 = vpop.permute.xlu0 %520  ;;  %v1098_v47 = vrot.slane %v3401_v48, %v3802_v3 }
 0x10f   :  { %448 = vst [vmem:[#allocation3 + $0x28] sm:$0x33] %v444_v57  ;;  %v1363_v57 = vcombine.low %v1350_v37, %v1354_v38 }
 0x110   :  { %2152 = vrot.lane.b32.xlu1 %v2150_v36, %s3748_s8  ;;  %1944 = vrot.lane.b32.xlu0 %v1941_v17, %s3737_s16  ;;  %v1610_v36 = vcombine.low %v1597_v25, %v1601_v30 }
 0x112   :  { %v4195_v2 = vpop.permute.xlu0 %687  ;;  %v603_v39 = vpop.permute.xlu1 %602 }
 0x113   :  { %v606_v15 = vrot.slane %v603_v39, 4 }
 0x114   :  { %1775 = vrot.lane.b32.xlu1 %v1773_v43, %s3749_s21  ;;  %1697 = vrot.lane.b32.xlu0 %v1694_v61, %s3739_s18 }
 0x118   :  { %1942 = vrot.lane.b32.xlu1 %v1940_v59, %s3737_s16  ;;  %v4206_v11 = vpop.permute.xlu0 %223  ;;  %1862 = vrot.lane.b32.xlu0 %v1859_v60, %s3750_s19  ;;  %v1106_v59 = vrot.slane %v3401_v48, %v3806_v5 }
 0x11a   :  { %v1112_v18 = vcombine.low %v1106_v59, %v1110_v27  ;;  %v524_v27 = vrot.slane %v4184_v58, 4 }
 0x11c   :  { %1695 = vrot.lane.b32.xlu1 %v1693_v19, %s3739_s18  ;;  %v4217_v28 = vpop.permute.xlu0 %765  ;;  %1449 = vrot.lane.b32.xlu0 %v1446_v13, %s3751_s24 }
 0x11e   :  { %v138_v21 = vpop.permute.xlu1 %137 }
 0x11f   :  { %v141_v52 = vrot.slane %v138_v21, 4 }
 0x120   :  { %1860 = vrot.lane.b32.xlu1 %v1858_v0, %s3750_s19  ;;  %v4228_v32 = vpop.permute.xlu0 %600  ;;  %1614 = vrot.lane.b32.xlu0 %v1611_v44, %s3736_s15  ;;  %v1102_v0 = vrot.slane %v3401_v48, %v3804_v4 }
 0x121   :  { %v605_v34 = vrot.slane %v4228_v32, 4 }
 0x122   :  { %v306_v26 = vpop.permute.xlu1 %305  ;;  %v1111_v9 = vcombine.low %v1098_v47, %v1102_v0 }
 0x123   :  { %v610_v46 = vsel %vm100_vm6, %v605_v34, %v606_v15  ;;  %v309_v8 = vrot.slane %v306_v26, 4  ;;  %v1269_v26 = vrot.slane %v3409_v63, %v3804_v4 }
 0x124   :  { %1447 = vrot.lane.b32.xlu1 %v1445_v24, %s3751_s24  ;;  %v611_v43 = vsel %vm267_vm11, %v4228_v32, %v610_v46  ;;  %v4248_v50 = vpop.permute.xlu0 %135  ;;  %1367 = vrot.lane.b32.xlu0 %v1364_v40, %s3752_s23 }
 0x125   :  { %615 = vst [vmem:[#allocation3 + $0x78] sm:$0x33] %v611_v43  ;;  %v140_v17 = vrot.slane %v4248_v50, 4  ;;  %v1278_v46 = vcombine.low %v1265_v31, %v1269_v26 }
 0x126   :  { %v432_v51 = vpop.permute.xlu1 %431 }
 0x127   :  { %v437_v53 = vrot.slane %v432_v51, 4  ;;  %v146_v42 = vsel %vm100_vm6, %v140_v17, %v141_v52 }
 0x128   :  { %1612 = vrot.lane.b32.xlu1 %v1610_v36, %s3736_s15  ;;  %v147_v19 = vsel %vm5182_vm5, %v4248_v50, %v146_v42  ;;  %v304_v35 = vpop.permute.xlu0 %303  ;;  %1534 = vrot.lane.b32.xlu0 %v1531_v62, %s3738_s17 }
 0x129   :  { %v440_v61 = vsel %vm100_vm6, %v437_v53, %v438_v49  ;;  %v771_v49 = vrot.slane %v4217_v28, 4  ;;  %151 = vst [vmem:[#allocation3] sm:$0x33] %v147_v19  ;;  %v308_v10 = vrot.slane %v304_v35, 4 }
 0x12a   :  { %v442_v22 = vsel %vm5180_vm3, %v432_v51, %v440_v61  ;;  %v768_v60 = vpop.permute.xlu1 %767 }
 0x12b   :  { %447 = vst [vmem:[#allocation3 + $0x60] sm:$0x33] %v442_v22  ;;  %v772_v39 = vrot.slane %v768_v60, 4  ;;  %v313_v12 = vsel %vm100_vm6, %v308_v10, %v309_v8 }
 0x12c   :  { %1365 = vrot.lane.b32.xlu1 %v1363_v57, %s3752_s23  ;;  %v314_v21 = vsel %vm311_vm7, %v304_v35, %v313_v12  ;;  %v517_v25 = vpop.permute.xlu0 %516  ;;  %1115 = vrot.lane.b32.xlu0 %v1112_v18, %s3753_s11  ;;  %v227_v18 = vrot.slane %v4206_v11, 4 }
 0x12d   :  { %v774_v13 = vsel %vm100_vm6, %v771_v49, %v772_v39  ;;  %v777_v29 = vsel %vm100_vm6, %v772_v39, %v773_v45  ;;  %318 = vst [vmem:[#allocation3 + $0x48] sm:$0x33] %v314_v21  ;;  %v522_v42 = vrot.slane %v517_v25, 4 }
 0x12e   :  { %v776_v23 = vsel %vm98_vm10, %v4217_v28, %v774_v13  ;;  %v778_v24 = vsel %vm98_vm10, %v768_v60, %v777_v29  ;;  %v599_v30 = vpop.permute.xlu1 %598  ;;  %v1279_v28 = vcombine.low %v1273_v16, %v1277_v20  ;;  %v691_v60 = vrot.slane %v4195_v2, 4 }
 0x12f   :  { %781 = vst [vmem:[#allocation3 + $0x80] sm:$0x33] %v776_v23  ;;  %782 = vst [vmem:[#allocation3 + $0xa8] sm:$0x33] %v778_v24  ;;  %v604_v44 = vrot.slane %v599_v30, 4 }
 0x130   :  { %1532 = vrot.lane.b32.xlu1 %v1530_v56, %s3738_s17  ;;  %v684_v36 = vpop.permute.xlu0 %683  ;;  %1282 = vrot.lane.b32.xlu0 %v1279_v28, %s3754_s22 }
 0x131   :  { %v607_v33 = vsel %vm100_vm6, %v604_v44, %v605_v34  ;;  %v689_v47 = vrot.slane %v684_v36, 4 }
 0x132   :  { %v609_v15 = vsel %vm267_vm11, %v599_v30, %v607_v33  ;;  %v134_v37 = vpop.permute.xlu1 %133 }
 0x133   :  { %614 = vst [vmem:[#allocation3 + $0x40] sm:$0x33] %v609_v15  ;;  %v139_v38 = vrot.slane %v134_v37, 4 }
 0x134   :  { %1113 = vrot.lane.b32.xlu1 %v1111_v9, %s3753_s11  ;;  %v220_v51 = vpop.permute.xlu0 %219 }
 0x135   :  { %v143_v40 = vsel %vm100_vm6, %v139_v38, %v140_v17  ;;  %v225_v0 = vrot.slane %v220_v51, 4 }
 0x136   :  { %v145_v32 = vsel %vm5182_vm5, %v134_v37, %v143_v40  ;;  %v302_v34 = vpop.permute.xlu1 %301  ;;  %v792_v14 = vld [vmem:[#allocation3 + $0x80] sm:$0x33]  ;;  %v793_v41 = vld [vmem:[#allocation3 + $0xa8] sm:$0x33] }
 0x137   :  { %150 = vst [vmem:[#allocation3 + $0xb0] sm:$0x33] %v145_v32  ;;  %v307_v48 = vrot.slane %v302_v34, 4  ;;  %v3391_v43 = vcombine.high %v792_v14, %v792_v14  ;;  %v3393_v50 = vcombine.high %v793_v41, %v793_v41  ;;  %v3390_v52 = vcombine.low %v792_v14, %v792_v14  ;;  %v783_v14 = vld [vmem:[%s5131_s1] sm:$0x3] }
 0x138   :  { %v3392_v53 = vcombine.low %v793_v41, %v793_v41  ;;  %1280 = vrot.lane.b32.xlu1 %v1278_v46, %s3754_s22  ;;  %v387_v45 = vpop.permute.xlu0 %386 }
 0x139   :  { %v310_v17 = vsel %vm100_vm6, %v307_v48, %v308_v10  ;;  %3394 = vmatprep.subr.msk.bf16.mxu0 %vm5148_vm14, %v3391_v43  ;;  %3396 = vmatprep.subr.msk.bf16.mxu1 %vm5148_vm14, %v3393_v50  ;;  %v856_v57 = vsel %vm5148_vm14, %v3390_v52, 0  ;;  %v392_v23 = vrot.slane %v387_v45, 4 }
 0x13a   :  { %v312_v54 = vsel %vm311_vm7, %v302_v34, %v310_v17  ;;  %v862_v55 = vsel %vm5148_vm14, %v3392_v53, 0  ;;  %v519_v59 = vpop.permute.xlu1 %518  ;;  %878 = vmatpush1.bf16.msra.mxu0 %v856_v57  ;;  %vm5184_vm14 = vcmask 244736  }
 0x13b   :  { %317 = vst [vmem:[#allocation3 + $0x10] sm:$0x33] %v312_v54  ;;  %919 = vmatpush1.bf16.msra.mxu1 %v862_v55  ;;  %v523_v61 = vrot.slane %v519_v59, 4 }
 0x13c   :  { %v391_v2 = vpop.permute.xlu0 %390 }
 0x13d   :  { %v525_v62 = vsel %vm100_vm6, %v522_v42, %v523_v61  ;;  %v528_v63 = vsel %vm100_vm6, %v523_v61, %v524_v27  ;;  %v394_v24 = vrot.slane %v391_v2, 4  ;;  %v3405_v27 = vld [vmem:[%s5136_s6 + $0x2] ss:$8 sm:$0xf] }
 0x13e   :  { %v527_v19 = vsel %vm349_vm13, %v517_v25, %v525_v62  ;;  %v529_v22 = vsel %vm349_vm13, %v519_v59, %v528_v63  ;;  %v686_v35 = vpop.permute.xlu1 %685  ;;  %v1191_v42 = vrot.slane %v3405_v27, %v3806_v5  ;;  %v1195_v61 = vrot.slane %v3405_v27, %v3808_v6 }
 0x13f   :  { %532 = vst [vmem:[#allocation3 + $0x60] sm:$0xcc] %v527_v19  ;;  %533 = vst [vmem:[#allocation3 + $0x28] sm:$0xcc] %v529_v22  ;;  %v690_v58 = vrot.slane %v686_v35, 4  ;;  %v1183_v62 = vrot.slane %v3405_v27, %v3802_v3  ;;  %v1187_v63 = vrot.slane %v3405_v27, %v3804_v4 }
 0x140   :  { %v4325_v41 = vpop.permute.xlu0 %961 }
 0x141   :  { %v692_v49 = vsel %vm100_vm6, %v689_v47, %v690_v58  ;;  %v695_v8 = vsel %vm100_vm6, %v690_v58, %v691_v60  ;;  %v1196_v19 = vcombine.low %v1183_v62, %v1187_v63 }
 0x142   :  { %v694_v10 = vsel %vm182_vm12, %v684_v36, %v692_v49  ;;  %v696_v39 = vsel %vm182_vm12, %v686_v35, %v695_v8  ;;  %v222_v56 = vpop.permute.xlu1 %221 }
 0x143   :  { %699 = vst [vmem:[#allocation3 + $0x40] sm:$0xcc] %v694_v10  ;;  %700 = vst [vmem:[#allocation3 + $0x78] sm:$0xcc] %v696_v39  ;;  %v226_v16 = vrot.slane %v222_v56, 4 }
 0x144   :  { %v4329_v43 = vpop.permute.xlu0 %965 }
 0x145   :  { %v228_v12 = vsel %vm100_vm6, %v225_v0, %v226_v16  ;;  %v231_v13 = vsel %vm100_vm6, %v226_v16, %v227_v18 }
 0x146   :  { %v230_v29 = vsel %vm5188_vm9, %v220_v51, %v228_v12  ;;  %v232_v20 = vsel %vm5188_vm9, %v222_v56, %v231_v13  ;;  %v389_v21 = vpop.permute.xlu1 %388  ;;  %v788_v44 = vld [vmem:[#allocation3 + $0x60] sm:$0xff] }
 0x147   :  { %235 = vst [vmem:[#allocation3 + $0xb0] sm:$0xcc] %v230_v29  ;;  %236 = vst [vmem:[#allocation3] sm:$0xcc] %v232_v20  ;;  %v393_v25 = vrot.slane %v389_v21, 4 }
 0x148   :  { %v1011_v51 = vld [vmem:[%s5136_s6] ss:$8 sm:$0xf]  ;;  %v4340_v55 = vpop.permute.xlu0 %969  ;;  %s5211_s6 = smov 97  }
 0x149   :  { %v395_v11 = vsel %vm100_vm6, %v392_v23, %v393_v25  ;;  %v398_v30 = vsel %vm100_vm6, %v393_v25, %v394_v24  ;;  %v1024_v52 = vrot.slane %v1011_v51, %v3806_v5  ;;  %v1028_v53 = vrot.slane %v1011_v51, %v3808_v6 }
 0x14a   :  { %v397_v9 = vsel %vm5190_vm8, %v387_v45, %v395_v11  ;;  %v399_v31 = vsel %vm5190_vm8, %v389_v21, %v398_v30  ;;  %v790_v26 = vld [vmem:[#allocation3 + $0x40] sm:$0xff]  ;;  %v3667_v33 = vld [vmem:[#allocation3 + $0x2c] ss:$80 sps:$4 sm:$0xff]   ;;  %v3669_v36 = vld [vmem:[#allocation3 + $0x28] ss:$80 sps:$4 sm:$0xff]   ;;  %v1016_v17 = vrot.slane %v1011_v51, %v3802_v3  ;;  %v1197_v45 = vcombine.low %v1191_v42, %v1195_v61 }
 0x14b   :  { %402 = vst [vmem:[#allocation3 + $0x10] sm:$0xcc] %v397_v9  ;;  %403 = vst [vmem:[#allocation3 + $0x48] sm:$0xcc] %v399_v31  ;;  %v3387_v28 = vcombine.high %v788_v44, %v790_v26  ;;  %v3386_v15 = vcombine.low %v788_v44, %v790_v26  ;;  %920 = vmatprep.subr.bf16.mxu1 %v3667_v33  ;;  %v1030_v54 = vcombine.low %v1024_v52, %v1028_v53 }
 0x14c   :  { %921 = vmatpush1.bf16.msra.mxu1 %v3669_v36  ;;  %v4353_v22 = vpop.permute.xlu0 %2983 }
 0x14d   :  { %879 = vmatprep.subr.bf16.mxu0 %v3387_v28  ;;  %1033 = vrot.lane.b32.xlu0 %v1030_v54, %s3755_s30 }
 0x14e   :  { %880 = vmatpush1.bf16.msra.mxu0 %v3386_v15  ;;  %v784_v37 = vld [vmem:[#allocation3 + $0xb0] sm:$0xff] }
 0x151   :  { %1200 = vrot.lane.b32.xlu0 %v1197_v45, %s3729_s28 }
 0x152   :  { %v786_v38 = vld [vmem:[#allocation3 + $0x10] sm:$0xff]  ;;  %v3670_v46 = vld [vmem:[#allocation3 + $0x4] ss:$72 sps:$4 sm:$0xff]   ;;  %v3672_v34 = vld [vmem:[#allocation3] ss:$72 sps:$4 sm:$0xff]   ;;  %v4359_v60 = vpop.permute.xlu0 %2731 }
 0x153   :  { %v3383_v40 = vcombine.high %v784_v37, %v786_v38  ;;  %v3382_v32 = vcombine.low %v784_v37, %v786_v38  ;;  %922 = vmatprep.subr.bf16.mxu1 %v3670_v46  ;;  %v4327_v48 = vpop.permute.xlu1 %797 }
 0x154   :  { %923 = vmatpush1.bf16.msra.mxu1 %v3672_v34 }
 0x155   :  { %881 = vmatprep.subr.bf16.mxu0 %v3383_v40 }
 0x156   :  { %882 = vmatpush1.bf16.msra.mxu0 %v3382_v32  ;;  %v4363_v5 = vpop.permute.xlu0 %2898 }
 0x157   :  { %3397 = vmatmul.mubr.msk.bf16.vlgmr.msra.gmra.mxu1 %vm850_vm15, %v783_v14  ;;  %v4331_v50 = vpop.permute.xlu1 %963 }
 0x158   :  { %3291 = vmatprep.mubr.bf16.mxu1 %v3740_v1 }
 0x159   :  { %3395 = vmatmul.mubr.msk.bf16.vlgmr.msra.gmra.mxu0 %vm850_vm15, %v783_v14  ;;  %vm1286_vm15 = vcmask 269312  }
 0x15a   :  { %3250 = vmatprep.mubr.bf16.mxu0 %v3740_v1  ;;  %v1020_v1 = vrot.slane %v1011_v51, %v3804_v4  ;;  %v4367_v3 = vpop.permute.xlu0 %2649 }
 0x15b   :  { %v4342_v59 = vpop.permute.xlu1 %967 }
 0x15c   :  { %v1029_v57 = vcombine.low %v1016_v17, %v1020_v1 }
 0x15e   :  { %1031 = vrot.lane.b32.xlu1 %v1029_v57, %s3755_s30  ;;  %v4371_v58 = vpop.permute.xlu0 %2816 }
 0x15f   :  { %v4355_v35 = vpop.permute.xlu1 %2981 }
 0x162   :  { %1198 = vrot.lane.b32.xlu1 %v1196_v19, %s3729_s28  ;;  %v4375_v8 = vpop.permute.xlu0 %2401 }
 0x163   :  { %v4361_v47 = vpop.permute.xlu1 %2729 }
 0x166   :  { %v4379_v39 = vpop.permute.xlu0 %2564 }
 0x167   :  { %v4365_v6 = vpop.permute.xlu1 %2896 }
 0x16a   :  { %v4383_v18 = vpop.permute.xlu0 %2321 }
 0x16b   :  { %v4369_v4 = vpop.permute.xlu1 %2647 }
 0x16e   :  { %v4387_v16 = vpop.permute.xlu0 %2484 }
 0x16f   :  { %v4373_v49 = vpop.permute.xlu1 %2814 }
 0x172   :  { %v4391_v12 = vpop.permute.xlu0 %2071 }
 0x173   :  { %v4377_v10 = vpop.permute.xlu1 %2399 }
 0x176   :  { %v4395_v29 = vpop.permute.xlu0 %2236 }
 0x177   :  { %v4381_v56 = vpop.permute.xlu1 %2562 }
 0x178   :  { %5193 = vst [vmem:[#allocation7_spill] sm:$0xff] %v4381_v56 }
 0x17a   :  { %v4399_v21 = vpop.permute.xlu0 %2154 }
 0x17b   :  { %v4385_v0 = vpop.permute.xlu1 %2319 }
 0x17e   :  { %v4403_v24 = vpop.permute.xlu0 %1777 }
 0x17f   :  { %v4389_v2 = vpop.permute.xlu1 %2482 }
 0x182   :  { %v4407_v11 = vpop.permute.xlu0 %1944 }
 0x183   :  { %v4393_v13 = vpop.permute.xlu1 %2069 }
 0x184   :  { %5194 = vst [vmem:[#allocation8_spill] sm:$0xff] %v4393_v13 }
 0x186   :  { %v4411_v44 = vpop.permute.xlu0 %1697 }
 0x187   :  { %v4397_v20 = vpop.permute.xlu1 %2234 }
 0x188   :  { %5195 = vst [vmem:[#allocation9_spill] sm:$0xff] %v4397_v20 }
 0x18a   :  { %v4415_v31 = vpop.permute.xlu0 %1862 }
 0x18b   :  { %v4401_v23 = vpop.permute.xlu1 %2152 }
 0x18e   :  { %v4419_v33 = vpop.permute.xlu0 %1449 }
 0x18f   :  { %v4405_v25 = vpop.permute.xlu1 %1775 }
 0x190   :  { %5196 = vst [vmem:[#allocation10_spill] sm:$0xff] %v4405_v25 }
 0x192   :  { %v4423_v15 = vpop.permute.xlu0 %1614 }
 0x193   :  { %v4409_v30 = vpop.permute.xlu1 %1942  ;;  %v5147_v37 = vrot.slane %v4423_v15, 4 }
 0x194   :  { %5197 = vst [vmem:[#allocation11_spill] sm:$0xff] %v4409_v30 }
 0x196   :  { %v4438_v32 = vpop.permute.xlu0 %1367 }
 0x197   :  { %v4413_v9 = vpop.permute.xlu1 %1695  ;;  %v5150_v14 = vrot.slane %v4438_v32, 4 }
 0x19a   :  { %v4453_v17 = vpop.permute.xlu0 %1534 }
 0x19b   :  { %v4417_v26 = vpop.permute.xlu1 %1860  ;;  %v5149_v54 = vrot.slane %v4453_v17, 4 }
 0x19e   :  { %v4468_v61 = vpop.permute.xlu0 %1115 }
 0x19f   :  { %v4421_v28 = vpop.permute.xlu1 %1447  ;;  %v5146_v63 = vrot.slane %v4468_v61, 4 }
 0x1a0   :  { %5198 = vst [vmem:[#allocation12_spill] sm:$0xff] %v4421_v28 }
 0x1a3   :  { %v4425_v36 = vpop.permute.xlu1 %1612 }
 0x1a4   :  { %5199 = vst [vmem:[#allocation13_spill] sm:$0xff] %v4425_v36  ;;  %v5142_v38 = vrot.slane %v4425_v36, 4 }
 0x1a6   :  { %v1619_v46 = vsel %vm100_vm6, %v5142_v38, %v5147_v37 }
 0x1a7   :  { %v4436_v40 = vsel %vm182_vm12, %v1619_v46, %v4423_v15  ;;  %v4440_v34 = vpop.permute.xlu1 %1365 }
 0x1a8   :  { %5200 = vst [vmem:[#allocation14_spill] sm:$0xff] %v4436_v40  ;;  %v5144_v51 = vrot.slane %v4440_v34, 4  ;;  %v973_v40 = vsel %vm5180_vm3, %v4329_v43, %v4342_v59 }
 0x1aa   :  { %v1373_v52 = vsel %vm100_vm6, %v5144_v51, %v5150_v14 }
 0x1ab   :  { %v4451_v53 = vsel %vm1371_vm1, %v1373_v52, %v4438_v32  ;;  %v4455_v1 = vpop.permute.xlu1 %1532  ;;  %v4483_v52 = vpop.permute.xlu0 %1282 }
 0x1ac   :  { %v5143_v57 = vrot.slane %v4455_v1, 4  ;;  %5203 = vst [vmem:[#allocation17_spill] sm:$0xff] %v4483_v52  ;;  %v5151_v38 = vrot.slane %v4483_v52, 4 }
 0x1ae   :  { %v1539_v27 = vsel %vm100_vm6, %v5143_v57, %v5149_v54 }
 0x1af   :  { %v4466_v42 = vsel %vm98_vm10, %v1539_v27, %v4453_v17  ;;  %v4470_v62 = vpop.permute.xlu1 %1113 }
 0x1b0   :  { %5201 = vst [vmem:[#allocation15_spill] sm:$0xff] %v4470_v62  ;;  %v5145_v45 = vrot.slane %v4470_v62, 4 }
 0x1b2   :  { %v1121_v19 = vsel %vm100_vm6, %v5145_v45, %v5146_v63 }
 0x1b3   :  { %v4481_v46 = vsel %vm1119_vm2, %v1121_v19, %v4468_v61  ;;  %v4485_v27 = vpop.permute.xlu1 %1280 }
 0x1b4   :  { %5202 = vst [vmem:[#allocation16_spill] sm:$0xff] %v4481_v46  ;;  %5204 = vst [vmem:[#allocation18_spill] sm:$0xff] %v4485_v27  ;;  %v5152_v57 = vrot.slane %v4485_v27, 4 }
 0x1b6   :  { %v1288_v51 = vsel %vm100_vm6, %v5152_v57, %v5151_v38 }
 0x1b7   :  { %v4496_v45 = vsel %vm1286_vm15, %v1288_v51, %v4483_v52 }
 0x1b8   :  { %5205 = vst [vmem:[#allocation19_spill] sm:$0xff] %v4496_v45 }
 0x1bf   :  { %v4498_v19 = vpop.permute.xlu0 %1033 }
 0x1c0   :  { %v5162_v37 = vrot.slane %v4498_v19, 4 }
 0x1d0   :  { %v4500_v63 = vpop.permute.xlu1 %1031 }
 0x1d1   :  { %v5161_v54 = vrot.slane %v4500_v63, 4 }
 0x1d3   :  { %v1039_v38 = vsel %vm100_vm6, %v5161_v54, %v5162_v37 }
 0x1d4   :  { %v4512_v52 = vsel %vm5184_vm14, %v1039_v38, %v4498_v19  ;;  %v971_v38 = vsel %vm5180_vm3, %v4325_v41, %v4331_v50 }
 0x217   :  { %v942_v14 = vpop.f32.mrf.mxu1 }
 0x218   :  { %v943_v51 = vadd.f32 %v942_v14, %v4327_v48 }
 0x219   :  { %v901_v57 = vpop.f32.mrf.mxu0  ;;  %v944_v27 = vpop.f32.mrf.mxu1 }
 0x21a   :  { %v902_v45 = vadd.f32 %v901_v57, %v4327_v48  ;;  %v951_v46 = vmax.f32 %v943_v51, 0.0  ;;  %v945_v36 = vadd.f32 %v944_v27, %v4327_v48  ;;  %v974_v51 = vsel %vm5180_vm3, %v4342_v59, %v4340_v55  ;;  %v4531_v55 = vpop.permute.xlu0 %1200  ;;  %v4533_v59 = vpop.permute.xlu1 %1198 }
 0x21b   :  { %v903_v62 = vpop.f32.mrf.mxu0  ;;  %v946_v37 = vpop.f32.mrf.mxu1 }
 0x21c   :  { %v949_v28 = vmax.f32 %v902_v45, 0.0  ;;  %v904_v54 = vadd.f32 %v903_v62, %v4327_v48  ;;  %v981_v14 = vadd.f32 %v973_v40, %v951_v46  ;;  %v952_v30 = vmax.f32 %v945_v36, 0.0 }
 0x21d   :  { %v905_v57 = vpop.f32.mrf.mxu0  ;;  %v947_v20 = vpop.f32.mrf.mxu1  ;;  %v972_v45 = vsel %vm5180_vm3, %v4331_v50, %v4329_v43 }
 0x21e   :  { %v979_v27 = vadd.f32 %v971_v38, %v949_v28  ;;  %v950_v25 = vmax.f32 %v904_v54, 0.0  ;;  %v982_v48 = vadd.f32 %v974_v51, %v952_v30  ;;  %v985_v13 = vmax.f32 %v981_v14, 0.0 }
 0x21f   :  { %v906_v37 = vpop.f32.mrf.mxu0  ;;  %v5170_v54 = vrot.slane %v4359_v60, 4  ;;  %v2652_v38 = vrot.slane %v4367_v3, 4 }
 0x220   :  { %v980_v62 = vadd.f32 %v972_v45, %v950_v25  ;;  %v986_v56 = vmax.f32 %v982_v48, 0.0  ;;  %v983_v41 = vmax.f32 %v979_v27, 0.0  ;;  %v5169_v27 = vrot.slane %v4363_v5, 4 }
 0x222   :  { %v984_v40 = vmax.f32 %v980_v62, 0.0  ;;  %v992_v36 = vcombine.low %v985_v13, %v986_v56  ;;  %v5173_v13 = vrot.slane %v4353_v22, 4 }
 0x224   :  { %v991_v46 = vcombine.low %v983_v41, %v984_v40  ;;  %995 = vrot.lane.b32.xlu0 %v992_v36, %s3731_s9  ;;  %v2819_v36 = vrot.slane %v4371_v58, 4 }
 0x226   :  { %993 = vrot.lane.b32.xlu1 %v991_v46, %s3731_s9 }
 0x296   :  { %v996_v20 = vpop.permute.xlu0 %995 }
 0x297   :  { %v998_v28 = vrot.slane %v996_v20, 4 }
 0x298   :  { %v994_v43 = vpop.permute.xlu1 %993 }
 0x299   :  { %v997_v50 = vrot.slane %v994_v43, 4  ;;  %1007 = vst.msk [vmem:[#allocation2 + $0x10] sm:$0xf] %vm41_vm0, %v998_v28  ;;  %vm5183_vm0 = vcmask 769024  }
 0x29b   :  { %v999_v25 = vsel %vm5180_vm3, %v997_v50, %v994_v43  ;;  %v1000_v30 = vsel %vm100_vm6, %v997_v50, %v998_v28  ;;  %v5168_v50 = vrot.slane %v4375_v8, 4 }
 0x29c   :  { %v4539_v56 = vsel %vm5180_vm3, %v1000_v30, %v996_v20  ;;  %1005 = vst.msk [vmem:[#allocation2] sm:$0xff] %vm3871_vm4, %v999_v25  ;;  %vm1081_vm4 = vcmask 801792   ;;  %vm5181_vm3 = vcmask 785408  }
 0x29d   :  { %1006 = vst [vmem:[#allocation2 + $0x8] sm:$0xff] %v4539_v56 }
 0x2a0   :  { %v2003_v14 = vld [vmem:[#allocation2 + $0x10] sm:$0xf] }
 0x2a1   :  { %v2959_v57 = vld [vmem:[#allocation2 + $0x10] sm:$0xf]  ;;  %v3594_v45 = vpack.c.bf16 %v2003_v14, %v2003_v14 }
 0x2a2   :  { %v2625_v51 = vld [vmem:[#allocation2 + $0x10] sm:$0xf]  ;;  %v2996_v48 = vmul.f32 %v5173_v13, %v2959_v57  ;;  %v2324_v57 = vrot.slane %v4383_v18, 4  ;;  %v5179_v13 = vrot.slane %v4403_v24, 4 }
 0x2a3   :  { %v2662_v7 = vmul.f32 %v2652_v38, %v2625_v51  ;;  %v2707_v37 = vld [vmem:[#allocation2 + $0x10] sm:$0xf]  ;;  %2032 = vrot.lane.b32.xlu0 %v3594_v45, %s3731_s9 }
 0x2a4   :  { %v2874_v62 = vld [vmem:[#allocation2 + $0x10] sm:$0xf]  ;;  %v2744_v41 = vmul.f32 %v5170_v54, %v2707_v37  ;;  %v3630_v46 = vpack.c.bf16 %v2996_v48, %v2996_v48 }
 0x2a5   :  { %v2792_v40 = vld [vmem:[#allocation2 + $0x10] sm:$0xf]  ;;  %v2911_v20 = vmul.f32 %v5169_v27, %v2874_v62  ;;  %v3618_v25 = vpack.c.bf16 %v2662_v7, %v2662_v7  ;;  %v5171_v62 = vrot.slane %v4379_v39, 4 }
 0x2a6   :  { %v3621_v28 = vpack.c.bf16 %v2744_v41, %v2744_v41  ;;  %v2377_v43 = vld [vmem:[#allocation2 + $0x10] sm:$0xf]  ;;  %3025 = vrot.lane.b32.xlu1 %v3630_v46, %s3755_s30  ;;  %v2829_v30 = vmul.f32 %v2819_v36, %v2792_v40  ;;  %v5177_v46 = vrot.slane %v4387_v16, 4 }
 0x2a7   :  { %v2297_v14 = vld [vmem:[#allocation2 + $0x10] sm:$0xf]  ;;  %2691 = vrot.lane.b32.xlu0 %v3618_v25, %s3752_s23  ;;  %v3627_v45 = vpack.c.bf16 %v2911_v20, %v2911_v20  ;;  %v2413_v48 = vmul.f32 %v5168_v50, %v2377_v43  ;;  %v5175_v50 = vrot.slane %v4399_v21, 4 }
 0x2a8   :  { %v2771_v51 = vrot.slane %v3621_v28, 6  ;;  %v2540_v37 = vld [vmem:[#allocation2 + $0x10] sm:$0xf]  ;;  %v3624_v41 = vpack.c.bf16 %v2829_v30, %v2829_v30  ;;  %v2333_v7 = vmul.f32 %v2324_v57, %v2297_v14 }
 0x2a9   :  { %v2460_v40 = vld [vmem:[#allocation2 + $0x10] sm:$0xf]  ;;  %v2938_v25 = vrot.slane %v3627_v45, 6  ;;  %v3609_v28 = vpack.c.bf16 %v2413_v48, %v2413_v48  ;;  %v2577_v20 = vmul.f32 %v5171_v62, %v2540_v37  ;;  %v5172_v45 = vrot.slane %v4391_v12, 4 }
 0x2aa   :  { %2776 = vrot.lane.b32.xlu1 %v2771_v51, %s3754_s22  ;;  %v3606_v43 = vpack.c.bf16 %v2333_v7, %v2333_v7  ;;  %v2496_v51 = vmul.f32 %v5177_v46, %v2460_v40  ;;  %v2130_v30 = vld [vmem:[#allocation2 + $0x10] sm:$0xf]  ;;  %v5174_v7 = vrot.slane %v4411_v44, 4 }
 0x2ab   :  { %2858 = vrot.lane.b32.xlu0 %v3624_v41, %s3729_s28  ;;  %v2440_v14 = vrot.slane %v3609_v28, 6  ;;  %v3615_v27 = vpack.c.bf16 %v2577_v20, %v2577_v20  ;;  %v2047_v54 = vld [vmem:[#allocation2 + $0x10] sm:$0xf]  ;;  %v2167_v37 = vmul.f32 %v5175_v50, %v2130_v30 }
 0x2ac   :  { %v3612_v48 = vpack.c.bf16 %v2496_v51, %v2496_v51  ;;  %v1673_v41 = vld [vmem:[#allocation2 + $0x10] sm:$0xf]  ;;  %v2083_v28 = vmul.f32 %v5172_v45, %v2047_v54 }
 0x2ad   :  { %v2604_v40 = vrot.slane %v3615_v27, 6  ;;  %v2212_v20 = vld [vmem:[#allocation2 + $0x10] sm:$0xf]  ;;  %v3600_v51 = vpack.c.bf16 %v2167_v37, %v2167_v37  ;;  %v1709_v30 = vmul.f32 %v5174_v7, %v1673_v41 }
 0x2ae   :  { %2943 = vrot.lane.b32.xlu1 %v2938_v25, %s3753_s11  ;;  %v4587_v25 = vcombine.high %v4539_v56, %v4539_v56  ;;  %v3597_v62 = vpack.c.bf16 %v2083_v28, %v2083_v28  ;;  %v1753_v45 = vld [vmem:[#allocation2 + $0x10] sm:$0xf] }
 0x2af   :  { %2362 = vrot.lane.b32.xlu0 %v3606_v43, %s3739_s18  ;;  %v5176_v43 = vrot.slane %v4395_v29, 4  ;;  %v3582_v37 = vpack.c.bf16 %v1709_v30, %v1709_v30  ;;  %v1790_v28 = vmul.f32 %v5179_v13, %v1753_v45  ;;  %v1920_v50 = vld [vmem:[#allocation2 + $0x10] sm:$0xf]  ;;  %v1452_v45 = vrot.slane %v4419_v33, 4 }
 0x2b0   :  { %v3593_v27 = vpack.c.bf16 %v4587_v25, %v4539_v56  ;;  %v1510_v46 = vld [vmem:[#allocation2 + $0x10] sm:$0xf] }
 0x2b1   :  { %v2249_v54 = vmul.f32 %v5176_v43, %v2212_v20  ;;  %v1947_v20 = vrot.slane %v4407_v11, 4  ;;  %v1010_v13 = vld [vmem:[#allocation2 + $0x10] sm:$0xf] }
 0x2b2   :  { %2445 = vrot.lane.b32.xlu1 %v2440_v14, %s3736_s15  ;;  %v1838_v14 = vld [vmem:[#allocation2 + $0x10] sm:$0xf] }
 0x2b3   :  { %2525 = vrot.lane.b32.xlu0 %v3612_v48, %s3738_s17  ;;  %v5178_v48 = vrot.slane %v4415_v31, 4  ;;  %v3603_v7 = vpack.c.bf16 %v2249_v54, %v2249_v54  ;;  %v1425_v54 = vld [vmem:[#allocation2 + $0x10] sm:$0xf] }
 0x2b5   :  { %v1875_v41 = vmul.f32 %v5178_v48, %v1838_v14  ;;  %v2276_v14 = vrot.slane %v3603_v7, 6  ;;  %v3585_v48 = vpack.c.bf16 %v1790_v28, %v1790_v28  ;;  %v1462_v7 = vmul.f32 %v1452_v45, %v1425_v54 }
 0x2b6   :  { %2609 = vrot.lane.b32.xlu1 %v2604_v40, %s3751_s24  ;;  %v1343_v40 = vld [vmem:[#allocation2 + $0x10] sm:$0xf]  ;;  %v5208_v28 = vrot.slane %v4498_v19, 4  ;;  %v2651_v19 = vrot.slane %v4369_v4, 4 }
 0x2b7   :  { %2196 = vrot.lane.b32.xlu0 %v3600_v51, %s3750_s19  ;;  %v2110_v51 = vrot.slane %v3597_v62, 6  ;;  %v3588_v43 = vpack.c.bf16 %v1875_v41, %v1875_v41  ;;  %v1956_v62 = vmul.f32 %v1947_v20, %v1920_v50 }
 0x2ba   :  { %2030 = vrot.lane.b32.xlu1 %v3593_v27, %s3731_s9  ;;  %v5206_v27 = vrot.slane %v4438_v32, 4  ;;  %v1817_v32 = vrot.slane %v3585_v48, 6  ;;  %v5209_v48 = vrot.slane %v4423_v15, 4 }
 0x2bb   :  { %1738 = vrot.lane.b32.xlu0 %v3582_v37, %s3735_s14 }
 0x2bc   :  { %v1380_v30 = vmul.f32 %v5206_v27, %v1343_v40  ;;  %v3591_v40 = vpack.c.bf16 %v1956_v62, %v1956_v62  ;;  %v1046_v27 = vmul.f32 %v5208_v28, %v1010_v13  ;;  %v4633_v13 = vld [vmem:[#allocation2] sm:$0xff] }
 0x2bd   :  { %v4644_v28 = vcombine.high %v4633_v13, %v4633_v13 }
 0x2be   :  { %2115 = vrot.lane.b32.xlu1 %v2110_v51, %s3737_s16  ;;  %v3570_v37 = vpack.c.bf16 %v1380_v30, %v1380_v30  ;;  %v5207_v51 = vrot.slane %v4453_v17, 4  ;;  %v1203_v30 = vrot.slane %v4531_v55, 4  ;;  %v1983_v17 = vrot.slane %v3591_v40, 6 }
 0x2bf   :  { %1904 = vrot.lane.b32.xlu0 %v3588_v43, %s3748_s8  ;;  %v1590_v43 = vld [vmem:[#allocation2 + $0x10] sm:$0xf]  ;;  %v3558_v54 = vpack.c.bf16 %v1046_v27, %v1046_v27  ;;  %v5210_v40 = vrot.slane %v4468_v61, 4 }
 0x2c0   :  { %v1546_v41 = vmul.f32 %v5207_v51, %v1510_v46  ;;  %v3573_v46 = vpack.c.bf16 %v1462_v7, %v1462_v7  ;;  %v1626_v62 = vmul.f32 %v5209_v48, %v1590_v43  ;;  %v2985_v7 = vrot.slane %v4355_v35, 4 }
 0x2c1   :  { %v2654_v43 = vsel %vm5183_vm0, %v2651_v19, %v4369_v4  ;;  %v2655_v4 = vsel %vm100_vm6, %v2651_v19, %v2652_v38  ;;  %v2323_v19 = vrot.slane %v4385_v0, 4 }
 0x2c2   :  { %2281 = vrot.lane.b32.xlu1 %v2276_v14, %s3749_s21  ;;  %v3576_v50 = vpack.c.bf16 %v1546_v41, %v1546_v41  ;;  %v1176_v14 = vld [vmem:[#allocation2 + $0x10] sm:$0xf]  ;;  %v1489_v41 = vrot.slane %v3573_v46, 6  ;;  %v2660_v27 = vmul.f32 %v2654_v43, %v4633_v13  ;;  %v2988_v61 = vsel %vm1081_vm4, %v2985_v7, %v4355_v35 }
 0x2c3   :  { %1409 = vrot.lane.b32.xlu0 %v3570_v37, %s3744_s20  ;;  %v1091_v37 = vld [vmem:[#allocation2 + $0x10] sm:$0xf]  ;;  %v1213_v51 = vmul.f32 %v1203_v30, %v1176_v14  ;;  %v2818_v14 = vrot.slane %v4373_v49, 4  ;;  %v2994_v48 = vmul.f32 %v2988_v61, %v4633_v13  ;;  %v2656_v38 = vsel %vm5183_vm0, %v2655_v4, %v4367_v3 }
 0x2c4   :  { %v1128_v15 = vmul.f32 %v5210_v40, %v1091_v37  ;;  %v3592_v37 = vpack.c.bf16 %v4644_v28, %v4633_v13  ;;  %v2661_v40 = vmul.f32 %v2656_v38, %v4539_v56  ;;  %v2486_v61 = vrot.slane %v4389_v2, 4 }
 0x2c5   :  { %vm1204_vm0 = vcmask 261120  }
 0x2c6   :  { %1822 = vrot.lane.b32.xlu1 %v1817_v32, %s3747_s25  ;;  %v3579_v32 = vpack.c.bf16 %v1626_v62, %v1626_v62  ;;  %v3561_v46 = vpack.c.bf16 %v1128_v15, %v1128_v15  ;;  %v2821_v62 = vsel %vm5181_vm3, %v2818_v14, %v4373_v49  ;;  %v2325_v15 = vsel %vm311_vm7, %v2323_v19, %v4385_v0 }
 0x2c7   :  { %1575 = vrot.lane.b32.xlu0 %v3576_v50, %s3732_s12  ;;  %v3564_v50 = vpack.c.bf16 %v1213_v51, %v1213_v51  ;;  %v2827_v51 = vmul.f32 %v2821_v62, %v4633_v13  ;;  %v2331_v3 = vmul.f32 %v2325_v15, %v4633_v13  ;;  %v1699_v15 = vrot.slane %v4413_v9, 4 }
 0x2c8   :  { %v1155_v49 = vrot.slane %v3561_v46, 6 }
 0x2c9   :  { %v2336_v62 = vcombine.high %v2331_v3, %v2331_v3 }
 0x2ca   :  { %1988 = vrot.lane.b32.xlu1 %v1983_v17, %s3733_s0  ;;  %v1653_v17 = vrot.slane %v3579_v32, 6  ;;  %v2999_v32 = vcombine.high %v2994_v48, %v2994_v48 }
 0x2cb   :  { %1075 = vrot.lane.b32.xlu0 %v3558_v54, %s3741_s26  ;;  %v2665_v54 = vcombine.high %v2660_v27, %v2660_v27 }
 0x2cc   :  { %v3628_v4 = vpack.c.bf16 %v2999_v32, %v2994_v48  ;;  %v5212_v48 = vrot.slane %v4387_v16, 4 }
 0x2cd   :  { %v3616_v43 = vpack.c.bf16 %v2665_v54, %v2660_v27  ;;  %v2488_v27 = vsel %vm5182_vm5, %v2486_v61, %v4389_v2 }
 0x2ce   :  { %1494 = vrot.lane.b32.xlu1 %v1489_v41, %s3746_s29  ;;  %v2822_v41 = vsel %vm100_vm6, %v2818_v14, %v2819_v36  ;;  %v2326_v14 = vsel %vm100_vm6, %v2323_v19, %v2324_v57  ;;  %v2156_v57 = vrot.slane %v4401_v23, 4  ;;  %v2489_v54 = vsel %vm100_vm6, %v2486_v61, %v5212_v48 }
 0x2cf   :  { %1242 = vrot.lane.b32.xlu0 %v3564_v50, %s3745_s2  ;;  %v2832_v50 = vcombine.high %v2827_v51, %v2827_v51  ;;  %v2823_v36 = vsel %vm5181_vm3, %v2822_v41, %v4371_v58  ;;  %v2327_v58 = vsel %vm311_vm7, %v2326_v14, %v4383_v18  ;;  %vm5185_vm3 = vcmask 539648  }
 0x2d0   :  { %v2828_v0 = vmul.f32 %v2823_v36, %v4539_v56  ;;  %v2332_v19 = vmul.f32 %v2327_v58, %v4539_v56  ;;  %v3604_v41 = vpack.c.bf16 %v2336_v62, %v2331_v3  ;;  %v2490_v32 = vsel %vm5182_vm5, %v2489_v54, %v4387_v16 }
 0x2d1   :  { %v3622_v46 = vpack.c.bf16 %v2832_v50, %v2827_v51  ;;  %v2159_v51 = vsel %vm5185_vm3, %v2156_v57, %v4401_v23  ;;  %v2495_v23 = vmul.f32 %v2490_v32, %v4539_v56  ;;  %v1701_v3 = vsel %vm267_vm11, %v1699_v15, %v4413_v9 }
 0x2d2   :  { %1658 = vrot.lane.b32.xlu1 %v1653_v17, %s3734_s13  ;;  %v2666_v17 = vcombine.high %v2661_v40, %v2661_v40  ;;  %v2833_v2 = vcombine.high %v2828_v0, %v2828_v0  ;;  %v2337_v61 = vcombine.high %v2332_v19, %v2332_v19  ;;  %v1707_v16 = vmul.f32 %v4633_v13, %v1701_v3 }
 0x2d3   :  { %2028 = vrot.lane.b32.xlu0 %v3592_v37, %s3731_s9  ;;  %v2494_v37 = vmul.f32 %v2488_v27, %v4633_v13  ;;  %vm1866_vm5 = vcmask 506880   ;;  %v2500_v9 = vcombine.high %v2495_v23, %v2495_v23  ;;  %v5215_v54 = vrot.slane %v4415_v31, 4 }
 0x2d4   :  { %v3617_v38 = vpack.c.bf16 %v2666_v17, %v2661_v40  ;;  %v3623_v50 = vpack.c.bf16 %v2833_v2, %v2828_v0  ;;  %v1864_v17 = vrot.slane %v4417_v26, 4  ;;  %v5214_v0 = vrot.slane %v4411_v44, 4 }
 0x2d5   :  { %v2499_v18 = vcombine.high %v2494_v37, %v2494_v37  ;;  %v3611_v2 = vpack.c.bf16 %v2500_v9, %v2495_v23 }
 0x2d6   :  { %1160 = vrot.lane.b32.xlu1 %v1155_v49, %s5211_s6  ;;  %v2165_v49 = vmul.f32 %v2159_v51, %v4633_v13  ;;  %v1702_v27 = vsel %vm100_vm6, %v1699_v15, %v5214_v0 }
 0x2d7   :  { %2687 = vrot.lane.b32.xlu0 %v3616_v43, %s3752_s23  ;;  %v5213_v43 = vrot.slane %v4399_v21, 4  ;;  %v3610_v36 = vpack.c.bf16 %v2499_v18, %v2494_v37  ;;  %v1867_v37 = vsel %vm1866_vm5, %v1864_v17, %v4417_v26  ;;  %v1703_v48 = vsel %vm267_vm11, %v1702_v27, %v4411_v44 }
 0x2d8   :  { %v2170_v14 = vcombine.high %v2165_v49, %v2165_v49  ;;  %v1708_v51 = vmul.f32 %v1703_v48, %v4539_v56  ;;  %v5216_v26 = vrot.slane %v4440_v34, 4 }
 0x2d9   :  { %v2160_v40 = vsel %vm100_vm6, %v2156_v57, %v5213_v43  ;;  %v1873_v57 = vmul.f32 %v4633_v13, %v1867_v37  ;;  %v5219_v37 = vrot.slane %v4353_v22, 4 }
 0x2da   :  { %3021 = vrot.lane.b32.xlu1 %v3628_v4, %s3755_s30  ;;  %v2161_v4 = vsel %vm5185_vm3, %v2160_v40, %v4399_v21  ;;  %v3598_v58 = vpack.c.bf16 %v2170_v14, %v2165_v49  ;;  %v1712_v21 = vcombine.high %v1707_v16, %v1707_v16  ;;  %v1713_v43 = vcombine.high %v1708_v51, %v1708_v51 }
 0x2db   :  { %2854 = vrot.lane.b32.xlu0 %v3622_v46, %s3729_s28  ;;  %v3605_v46 = vpack.c.bf16 %v2337_v61, %v2332_v19  ;;  %v2166_v62 = vmul.f32 %v2161_v4, %v4539_v56  ;;  %v1878_v49 = vcombine.high %v1873_v57, %v1873_v57  ;;  %v1379_v4 = vmul.f32 %v4451_v53, %v4539_v56 }
 0x2dc   :  { %v3580_v18 = vpack.c.bf16 %v1712_v21, %v1707_v16  ;;  %v3581_v14 = vpack.c.bf16 %v1713_v43, %v1708_v51  ;;  %v1545_v53 = vmul.f32 %v4466_v42, %v4539_v56  ;;  %v2900_v21 = vrot.slane %v4365_v6, 4 }
 0x2dd   :  { %v2171_v19 = vcombine.high %v2166_v62, %v2166_v62  ;;  %v3586_v61 = vpack.c.bf16 %v1878_v49, %v1873_v57  ;;  %v5220_v57 = vrot.slane %v4359_v60, 4  ;;  %vm5187_vm3 = vcmask 793600  }
 0x2de   :  { %2689 = vrot.lane.b32.xlu1 %v3617_v38, %s3752_s23  ;;  %v1868_v38 = vsel %vm100_vm6, %v1864_v17, %v5215_v54  ;;  %v1202_v17 = vrot.slane %v4533_v59, 4 }
 0x2df   :  { %2358 = vrot.lane.b32.xlu0 %v3604_v41, %s3739_s18  ;;  %v1372_v41 = vsel %vm1371_vm1, %v5216_v26, %v4440_v34  ;;  %v1869_v32 = vsel %vm1866_vm5, %v1868_v38, %v4415_v31  ;;  %v3599_v15 = vpack.c.bf16 %v2171_v19, %v2166_v62  ;;  %v5218_v31 = vrot.slane %v4500_v63, 4 }
 0x2e0   :  { %v1378_v44 = vmul.f32 %v4633_v13, %v1372_v41  ;;  %v1874_v40 = vmul.f32 %v1869_v32, %v4539_v56  ;;  %v1384_v62 = vcombine.high %v1379_v4, %v1379_v4  ;;  %v1206_v35 = vsel %vm100_vm6, %v1202_v17, %v1203_v30 }
 0x2e1   :  { %v5221_v26 = vrot.slane %v4363_v5, 4 }
 0x2e2   :  { %2856 = vrot.lane.b32.xlu1 %v3623_v50, %s3729_s28  ;;  %v5217_v50 = vrot.slane %v4455_v1, 4  ;;  %v1383_v23 = vcombine.high %v1378_v44, %v1378_v44  ;;  %v1879_v16 = vcombine.high %v1874_v40, %v1874_v40  ;;  %v3569_v42 = vpack.c.bf16 %v1384_v62, %v1379_v4  ;;  %s5245_s28 = smov 95  }
 0x2e3   :  { %2521 = vrot.lane.b32.xlu0 %v3610_v36, %s3738_s17  ;;  %v1038_v36 = vsel %vm5184_vm14, %v5218_v31, %v4500_v63  ;;  %v1205_v63 = vsel %vm1204_vm0, %v1202_v17, %v4533_v59  ;;  %vm5186_vm14 = vcmask 777216   ;;  %v2904_v41 = vsel %vm100_vm6, %v2900_v21, %v5221_v26 }
 0x2e4   :  { %v1538_v34 = vsel %vm98_vm10, %v5217_v50, %v4455_v1  ;;  %v2733_v1 = vrot.slane %v4361_v47, 4  ;;  %v3568_v0 = vpack.c.bf16 %v1383_v23, %v1378_v44  ;;  %v3587_v9 = vpack.c.bf16 %v1879_v16, %v1874_v40  ;;  %v5223_v23 = vld [vmem:[#allocation7_spill] sm:$0xff] }
 0x2e5   :  { %v1544_v3 = vmul.f32 %v4633_v13, %v1538_v34  ;;  %v1211_v38 = vmul.f32 %v4633_v13, %v1205_v63  ;;  %v2905_v50 = vsel %vm5187_vm3, %v2904_v41, %v4363_v5  ;;  %v5222_v34 = vrot.slane %v4375_v8, 4 }
 0x2e6   :  { %2360 = vrot.lane.b32.xlu1 %v3605_v46, %s3739_s18  ;;  %v1044_v46 = vmul.f32 %v4633_v13, %v1038_v36  ;;  %v2737_v59 = vsel %vm100_vm6, %v2733_v1, %v5220_v57  ;;  %v2910_v36 = vmul.f32 %v2905_v50, %v4539_v56 }
 0x2e7   :  { %2192 = vrot.lane.b32.xlu0 %v3598_v58, %s3750_s19  ;;  %v1549_v27 = vcombine.high %v1544_v3, %v1544_v3  ;;  %v2989_v58 = vsel %vm100_vm6, %v2985_v7, %v5219_v37  ;;  %v1550_v7 = vcombine.high %v1545_v53, %v1545_v53  ;;  %v2738_v51 = vsel %vm5186_vm14, %v2737_v59, %v4359_v60 }
 0x2e8   :  { %v1049_v54 = vcombine.high %v1044_v46, %v1044_v46  ;;  %v2990_v19 = vsel %vm1081_vm4, %v2989_v58, %v4353_v22  ;;  %v1216_v49 = vcombine.high %v1211_v38, %v1211_v38  ;;  %v2736_v22 = vsel %vm5186_vm14, %v2733_v1, %v4361_v47 }
 0x2e9   :  { %v3574_v48 = vpack.c.bf16 %v1549_v27, %v1544_v3  ;;  %v2995_v44 = vmul.f32 %v2990_v19, %v4539_v56  ;;  %v1207_v60 = vsel %vm1204_vm0, %v1206_v35, %v4531_v55  ;;  %v3575_v32 = vpack.c.bf16 %v1550_v7, %v1545_v53 }
 0x2ea   :  { %2523 = vrot.lane.b32.xlu1 %v3611_v2, %s3738_s17  ;;  %v1045_v2 = vmul.f32 %v4512_v52, %v4539_v56  ;;  %v3556_v30 = vpack.c.bf16 %v1049_v54, %v1044_v46  ;;  %v2743_v52 = vmul.f32 %v2738_v51, %v4539_v56  ;;  %v1212_v43 = vmul.f32 %v1207_v60, %v4539_v56  ;;  %v5225_v46 = vld [vmem:[#allocation8_spill] sm:$0xff] }
 0x2eb   :  { %1734 = vrot.lane.b32.xlu0 %v3580_v18, %s3735_s14  ;;  %v2403_v18 = vrot.slane %v4377_v10, 4  ;;  %v2742_v40 = vmul.f32 %v2736_v22, %v4633_v13  ;;  %v2566_v47 = vrot.slane %v5223_v23, 4  ;;  %v3562_v55 = vpack.c.bf16 %v1216_v49, %v1211_v38  ;;  %v5227_v38 = vld [vmem:[#allocation9_spill] sm:$0xff] }
 0x2ec   :  { %v3000_v3 = vcombine.high %v2995_v44, %v2995_v44  ;;  %v2748_v31 = vcombine.high %v2743_v52, %v2743_v52  ;;  %v1217_v5 = vcombine.high %v1212_v43, %v1212_v43  ;;  %vm5189_vm14 = vcmask 670720  }
 0x2ed   :  { %v2747_v4 = vcombine.high %v2742_v40, %v2742_v40  ;;  %v2073_v63 = vrot.slane %v5225_v46, 4  ;;  %v2915_v62 = vcombine.high %v2910_v36, %v2910_v36  ;;  %v2405_v37 = vsel %vm5188_vm9, %v2403_v18, %v4377_v10 }
 0x2ee   :  { %2194 = vrot.lane.b32.xlu1 %v3599_v15, %s3750_s19  ;;  %v1050_v15 = vcombine.high %v1045_v2, %v1045_v2  ;;  %v2411_v57 = vmul.f32 %v2405_v37, %v4633_v13  ;;  %v2238_v35 = vrot.slane %v5227_v38, 4  ;;  %v2569_v19 = vsel %vm5189_vm14, %v2566_v47, %v5223_v23 }
 0x2ef   :  { %1900 = vrot.lane.b32.xlu0 %v3586_v61, %s3748_s8  ;;  %v2406_v61 = vsel %vm100_vm6, %v2403_v18, %v5222_v34  ;;  %v3619_v58 = vpack.c.bf16 %v2747_v4, %v2742_v40  ;;  %v3626_v10 = vpack.c.bf16 %v2915_v62, %v2910_v36  ;;  %v2575_v41 = vmul.f32 %v2569_v19, %v4633_v13 }
 0x2f0   :  { %v3557_v16 = vpack.c.bf16 %v1050_v15, %v1045_v2  ;;  %v2407_v17 = vsel %vm5188_vm9, %v2406_v61, %v4375_v8  ;;  %v3563_v8 = vpack.c.bf16 %v1217_v5, %v1212_v43  ;;  %v2416_v26 = vcombine.high %v2411_v57, %v2411_v57 }
 0x2f1   :  { %v2412_v53 = vmul.f32 %v2407_v17, %v4539_v56  ;;  %v2769_v51 = vrot.slane %v3619_v58, 6  ;;  %v2937_v22 = vrot.slane %v3626_v10, 6  ;;  %v2075_v43 = vsel %vm5190_vm8, %v2073_v63, %v5225_v46  ;;  %v5232_v46 = vld [vmem:[#allocation12_spill] sm:$0xff] }
 0x2f2   :  { %1736 = vrot.lane.b32.xlu1 %v3581_v14, %s3735_s14  ;;  %v2903_v14 = vsel %vm5187_vm3, %v2900_v21, %v4365_v6  ;;  %v3629_v6 = vpack.c.bf16 %v3000_v3, %v2995_v44  ;;  %vm1828_vm3 = vcmask 637952   ;;  %v5229_v44 = vld [vmem:[#allocation10_spill] sm:$0xff]  ;;  %v3607_v40 = vpack.c.bf16 %v2416_v26, %v2411_v57 }
 0x2f3   :  { %1405 = vrot.lane.b32.xlu0 %v3568_v0, %s3744_s20  ;;  %v2909_v1 = vmul.f32 %v2903_v14, %v4633_v13  ;;  %v5224_v0 = vrot.slane %v4379_v39, 4  ;;  %v2417_v7 = vcombine.high %v2412_v53, %v2412_v53  ;;  %v2580_v50 = vcombine.high %v2575_v41, %v2575_v41 }
 0x2f4   :  { %v2081_v34 = vmul.f32 %v2075_v43, %v4633_v13  ;;  %vm1781_vm9 = vcmask 408576   ;;  %v5230_v23 = vrot.slane %v4403_v24, 4  ;;  %v2241_v5 = vsel %vm1828_vm3, %v2238_v35, %v5227_v38 }
 0x2f5   :  { %v2570_v27 = vsel %vm100_vm6, %v2566_v47, %v5224_v0  ;;  %v2914_v21 = vcombine.high %v2909_v1, %v2909_v1  ;;  %v3608_v60 = vpack.c.bf16 %v2417_v7, %v2412_v53  ;;  %v3613_v4 = vpack.c.bf16 %v2580_v50, %v2575_v41  ;;  %v5234_v50 = vld [vmem:[#allocation13_spill] sm:$0xff] }
 0x2f6   :  { %1902 = vrot.lane.b32.xlu1 %v3587_v9, %s3748_s8  ;;  %v3620_v9 = vpack.c.bf16 %v2748_v31, %v2743_v52  ;;  %v2571_v59 = vsel %vm5189_vm14, %v2570_v27, %v4379_v39  ;;  %v1779_v52 = vrot.slane %v5229_v44, 4  ;;  %v2247_v17 = vmul.f32 %v2241_v5, %v4633_v13 }
 0x2f7   :  { %1571 = vrot.lane.b32.xlu0 %v3574_v48, %s3732_s12  ;;  %v5226_v48 = vrot.slane %v4391_v12, 4  ;;  %v2576_v2 = vmul.f32 %v2571_v59, %v4539_v56  ;;  %v3625_v39 = vpack.c.bf16 %v2914_v21, %v2909_v1  ;;  %v2439_v31 = vrot.slane %v3608_v60, 6 }
 0x2f8   :  { %v1783_v47 = vsel %vm100_vm6, %v1779_v52, %v5230_v23  ;;  %v2086_v1 = vcombine.high %v2081_v34, %v2081_v34  ;;  %v1782_v37 = vsel %vm1781_vm9, %v1779_v52, %v5229_v44  ;;  %v2252_v58 = vcombine.high %v2247_v17, %v2247_v17 }
 0x2f9   :  { %v2076_v54 = vsel %vm100_vm6, %v2073_v63, %v5226_v48  ;;  %v1784_v0 = vsel %vm1781_vm9, %v1783_v47, %v4403_v24  ;;  %v1451_v63 = vrot.slane %v5232_v46, 4  ;;  %v1788_v21 = vmul.f32 %v4633_v13, %v1782_v37 }
 0x2fa   :  { %1407 = vrot.lane.b32.xlu1 %v3569_v42, %s3744_s20  ;;  %v2770_v42 = vrot.slane %v3620_v9, 6  ;;  %v2077_v18 = vsel %vm5190_vm8, %v2076_v54, %v4391_v12  ;;  %v2936_v12 = vrot.slane %v3625_v39, 6  ;;  %v1789_v53 = vmul.f32 %v1784_v0, %v4539_v56 }
 0x2fb   :  { %1071 = vrot.lane.b32.xlu0 %v3556_v30, %s3741_s26  ;;  %v5228_v30 = vrot.slane %v4395_v29, 4  ;;  %v2082_v15 = vmul.f32 %v2077_v18, %v4539_v56  ;;  %v3595_v24 = vpack.c.bf16 %v2086_v1, %v2081_v34  ;;  %vm1453_vm14 = vcmask 375808  }
 0x2fc   :  { %v1455_v57 = vsel %vm100_vm6, %v1451_v63, %v1452_v45  ;;  %v1794_v38 = vcombine.high %v1789_v53, %v1789_v53  ;;  %v3601_v7 = vpack.c.bf16 %v2252_v58, %v2247_v17  ;;  %v5235_v34 = vrot.slane %v5234_v50, 4  ;;  %v5238_v17 = vld [vmem:[#allocation16_spill] sm:$0xff] }
 0x2fd   :  { %v2242_v49 = vsel %vm100_vm6, %v2238_v35, %v5228_v30  ;;  %v2087_v14 = vcombine.high %v2082_v15, %v2082_v15  ;;  %v2108_v10 = vrot.slane %v3595_v24, 6  ;;  %v1456_v19 = vsel %vm1453_vm14, %v1455_v57, %v4419_v33 }
 0x2fe   :  { %1573 = vrot.lane.b32.xlu1 %v3575_v32, %s3732_s12  ;;  %v2581_v32 = vcombine.high %v2576_v2, %v2576_v2  ;;  %v2243_v61 = vsel %vm1828_vm3, %v2242_v49, %v4395_v29  ;;  %v2438_v29 = vrot.slane %v3607_v40, 6  ;;  %v3584_v26 = vpack.c.bf16 %v1794_v38, %v1789_v53 }
 0x2ff   :  { %1238 = vrot.lane.b32.xlu0 %v3562_v55, %s3745_s2  ;;  %v5231_v55 = vld [vmem:[#allocation11_spill] sm:$0xff]  ;;  %v3596_v9 = vpack.c.bf16 %v2087_v14, %v2082_v15  ;;  %v1461_v18 = vmul.f32 %v1456_v19, %v4539_v56  ;;  %v1454_v30 = vsel %vm1453_vm14, %v1451_v63, %v5232_v46  ;;  %v2274_v44 = vrot.slane %v3601_v7, 6 }
 0x300   :  { %v1946_v3 = vrot.slane %v5231_v55, 4  ;;  %v3614_v36 = vpack.c.bf16 %v2581_v32, %v2576_v2  ;;  %v1793_v2 = vcombine.high %v1788_v21, %v1788_v21  ;;  %v1460_v33 = vmul.f32 %v4633_v13, %v1454_v30 }
 0x301   :  { %v2109_v48 = vrot.slane %v3596_v9, 6  ;;  %v1816_v32 = vrot.slane %v3584_v26, 6  ;;  %v1466_v43 = vcombine.high %v1461_v18, %v1461_v18  ;;  %v1127_v0 = vmul.f32 %v5238_v17, %v4539_v56 }
 0x302   :  { %1073 = vrot.lane.b32.xlu1 %v3557_v16, %s3741_s26  ;;  %v2248_v16 = vmul.f32 %v2243_v61, %v4539_v56  ;;  %v1949_v27 = vsel %vm100_vm6, %v1946_v3, %v1947_v20  ;;  %v3583_v52 = vpack.c.bf16 %v1793_v2, %v1788_v21  ;;  %v1618_v61 = vsel %vm182_vm12, %v5235_v34, %v5234_v50  ;;  %v5243_v50 = vld [vmem:[#allocation17_spill] sm:$0xff] }
 0x303   :  { %3023 = vrot.lane.b32.xlu0 %v3629_v6, %s3755_s30  ;;  %v2603_v6 = vrot.slane %v3614_v36, 6  ;;  %v1950_v20 = vsel %vm349_vm13, %v1949_v27, %v4407_v11  ;;  %v5236_v36 = vld [vmem:[#allocation15_spill] sm:$0xff]  ;;  %v1132_v21 = vcombine.high %v1127_v0, %v1127_v0  ;;  %vm5242_vm8 = vcmask 523264  }
 0x304   :  { %v2253_v62 = vcombine.high %v2248_v16, %v2248_v16  ;;  %v1955_v35 = vmul.f32 %v1950_v20, %v4539_v56  ;;  %v1815_v47 = vrot.slane %v3583_v52, 6  ;;  %v5237_v14 = vrot.slane %v5236_v36, 4  ;;  %v5241_v20 = vld [vmem:[#allocation19_spill] sm:$0xff] }
 0x305   :  { %v1294_v57 = vmul.f32 %v5241_v20, %v4539_v56  ;;  %v3560_v2 = vpack.c.bf16 %v1132_v21, %v1127_v0  ;;  %v3306_v0 = vld [vmem:[#allocation2 + $0x10] sm:$0xf] }
 0x306   :  { %1240 = vrot.lane.b32.xlu1 %v3563_v8, %s3745_s2  ;;  %v2602_v8 = vrot.slane %v3613_v4, 6  ;;  %v3602_v54 = vpack.c.bf16 %v2253_v62, %v2248_v16  ;;  %v1960_v41 = vcombine.high %v1955_v35, %v1955_v35  ;;  %v1120_v16 = vsel %vm1119_vm2, %v5237_v14, %v5236_v36  ;;  %v5239_v62 = vld [vmem:[#allocation18_spill] sm:$0xff] }
 0x307   :  { %2774 = vrot.lane.b32.xlu0 %v2770_v42, %s3754_s22  ;;  %v1948_v42 = vsel %vm349_vm13, %v1946_v3, %v5231_v55  ;;  %v1465_v3 = vcombine.high %v1460_v33, %v1460_v33  ;;  %v3572_v4 = vpack.c.bf16 %v1466_v43, %v1461_v18  ;;  %v1126_v9 = vmul.f32 %v4633_v13, %v1120_v16  ;;  %v3066_v36 = vld [vmem:[%s5134_s4] sm:$0xf] }
 0x308   :  { %v1954_v45 = vmul.f32 %v4633_v13, %v1948_v42  ;;  %v2275_v39 = vrot.slane %v3602_v54, 6  ;;  %v3590_v15 = vpack.c.bf16 %v1960_v41, %v1955_v35  ;;  %v5240_v53 = vrot.slane %v5239_v62, 4 }
 0x309   :  { %v3571_v63 = vpack.c.bf16 %v1465_v3, %v1460_v33  ;;  %v1488_v24 = vrot.slane %v3572_v4, 6  ;;  %v1131_v35 = vcombine.high %v1126_v9, %v1126_v9 }
 0x30a   :  { %2772 = vrot.lane.b32.xlu1 %v2769_v51, %s3754_s22  ;;  %v1287_v37 = vsel %vm1286_vm15, %v5240_v53, %v5239_v62 }
 0x30b   :  { %2941 = vrot.lane.b32.xlu0 %v2937_v22, %s3753_s11  ;;  %v1959_v22 = vcombine.high %v1954_v45, %v1954_v45  ;;  %v1487_v54 = vrot.slane %v3571_v63, 6  ;;  %v1293_v42 = vmul.f32 %v4633_v13, %v1287_v37  ;;  %v3559_v26 = vpack.c.bf16 %v1131_v35, %v1126_v9 }
 0x30d   :  { %v3589_v55 = vpack.c.bf16 %v1959_v22, %v1954_v45  ;;  %v1299_v45 = vcombine.high %v1294_v57, %v1294_v57  ;;  %v1298_v41 = vcombine.high %v1293_v42, %v1293_v42  ;;  %v1154_v22 = vrot.slane %v3560_v2, 6 }
 0x30e   :  { %2939 = vrot.lane.b32.xlu1 %v2936_v12, %s3753_s11  ;;  %v5233_v12 = vld [vmem:[#allocation14_spill] sm:$0xff] }
 0x30f   :  { %2443 = vrot.lane.b32.xlu0 %v2439_v31, %s3736_s15  ;;  %v1625_v40 = vmul.f32 %v5233_v12, %v4539_v56  ;;  %v1624_v31 = vmul.f32 %v4633_v13, %v1618_v61  ;;  %v1981_v46 = vrot.slane %v3589_v55, 6  ;;  %v3566_v33 = vpack.c.bf16 %v1299_v45, %v1294_v57 }
 0x310   :  { %v1153_v12 = vrot.slane %v3559_v26, 6 }
 0x311   :  { %v1630_v1 = vcombine.high %v1625_v40, %v1625_v40 }
 0x312   :  { %2441 = vrot.lane.b32.xlu1 %v2438_v29, %s3736_s15  ;;  %v1982_v29 = vrot.slane %v3590_v15, 6 }
 0x313   :  { %2607 = vrot.lane.b32.xlu0 %v2603_v6, %s3751_s24  ;;  %v1629_v6 = vcombine.high %v1624_v31, %v1624_v31  ;;  %v3578_v58 = vpack.c.bf16 %v1630_v1, %v1625_v40  ;;  %v3565_v40 = vpack.c.bf16 %v1298_v41, %v1293_v42 }
 0x315   :  { %v4874_v59 = vpop.permute.xlu0 %2032  ;;  %v3577_v38 = vpack.c.bf16 %v1629_v6, %v1624_v31  ;;  %v1652_v7 = vrot.slane %v3578_v58, 6  ;;  %v1320_v3 = vrot.slane %v3565_v40, 6 }
 0x316   :  { %2605 = vrot.lane.b32.xlu1 %v2602_v8, %s3751_s24  ;;  %v2036_v18 = vrot.slane %v4874_v59, 4  ;;  %v5244_v59 = vrot.slane %v5243_v50, 4 }
 0x317   :  { %2113 = vrot.lane.b32.xlu0 %v2109_v48, %s3737_s16 }
 0x318   :  { %v4881_v11 = vpop.permute.xlu1 %3025 }
 0x319   :  { %v4886_v51 = vpop.permute.xlu0 %2691 }
 0x31a   :  { %2111 = vrot.lane.b32.xlu1 %v2108_v10, %s3737_s16 }
 0x31b   :  { %2279 = vrot.lane.b32.xlu0 %v2275_v39, %s3749_s21  ;;  %v1651_v39 = vrot.slane %v3577_v38, 6 }
 0x31c   :  { %v4893_v49 = vpop.permute.xlu1 %2776 }
 0x31d   :  { %v4896_v60 = vpop.permute.xlu0 %2858 }
 0x31e   :  { %2277 = vrot.lane.b32.xlu1 %v2274_v44, %s3749_s21  ;;  %v1258_v44 = vld [vmem:[#allocation2 + $0x10] sm:$0xf]  ;;  %v2862_v2 = vrot.slane %v4896_v60, 4 }
 0x31f   :  { %1820 = vrot.lane.b32.xlu0 %v1816_v32, %s3747_s25  ;;  %v1295_v34 = vmul.f32 %v5244_v59, %v1258_v44 }
 0x320   :  { %v4906_v23 = vpop.permute.xlu1 %2943 }
 0x321   :  { %v4913_v5 = vpop.permute.xlu0 %2362  ;;  %v3567_v31 = vpack.c.bf16 %v1295_v34, %v1295_v34 }
 0x322   :  { %1818 = vrot.lane.b32.xlu1 %v1815_v47, %s3747_s25  ;;  %v1321_v47 = vrot.slane %v3566_v33, 6  ;;  %v2366_v44 = vrot.slane %v4913_v5, 4 }
 0x323   :  { %1986 = vrot.lane.b32.xlu0 %v1982_v29, %s3733_s0  ;;  %v1322_v29 = vrot.slane %v3567_v31, 6 }
 0x324   :  { %v4919_v27 = vpop.permute.xlu1 %2445 }
 0x325   :  { %v4926_v8 = vpop.permute.xlu0 %2525 }
 0x326   :  { %1984 = vrot.lane.b32.xlu1 %v1981_v46, %s3733_s0  ;;  %v2529_v59 = vrot.slane %v4926_v8, 4 }
 0x327   :  { %1492 = vrot.lane.b32.xlu0 %v1488_v24, %s3746_s29 }
 0x328   :  { %v4932_v48 = vpop.permute.xlu1 %2609 }
 0x329   :  { %v4935_v10 = vpop.permute.xlu0 %2196 }
 0x32a   :  { %1490 = vrot.lane.b32.xlu1 %v1487_v54, %s3746_s29 }
 0x32b   :  { %1656 = vrot.lane.b32.xlu0 %v1652_v7, %s3734_s13 }
 0x32c   :  { %v2031_v19 = vpop.permute.xlu1 %2030 }
 0x32d   :  { %v2035_v30 = vrot.slane %v2031_v19, 4  ;;  %v4940_v52 = vpop.permute.xlu0 %1738 }
 0x32e   :  { %1654 = vrot.lane.b32.xlu1 %v1651_v39, %s3734_s13 }
 0x32f   :  { %v2039_v32 = vsel %vm100_vm6, %v2035_v30, %v2036_v18  ;;  %1158 = vrot.lane.b32.xlu0 %v1154_v22, %s5211_s6 }
 0x330   :  { %v2040_v15 = vsel %vm5242_vm8, %v2031_v19, %v2039_v32  ;;  %v4946_v43 = vpop.permute.xlu1 %2115 }
 0x331   :  { %2044 = vst [vmem:[#allocation3 + $0x70] sm:$0x33] %v2040_v15  ;;  %v4950_v61 = vpop.permute.xlu0 %1904 }
 0x332   :  { %1156 = vrot.lane.b32.xlu1 %v1153_v12, %s5211_s6 }
 0x333   :  { %1325 = vrot.lane.b32.xlu0 %v1321_v47, %s5245_s28 }
 0x334   :  { %v4954_v55 = vpop.permute.xlu1 %2281 }
 0x335   :  { %v4959_v14 = vpop.permute.xlu0 %1409 }
 0x336   :  { %1323 = vrot.lane.b32.xlu1 %v1320_v3, %s5245_s28 }
 0x337   :  { %3069 = vperm.xlu0 %3661, %v3066_v36  }
 0x338   :  { %v4962_v16 = vpop.permute.xlu1 %1822 }
 0x339   :  { %v4964_v4 = vpop.permute.xlu0 %1575 }
 0x33a   :  { %1327 = vrot.lane.b32.xlu1 %v1322_v29, %s5245_s28 }
 0x33b   :  { %3316 = vrot.lane.b32.xlu0 %v4539_v56, %s3731_s9 }
 0x33c   :  { %v4969_v1 = vpop.permute.xlu1 %1988 }
 0x33d   :  { %v4971_v17 = vpop.permute.xlu0 %1075 }
 0x33e   :  { %3312 = vrot.lane.b32.xlu1 %v4633_v13, %s3731_s9 }
 0x33f   :  { %3320 = vrot.lane.b32.xlu0 %v3306_v0, %s3731_s9 }
 0x340   :  { %v4976_v46 = vpop.permute.xlu1 %1494 }
 0x341   :  { %v4978_v63 = vpop.permute.xlu0 %1242 }
 0x342   :  { %3314 = vrot.lane.b32.xlu1 %v4644_v28, %s3731_s9  ;;  %v2695_v28 = vrot.slane %v4886_v51, 4 }
 0x344   :  { %v4982_v6 = vpop.permute.xlu1 %1658 }
 0x345   :  { %v2029_v56 = vpop.permute.xlu0 %2028 }
 0x346   :  { %3318 = vrot.lane.b32.xlu1 %v4587_v25, %s3731_s9  ;;  %v2034_v9 = vrot.slane %v2029_v56, 4 }
 0x348   :  { %v4986_v62 = vpop.permute.xlu1 %1160  ;;  %v2037_v13 = vsel %vm100_vm6, %v2034_v9, %v2035_v30 }
 0x349   :  { %v2038_v53 = vsel %vm5242_vm8, %v2029_v56, %v2037_v13  ;;  %v2688_v37 = vpop.permute.xlu0 %2687  ;;  %v2200_v56 = vrot.slane %v4935_v10, 4  ;;  %vm5252_vm8 = vcmask 244736  }
 0x34a   :  { %2043 = vst [vmem:[#allocation3 + $0x88] sm:$0x33] %v2038_v53  ;;  %v2693_v20 = vrot.slane %v2688_v37, 4 }
 0x34c   :  { %v4990_v24 = vpop.permute.xlu1 %3021 }
 0x34d   :  { %v2855_v58 = vpop.permute.xlu0 %2854 }
 0x34e   :  { %v2860_v45 = vrot.slane %v2855_v58, 4 }
 0x350   :  { %v2690_v21 = vpop.permute.xlu1 %2689 }
 0x351   :  { %v2694_v57 = vrot.slane %v2690_v21, 4  ;;  %v2359_v54 = vpop.permute.xlu0 %2358 }
 0x352   :  { %v2364_v22 = vrot.slane %v2359_v54, 4 }
 0x353   :  { %v2696_v25 = vsel %vm100_vm6, %v2693_v20, %v2694_v57  ;;  %v2699_v38 = vsel %vm100_vm6, %v2694_v57, %v2695_v28  ;;  %v1742_v20 = vrot.slane %v4940_v52, 4 }
 0x354   :  { %v2698_v35 = vsel %vm1371_vm1, %v2688_v37, %v2696_v25  ;;  %v2700_v42 = vsel %vm1371_vm1, %v2690_v21, %v2699_v38  ;;  %v2857_v7 = vpop.permute.xlu1 %2856  ;;  %vm5250_vm1 = vcmask 662528  }
 0x355   :  { %2703 = vst [vmem:[#allocation3 + $0xa0] sm:$0x33] %v2698_v35  ;;  %2704 = vst [vmem:[#allocation3 + $0x90] sm:$0x33] %v2700_v42  ;;  %v2861_v19 = vrot.slane %v2857_v7, 4  ;;  %v2522_v39 = vpop.permute.xlu0 %2521 }
 0x356   :  { %v2527_v34 = vrot.slane %v2522_v39, 4 }
 0x357   :  { %v2863_v51 = vsel %vm100_vm6, %v2860_v45, %v2861_v19  ;;  %v2866_v26 = vsel %vm100_vm6, %v2861_v19, %v2862_v2  ;;  %v1908_v2 = vrot.slane %v4950_v61, 4 }
 0x358   :  { %v2865_v41 = vsel %vm1204_vm0, %v2855_v58, %v2863_v51  ;;  %v2867_v18 = vsel %vm1204_vm0, %v2857_v7, %v2866_v26  ;;  %v2361_v30 = vpop.permute.xlu1 %2360  ;;  %vm5251_vm0 = vmmov %vm5250_vm1 }
 0x359   :  { %2870 = vst [vmem:[#allocation3 + $0x98] sm:$0x33] %v2865_v41  ;;  %2871 = vst [vmem:[#allocation3 + $0x18] sm:$0x33] %v2867_v18  ;;  %v2365_v60 = vrot.slane %v2361_v30, 4  ;;  %v2193_v33 = vpop.permute.xlu0 %2192 }
 0x35a   :  { %v2198_v9 = vrot.slane %v2193_v33, 4 }
 0x35b   :  { %v2367_v32 = vsel %vm100_vm6, %v2364_v22, %v2365_v60  ;;  %v2369_v15 = vsel %vm100_vm6, %v2365_v60, %v2366_v44 }
 0x35c   :  { %v2368_v12 = vsel %vm267_vm11, %v2359_v54, %v2367_v32  ;;  %v2370_v40 = vsel %vm267_vm11, %v2361_v30, %v2369_v15  ;;  %v2524_v50 = vpop.permute.xlu1 %2523  ;;  %v1413_v30 = vrot.slane %v4959_v14, 4 }
 0x35d   :  { %2373 = vst [vmem:[#allocation3 + $0x20] sm:$0x33] %v2368_v12  ;;  %2374 = vst [vmem:[#allocation3 + $0xb8] sm:$0x33] %v2370_v40  ;;  %v2528_v5 = vrot.slane %v2524_v50, 4  ;;  %v1735_v47 = vpop.permute.xlu0 %1734  ;;  %v1579_v40 = vrot.slane %v4964_v4, 4 }
 0x35e   :  { %v1740_v57 = vrot.slane %v1735_v47, 4 }
 0x35f   :  { %v2530_v3 = vsel %vm100_vm6, %v2527_v34, %v2528_v5  ;;  %v2532_v31 = vsel %vm100_vm6, %v2528_v5, %v2529_v59 }
 0x360   :  { %v2531_v36 = vsel %vm98_vm10, %v2522_v39, %v2530_v3  ;;  %v2533_v29 = vsel %vm98_vm10, %v2524_v50, %v2532_v31  ;;  %v2195_v0 = vpop.permute.xlu1 %2194 }
 0x361   :  { %2536 = vst [vmem:[#allocation3 + $0x58] sm:$0x33] %v2531_v36  ;;  %2537 = vst [vmem:[#allocation3 + $0xc8] sm:$0x33] %v2533_v29  ;;  %v2199_v8 = vrot.slane %v2195_v0, 4  ;;  %v1901_v13 = vpop.permute.xlu0 %1900  ;;  %v1079_v36 = vrot.slane %v4971_v17, 4 }
 0x362   :  { %v1906_v45 = vrot.slane %v1901_v13, 4 }
 0x363   :  { %v2201_v53 = vsel %vm100_vm6, %v2198_v9, %v2199_v8  ;;  %v2204_v37 = vsel %vm100_vm6, %v2199_v8, %v2200_v56  ;;  %v3027_v9 = vrot.slane %v4990_v24, 4 }
 0x364   :  { %v2203_v58 = vsel %vm1866_vm5, %v2193_v33, %v2201_v53  ;;  %v2205_v21 = vsel %vm1866_vm5, %v2195_v0, %v2204_v37  ;;  %v1737_v28 = vpop.permute.xlu1 %1736  ;;  %vm5246_vm5 = vcmask 539648   ;;  %v3029_v0 = vrot.slane %v4881_v11, 4 }
 0x365   :  { %2208 = vst [vmem:[#allocation3 + $0x8] sm:$0x33] %v2203_v58  ;;  %2209 = vst [vmem:[#allocation3 + $0x38] sm:$0x33] %v2205_v21  ;;  %v1741_v10 = vrot.slane %v1737_v28, 4  ;;  %v1406_v54 = vpop.permute.xlu0 %1405  ;;  %v1246_v37 = vrot.slane %v4978_v63, 4 }
 0x366   :  { %vm5247_vm10 = vmmov %vm5246_vm5  ;;  %v1411_v44 = vrot.slane %v1406_v54, 4  ;;  %v2780_v63 = vrot.slane %v4893_v49, 4 }
 0x367   :  { %v1743_v25 = vsel %vm100_vm6, %v1740_v57, %v1741_v10  ;;  %v1745_v38 = vsel %vm100_vm6, %v1741_v10, %v1742_v20 }
 0x368   :  { %v1744_v35 = vsel %vm311_vm7, %v1735_v47, %v1743_v25  ;;  %v1746_v42 = vsel %vm311_vm7, %v1737_v28, %v1745_v38  ;;  %v1903_v7 = vpop.permute.xlu1 %1902  ;;  %vm5248_vm7 = vcmask 769024  }
 0x369   :  { %1749 = vst [vmem:[#allocation3 + $0x80] sm:$0x33] %v1744_v35  ;;  %1750 = vst [vmem:[#allocation3 + $0xa8] sm:$0x33] %v1746_v42  ;;  %v1907_v52 = vrot.slane %v1903_v7, 4  ;;  %v1572_v19 = vpop.permute.xlu0 %1571 }
 0x36a   :  { %vm5249_vm11 = vmmov %vm5248_vm7  ;;  %v1577_v50 = vrot.slane %v1572_v19, 4 }
 0x36b   :  { %v1909_v39 = vsel %vm100_vm6, %v1906_v45, %v1907_v52  ;;  %v1912_v51 = vsel %vm100_vm6, %v1907_v52, %v1908_v2 }
 0x36c   :  { %v1911_v26 = vsel %vm5246_vm5, %v1901_v13, %v1909_v39  ;;  %v1913_v41 = vsel %vm5247_vm10, %v1903_v7, %v1912_v51  ;;  %v1408_v18 = vpop.permute.xlu1 %1407  ;;  %vm5253_vm5 = vmmov %vm5252_vm8  ;;  %v2947_v39 = vrot.slane %v4906_v23, 4 }
 0x36d   :  { %1916 = vst [vmem:[#allocation3 + $0x50] sm:$0x33] %v1911_v26  ;;  %1917 = vst [vmem:[#allocation3 + $0x30] sm:$0x33] %v1913_v41  ;;  %v1412_v61 = vrot.slane %v1408_v18, 4  ;;  %v1072_v22 = vpop.permute.xlu0 %1071 }
 0x36e   :  { %v1077_v29 = vrot.slane %v1072_v22, 4 }
 0x36f   :  { %v1414_v60 = vsel %vm100_vm6, %v1411_v44, %v1412_v61  ;;  %v1417_v33 = vsel %vm100_vm6, %v1412_v61, %v1413_v30  ;;  %v2449_v61 = vrot.slane %v4919_v27, 4 }
 0x370   :  { %v1416_v32 = vsel %vm5248_vm7, %v1406_v54, %v1414_v60  ;;  %v1418_v15 = vsel %vm5249_vm11, %v1408_v18, %v1417_v33  ;;  %v1574_v12 = vpop.permute.xlu1 %1573 }
 0x371   :  { %1421 = vst [vmem:[#allocation3 + $0x60] sm:$0x33] %v1416_v32  ;;  %1422 = vst [vmem:[#allocation3 + $0x28] sm:$0x33] %v1418_v15  ;;  %v1578_v14 = vrot.slane %v1574_v12, 4  ;;  %v1239_v59 = vpop.permute.xlu0 %1238 }
 0x372   :  { %v1244_v28 = vrot.slane %v1239_v59, 4 }
 0x373   :  { %v1580_v34 = vsel %vm100_vm6, %v1577_v50, %v1578_v14  ;;  %v1582_v5 = vsel %vm100_vm6, %v1578_v14, %v1579_v40 }
 0x374   :  { %v1581_v47 = vsel %vm5250_vm1, %v1572_v19, %v1580_v34  ;;  %v1583_v3 = vsel %vm5251_vm0, %v1574_v12, %v1582_v5  ;;  %v1074_v31 = vpop.permute.xlu1 %1073  ;;  %vm5266_vm0 = vcmask 793600  }
 0x375   :  { %1586 = vst [vmem:[#allocation3 + $0x40] sm:$0x33] %v1581_v47  ;;  %1587 = vst [vmem:[#allocation3 + $0x78] sm:$0x33] %v1583_v3  ;;  %v1078_v4 = vrot.slane %v1074_v31, 4  ;;  %v3024_v56 = vpop.permute.xlu0 %3023 }
 0x376   :  { %v3028_v53 = vrot.slane %v3024_v56, 4 }
 0x377   :  { %v1080_v8 = vsel %vm100_vm6, %v1077_v29, %v1078_v4  ;;  %v1083_v13 = vsel %vm100_vm6, %v1078_v4, %v1079_v36  ;;  %v2613_v29 = vrot.slane %v4932_v48, 4  ;;  %v2119_v48 = vrot.slane %v4946_v43, 4 }
 0x378   :  { %v1082_v58 = vsel %vm1081_vm4, %v1072_v22, %v1080_v8  ;;  %v1084_v17 = vsel %vm1081_vm4, %v1074_v31, %v1083_v13  ;;  %v1241_v21 = vpop.permute.xlu1 %1240  ;;  %v3030_v11 = vsel %vm100_vm6, %v3027_v9, %v3028_v53  ;;  %v3033_v20 = vsel %vm100_vm6, %v3028_v53, %v3029_v0 }
 0x379   :  { %1087 = vst [vmem:[#allocation3 + $0xb0] sm:$0x33] %v1082_v58  ;;  %1088 = vst [vmem:[#allocation3] sm:$0x33] %v1084_v17  ;;  %v1245_v57 = vrot.slane %v1241_v21, 4  ;;  %v3032_v10 = vsel %vm5252_vm8, %v4990_v24, %v3030_v11  ;;  %v3034_v54 = vsel %vm5253_vm5, %v3024_v56, %v3033_v20  ;;  %v2775_v25 = vpop.permute.xlu0 %2774  ;;  %vm5254_vm4 = vcmask 785408  }
 0x37a   :  { %3037 = vst [vmem:[#allocation3 + $0xc0] sm:$0x33] %v3032_v10  ;;  %3038 = vst [vmem:[#allocation3 + $0x68] sm:$0x33] %v3034_v54  ;;  %v2779_v42 = vrot.slane %v2775_v25, 4  ;;  %v2285_v43 = vrot.slane %v4954_v55, 4 }
 0x37b   :  { %v1247_v38 = vsel %vm100_vm6, %v1244_v28, %v1245_v57  ;;  %v1250_v35 = vsel %vm100_vm6, %v1245_v57, %v1246_v37  ;;  %vm5255_vm10 = vmmov %vm5254_vm4  ;;  %vm5268_vm5 = vcmask 777216  }
 0x37c   :  { %v1249_v7 = vsel %vm5254_vm4, %v1239_v59, %v1247_v38  ;;  %v1251_v2 = vsel %vm5255_vm10, %v1241_v21, %v1250_v35  ;;  %v2773_v45 = vpop.permute.xlu1 %2772  ;;  %v2784_v24 = vsel %vm100_vm6, %v2779_v42, %v2780_v63  ;;  %vm5267_vm8 = vmmov %vm5266_vm0  ;;  %vm3202_vm10 = vcmask 818176  }
 0x37d   :  { %1254 = vst [vmem:[#allocation3 + $0x10] sm:$0x33] %v1249_v7  ;;  %1255 = vst [vmem:[#allocation3 + $0x48] sm:$0x33] %v1251_v2  ;;  %v2778_v52 = vrot.slane %v2773_v45, 4  ;;  %v2785_v19 = vsel %vm1286_vm15, %v2775_v25, %v2784_v24  ;;  %v2942_v49 = vpop.permute.xlu0 %2941 }
 0x37e   :  { %2789 = vst [vmem:[#allocation3 + $0x90] sm:$0xcc] %v2785_v19  ;;  %v2946_v26 = vrot.slane %v2942_v49, 4  ;;  %vm5269_vm4 = vmmov %vm5268_vm5 }
 0x37f   :  { %v2781_v51 = vsel %vm100_vm6, %v2778_v52, %v2779_v42 }
 0x380   :  { %v2783_v41 = vsel %vm1286_vm15, %v2773_v45, %v2781_v51  ;;  %v2940_v18 = vpop.permute.xlu1 %2939  ;;  %v2951_v30 = vsel %vm100_vm6, %v2946_v26, %v2947_v39  ;;  %vm5256_vm15 = vcmask 1041408   ;;  %v1826_v51 = vrot.slane %v4962_v16, 4 }
 0x381   :  { %2788 = vst [vmem:[#allocation3 + $0xa0] sm:$0xcc] %v2783_v41  ;;  %v2945_v44 = vrot.slane %v2940_v18, 4  ;;  %v2952_v22 = vsel %vm1119_vm2, %v2942_v49, %v2951_v30  ;;  %v2444_v60 = vpop.permute.xlu0 %2443  ;;  %v3064_v33 = vld [vmem:[#allocation3 + $0xc0] sm:$0x33]  ;;  %vm5257_vm7 = vmmov %vm5256_vm15  ;;  %v1992_v16 = vrot.slane %v4969_v1, 4 }
 0x382   :  { %v3065_v32 = vld [vmem:[#allocation3 + $0x68] sm:$0x33]  ;;  %2956 = vst [vmem:[#allocation3 + $0x18] sm:$0xcc] %v2952_v22  ;;  %v2448_v15 = vrot.slane %v2444_v60, 4  ;;  %v3521_v12 = vcombine.high %v3064_v33, %v3064_v33  ;;  %v3520_v59 = vcombine.low %v3064_v33, %v3064_v33  ;;  %vm5258_vm11 = vmmov %vm5257_vm7 }
 0x383   :  { %v2948_v23 = vsel %vm100_vm6, %v2945_v44, %v2946_v26  ;;  %v3523_v40 = vcombine.high %v3065_v32, %v3065_v32  ;;  %v3522_v34 = vcombine.low %v3065_v32, %v3065_v32  ;;  %vm5259_vm1 = vmmov %vm5257_vm7 }
 0x384   :  { %v2950_v50 = vsel %vm1119_vm2, %v2940_v18, %v2948_v23  ;;  %v2442_v14 = vpop.permute.xlu1 %2441  ;;  %v2452_v5 = vsel %vm100_vm6, %v2448_v15, %v2449_v61  ;;  %3524 = vmatprep.subr.msk.bf16.mxu0 %vm5256_vm15, %v3521_v12  ;;  %v3207_v31 = vsel %vm5258_vm11, %v3520_v59, 0 }
 0x385   :  { %2955 = vst [vmem:[#allocation3 + $0x98] sm:$0xcc] %v2950_v50  ;;  %v2447_v27 = vrot.slane %v2442_v14, 4  ;;  %3526 = vmatprep.subr.msk.bf16.mxu1 %vm5257_vm7, %v3523_v40  ;;  %v2453_v47 = vsel %vm182_vm12, %v2444_v60, %v2452_v5  ;;  %v2608_v3 = vpop.permute.xlu0 %2607  ;;  %v3213_v36 = vsel %vm5259_vm1, %v3522_v34, 0  ;;  %3221 = vmatpush1.bf16.msra.mxu0 %v3207_v31 }
 0x386   :  { %2457 = vst [vmem:[#allocation3 + $0xb8] sm:$0xcc] %v2453_v47  ;;  %v2612_v0 = vrot.slane %v2608_v3, 4  ;;  %3262 = vmatpush1.bf16.msra.mxu1 %v3213_v36 }
 0x387   :  { %v2450_v4 = vsel %vm100_vm6, %v2447_v27, %v2448_v15  ;;  %v1498_v27 = vrot.slane %v4976_v46, 4 }
 0x388   :  { %v2451_v56 = vsel %vm182_vm12, %v2442_v14, %v2450_v4  ;;  %v2606_v9 = vpop.permute.xlu1 %2605  ;;  %v2617_v8 = vsel %vm100_vm6, %v2612_v0, %v2613_v29 }
 0x389   :  { %2456 = vst [vmem:[#allocation3 + $0x20] sm:$0xcc] %v2451_v56  ;;  %v2611_v13 = vrot.slane %v2606_v9, 4  ;;  %v2618_v53 = vsel %vm1453_vm14, %v2608_v3, %v2617_v8  ;;  %v2114_v37 = vpop.permute.xlu0 %2113  ;;  %v3678_v58 = vld [vmem:[#allocation3 + $0x90] ss:$-120 sps:$4 sm:$0xff]  }
 0x38a   :  { %v3680_v17 = vld [vmem:[#allocation3 + $0x94] ss:$-120 sps:$4 sm:$0xff]   ;;  %2622 = vst [vmem:[#allocation3 + $0xc8] sm:$0xcc] %v2618_v53  ;;  %v2118_v28 = vrot.slane %v2114_v37, 4 }
 0x38b   :  { %v2614_v21 = vsel %vm100_vm6, %v2611_v13, %v2612_v0  ;;  %3263 = vmatprep.subr.bf16.mxu1 %v3680_v17  ;;  %v1662_v13 = vrot.slane %v4982_v6, 4  ;;  %v1164_v6 = vrot.slane %v4986_v62, 4 }
 0x38c   :  { %v2616_v11 = vsel %vm1453_vm14, %v2606_v9, %v2614_v21  ;;  %v2112_v20 = vpop.permute.xlu1 %2111  ;;  %v3681_v57 = vld [vmem:[#allocation3 + $0xa0] ss:$-8 sps:$4 sm:$0xff]   ;;  %v3683_v10 = vld [vmem:[#allocation3 + $0xa4] ss:$-8 sps:$4 sm:$0xff]   ;;  %v2122_v54 = vsel %vm100_vm6, %v2118_v28, %v2119_v48  ;;  %3264 = vmatpush1.bf16.msra.mxu1 %v3678_v58  ;;  %vm5264_vm14 = vcmask 654336  }
 0x38d   :  { %2621 = vst [vmem:[#allocation3 + $0x58] sm:$0xcc] %v2616_v11  ;;  %v2117_v25 = vrot.slane %v2112_v20, 4  ;;  %v2123_v63 = vsel %vm349_vm13, %v2114_v37, %v2122_v54  ;;  %v2280_v38 = vpop.permute.xlu0 %2279  ;;  %3222 = vmatprep.subr.bf16.mxu0 %v3683_v10  ;;  %vm5265_vm2 = vmmov %vm5264_vm14 }
 0x38e   :  { %2127 = vst [vmem:[#allocation3 + $0x70] sm:$0xcc] %v2123_v63  ;;  %v2284_v42 = vrot.slane %v2280_v38, 4  ;;  %3223 = vmatpush1.bf16.msra.mxu0 %v3681_v57 }
 0x38f   :  { %v2120_v35 = vsel %vm100_vm6, %v2117_v25, %v2118_v28 }
 0x390   :  { %v2121_v7 = vsel %vm349_vm13, %v2112_v20, %v2120_v35  ;;  %v2278_v2 = vpop.permute.xlu1 %2277  ;;  %v2289_v45 = vsel %vm100_vm6, %v2284_v42, %v2285_v43 }
 0x391   :  { %2126 = vst [vmem:[#allocation3 + $0x88] sm:$0xcc] %v2121_v7  ;;  %v2283_v24 = vrot.slane %v2278_v2, 4  ;;  %v2290_v52 = vsel %vm1781_vm9, %v2280_v38, %v2289_v45  ;;  %v1821_v19 = vpop.permute.xlu0 %1820  ;;  %v3684_v49 = vld [vmem:[#allocation3 + $0xb8] ss:$16 sps:$4 sm:$0xff]  }
 0x392   :  { %v3686_v39 = vld [vmem:[#allocation3 + $0xbc] ss:$16 sps:$4 sm:$0xff]   ;;  %2294 = vst [vmem:[#allocation3 + $0x38] sm:$0xcc] %v2290_v52  ;;  %v1825_v26 = vrot.slane %v1821_v19, 4 }
 0x393   :  { %v2286_v55 = vsel %vm100_vm6, %v2283_v24, %v2284_v42  ;;  %3265 = vmatprep.subr.bf16.mxu1 %v3686_v39 }
 0x394   :  { %v2288_v41 = vsel %vm1781_vm9, %v2278_v2, %v2286_v55  ;;  %v1819_v18 = vpop.permute.xlu1 %1818  ;;  %v3687_v30 = vld [vmem:[#allocation3 + $0x20] ss:$56 sps:$4 sm:$0xff]   ;;  %v3689_v44 = vld [vmem:[#allocation3 + $0x24] ss:$56 sps:$4 sm:$0xff]   ;;  %v1830_v61 = vsel %vm100_vm6, %v1825_v26, %v1826_v51  ;;  %3266 = vmatpush1.bf16.msra.mxu1 %v3684_v49  ;;  %vm5260_vm9 = vcmask 531456  }
 0x395   :  { %2293 = vst [vmem:[#allocation3 + $0x8] sm:$0xcc] %v2288_v41  ;;  %v1824_v22 = vrot.slane %v1819_v18, 4  ;;  %v1831_v60 = vsel %vm1828_vm3, %v1821_v19, %v1830_v61  ;;  %v1987_v33 = vpop.permute.xlu0 %1986  ;;  %3224 = vmatprep.subr.bf16.mxu0 %v3689_v44  ;;  %vm5261_vm12 = vmmov %vm5260_vm9 }
 0x396   :  { %1835 = vst [vmem:[#allocation3 + $0xa8] sm:$0xcc] %v1831_v60  ;;  %v1991_v23 = vrot.slane %v1987_v33, 4  ;;  %3225 = vmatpush1.bf16.msra.mxu0 %v3687_v30 }
 0x397   :  { %v1827_v32 = vsel %vm100_vm6, %v1824_v22, %v1825_v26 }
 0x398   :  { %v1829_v15 = vsel %vm1828_vm3, %v1819_v18, %v1827_v32  ;;  %v1985_v12 = vpop.permute.xlu1 %1984  ;;  %v1995_v40 = vsel %vm100_vm6, %v1991_v23, %v1992_v16  ;;  %v3052_v36 = vld [vmem:[#allocation3 + $0x88] sm:$0xff]  ;;  %vm5262_vm3 = vcmask 670720  }
 0x399   :  { %1834 = vst [vmem:[#allocation3 + $0x80] sm:$0xcc] %v1829_v15  ;;  %v1990_v50 = vrot.slane %v1985_v12, 4  ;;  %v1996_v14 = vsel %vm5260_vm9, %v1987_v33, %v1995_v40  ;;  %v1493_v59 = vpop.permute.xlu0 %1492  ;;  %v3690_v34 = vld [vmem:[#allocation3 + $0x70] ss:$-56 sps:$4 sm:$0xff]   ;;  %vm5263_vm13 = vmmov %vm5262_vm3 }
 0x39a   :  { %v3692_v5 = vld [vmem:[#allocation3 + $0x74] ss:$-56 sps:$4 sm:$0xff]   ;;  %2000 = vst [vmem:[#allocation3 + $0x30] sm:$0xcc] %v1996_v14  ;;  %v1497_v47 = vrot.slane %v1493_v59, 4 }
 0x39b   :  { %v1993_v1 = vsel %vm100_vm6, %v1990_v50, %v1991_v23  ;;  %3267 = vmatprep.subr.bf16.mxu1 %v3692_v5  ;;  %v3039_v15 = vld [vmem:[%s5133_s3] sm:$0x3] }
 0x39c   :  { %v1994_v3 = vsel %vm5261_vm12, %v1985_v12, %v1993_v1  ;;  %v1491_v31 = vpop.permute.xlu1 %1490  ;;  %v3054_v29 = vld [vmem:[#allocation3 + $0x8] sm:$0xff]  ;;  %v1502_v4 = vsel %vm100_vm6, %v1497_v47, %v1498_v27  ;;  %3268 = vmatpush1.bf16.msra.mxu1 %v3690_v34 }
 0x39d   :  { %1999 = vst [vmem:[#allocation3 + $0x50] sm:$0xcc] %v1994_v3  ;;  %v1496_v0 = vrot.slane %v1491_v31, 4  ;;  %v3508_v56 = vcombine.low %v3052_v36, %v3054_v29  ;;  %v3509_v9 = vcombine.high %v3052_v36, %v3054_v29  ;;  %v1503_v8 = vsel %vm5262_vm3, %v1493_v59, %v1502_v4  ;;  %v1657_v46 = vpop.permute.xlu0 %1656 }
 0x39e   :  { %1507 = vst [vmem:[#allocation3 + $0x28] sm:$0xcc] %v1503_v8  ;;  %v1661_v37 = vrot.slane %v1657_v46, 4 }
 0x39f   :  { %v1499_v53 = vsel %vm100_vm6, %v1496_v0, %v1497_v47  ;;  %3226 = vmatprep.subr.bf16.mxu0 %v3509_v9 }
 0x3a0   :  { %v1501_v58 = vsel %vm5263_vm13, %v1491_v31, %v1499_v53  ;;  %3227 = vmatpush1.bf16.msra.mxu0 %v3508_v56  ;;  %v1655_v17 = vpop.permute.xlu1 %1654  ;;  %v1665_v48 = vsel %vm100_vm6, %v1661_v37, %v1662_v13 }
 0x3a1   :  { %1506 = vst [vmem:[#allocation3 + $0x60] sm:$0xcc] %v1501_v58  ;;  %v1660_v21 = vrot.slane %v1655_v17, 4  ;;  %v1666_v28 = vsel %vm5264_vm14, %v1657_v46, %v1665_v48  ;;  %v1159_v11 = vpop.permute.xlu0 %1158  ;;  %v3693_v20 = vld [vmem:[#allocation3 + $0xa8] ss:$-120 sps:$4 sm:$0xff]  }
 0x3a2   :  { %v3695_v57 = vld [vmem:[#allocation3 + $0xac] ss:$-120 sps:$4 sm:$0xff]   ;;  %1670 = vst [vmem:[#allocation3 + $0x78] sm:$0xcc] %v1666_v28  ;;  %v1163_v54 = vrot.slane %v1159_v11, 4 }
 0x3a3   :  { %v1663_v10 = vsel %vm100_vm6, %v1660_v21, %v1661_v37  ;;  %3269 = vmatprep.subr.bf16.mxu1 %v3695_v57 }
 0x3a4   :  { %v1664_v25 = vsel %vm5265_vm2, %v1655_v17, %v1663_v10  ;;  %v1157_v63 = vpop.permute.xlu1 %1156  ;;  %v3696_v38 = vld [vmem:[#allocation3 + $0x80] ss:$-48 sps:$4 sm:$0xff]   ;;  %v3698_v43 = vld [vmem:[#allocation3 + $0x84] ss:$-48 sps:$4 sm:$0xff]   ;;  %v1168_v35 = vsel %vm100_vm6, %v1163_v54, %v1164_v6  ;;  %3270 = vmatpush1.bf16.msra.mxu1 %v3693_v20 }
 0x3a5   :  { %1669 = vst [vmem:[#allocation3 + $0x40] sm:$0xcc] %v1664_v25  ;;  %v1162_v42 = vrot.slane %v1157_v63, 4  ;;  %v1169_v7 = vsel %vm5266_vm0, %v1159_v11, %v1168_v35  ;;  %v1326_v2 = vpop.permute.xlu0 %1325  ;;  %3228 = vmatprep.subr.bf16.mxu0 %v3698_v43 }
 0x3a6   :  { %1173 = vst [vmem:[#allocation3] sm:$0xcc] %v1169_v7  ;;  %3229 = vmatpush1.bf16.msra.mxu0 %v3696_v38  ;;  %v1330_v52 = vrot.slane %v1326_v2, 4 }
 0x3a7   :  { %v1165_v62 = vsel %vm100_vm6, %v1162_v42, %v1163_v54 }
 0x3a8   :  { %v1167_v45 = vsel %vm5267_vm8, %v1157_v63, %v1165_v62  ;;  %v1324_v24 = vpop.permute.xlu1 %1323  ;;  %v3044_v41 = vld [vmem:[#allocation3 + $0x60] sm:$0xff] }
 0x3a9   :  { %1172 = vst [vmem:[#allocation3 + $0xb0] sm:$0xcc] %v1167_v45  ;;  %v1329_v19 = vrot.slane %v1324_v24, 4  ;;  %v3699_v49 = vld [vmem:[#allocation3 + $0x28] ss:$80 sps:$4 sm:$0xff]  }
 0x3aa   :  { %v3701_v39 = vld [vmem:[#allocation3 + $0x2c] ss:$80 sps:$4 sm:$0xff]  }
 0x3ab   :  { %v1332_v51 = vsel %vm100_vm6, %v1329_v19, %v1330_v52  ;;  %3271 = vmatprep.subr.bf16.mxu1 %v3701_v39 }
 0x3ac   :  { %v1334_v55 = vsel %vm5268_vm5, %v1324_v24, %v1332_v51  ;;  %v1328_v26 = vpop.permute.xlu1 %1327  ;;  %v3046_v18 = vld [vmem:[#allocation3 + $0x40] sm:$0xff]  ;;  %3272 = vmatpush1.bf16.msra.mxu1 %v3699_v49 }
 0x3ad   :  { %1339 = vst [vmem:[#allocation3 + $0x10] sm:$0xcc] %v1334_v55  ;;  %v1331_v30 = vrot.slane %v1328_v26, 4  ;;  %v3500_v44 = vcombine.low %v3044_v41, %v3046_v18  ;;  %v3501_v61 = vcombine.high %v3044_v41, %v3046_v18 }
 0x3af   :  { %v1335_v22 = vsel %vm100_vm6, %v1330_v52, %v1331_v30  ;;  %3230 = vmatprep.subr.bf16.mxu0 %v3501_v61  ;;  %vm5270_vm6 = vcmask 523264  }
 0x3b0   :  { %v1336_v60 = vsel %vm5269_vm4, %v1326_v2, %v1335_v22  ;;  %3231 = vmatpush1.bf16.msra.mxu0 %v3500_v44  ;;  %v3040_v33 = vld [vmem:[#allocation3 + $0xb0] sm:$0xff]  ;;  %v3313_v50 = vpop.permute.xlu1 %3312  ;;  %vm5271_vm15 = vmmov %vm5270_vm6 }
 0x3b1   :  { %1340 = vst [vmem:[#allocation3 + $0x48] sm:$0xcc] %v1336_v60  ;;  %vm5272_vm7 = vmmov %vm5270_vm6 }
 0x3b2   :  { %v3070_v14 = vpop.permute.xlu0 %3069  ;;  %vm5273_vm11 = vmmov %vm5270_vm6 }
 0x3b4   :  { %v3042_v16 = vld [vmem:[#allocation3 + $0x10] sm:$0xff]  ;;  %v3315_v59 = vpop.permute.xlu1 %3314 }
 0x3b5   :  { %v3496_v32 = vcombine.low %v3040_v33, %v3042_v16  ;;  %v3497_v23 = vcombine.high %v3040_v33, %v3042_v16  ;;  %v3322_v36 = vsel %vm5270_vm6, %v3313_v50, %v3315_v59 }
 0x3b6   :  { %v3317_v34 = vpop.permute.xlu0 %3316 }
 0x3b7   :  { %3232 = vmatprep.subr.bf16.mxu0 %v3497_v23  ;;  %v3323_v46 = vsel %vm5271_vm15, %v3315_v59, %v3317_v34 }
 0x3b8   :  { %3233 = vmatpush1.bf16.msra.mxu0 %v3496_v32  ;;  %v3702_v12 = vld [vmem:[#allocation3] ss:$72 sps:$4 sm:$0xff]   ;;  %v3704_v40 = vld [vmem:[#allocation3 + $0x4] ss:$72 sps:$4 sm:$0xff]   ;;  %v3319_v29 = vpop.permute.xlu1 %3318 }
 0x3b9   :  { %3273 = vmatprep.subr.bf16.mxu1 %v3704_v40  ;;  %v3324_v17 = vsel %vm5272_vm7, %v3317_v34, %v3319_v29 }
 0x3ba   :  { %3274 = vmatpush1.bf16.msra.mxu1 %v3702_v12  ;;  %v3321_v13 = vpop.permute.xlu0 %3320 }
 0x3bb   :  { %3525 = vmatmul.mubr.msk.bf16.vlgmr.msra.gmra.mxu0 %vm3202_vm10, %v3039_v15  ;;  %v3325_v20 = vsel %vm5273_vm11, %v3319_v29, %v3321_v13 }
 0x3bd   :  { %3527 = vmatmul.mubr.msk.bf16.vlgmr.msra.gmra.mxu1 %vm3202_vm10, %v3039_v15 }
 0x47b   :  { %v3252_v5 = vpop.f32.mrf.mxu0 }
 0x47c   :  { %v3253_v27 = vadd.f32 %v3252_v5, %v3070_v14 }
 0x47d   :  { %v3254_v1 = vpop.f32.mrf.mxu0  ;;  %v3293_v31 = vpop.f32.mrf.mxu1 }
 0x47e   :  { %v3300_v47 = vmax.f32 %v3253_v27, 0.0  ;;  %v3255_v3 = vadd.f32 %v3254_v1, %v3070_v14  ;;  %v3294_v0 = vadd.f32 %v3293_v31, %v3070_v14 }
 0x47f   :  { %v3256_v4 = vpop.f32.mrf.mxu0  ;;  %v3295_v8 = vpop.f32.mrf.mxu1 }
 0x480   :  { %v3330_v56 = vadd.f32 %v3322_v36, %v3300_v47  ;;  %v3301_v9 = vmax.f32 %v3255_v3, 0.0  ;;  %v3302_v53 = vmax.f32 %v3294_v0, 0.0  ;;  %v3296_v58 = vadd.f32 %v3295_v8, %v3070_v14 }
 0x481   :  { %v3257_v37 = vpop.f32.mrf.mxu0  ;;  %v3297_v21 = vpop.f32.mrf.mxu1 }
 0x482   :  { %v3331_v48 = vadd.f32 %v3323_v46, %v3301_v9  ;;  %v3332_v28 = vadd.f32 %v3324_v17, %v3302_v53  ;;  %v3303_v11 = vmax.f32 %v3296_v58, 0.0  ;;  %v3334_v57 = vmax.f32 %v3330_v56, 0.0 }
 0x483   :  { %v3298_v10 = vpop.f32.mrf.mxu1 }
 0x484   :  { %v3335_v6 = vmax.f32 %v3331_v48, 0.0  ;;  %v3333_v54 = vadd.f32 %v3325_v20, %v3303_v11  ;;  %v3336_v63 = vmax.f32 %v3332_v28, 0.0 }
 0x486   :  { %v3340_v25 = vcombine.low %v3334_v57, %v3335_v6  ;;  %v3337_v38 = vmax.f32 %v3333_v54, 0.0 }
 0x488   :  { %3342 = vst [vmem:[%s5137_s7] sm:$0xff] %v3340_v25  ;;  %v3345_v43 = vcombine.low %v3336_v63, %v3337_v38 }
 0x48a   :  { %3528 = vst [vmem:[%s5137_s7 + $0x8] sm:$0xff] %v3345_v43 }
 0x48b   :  { %3353 = vsyncpa [#allocation5], 1 }

</bundles_post_ra>
